<compile_context>
chip_gen: v7x
topology: tpu7x:2x2x1
jax: 0.10.0
libtpu: 0.0.40
codegen_flags: <defaults>
</compile_context>

<pallas_src>
import functools
import math

import jax
import jax.numpy as jnp
import numpy as np
from jax.experimental import pallas as pl
from jax.experimental.pallas import tpu as pltpu

NEG_INF = -1e18
MXU_DTYPE = jnp.bfloat16   # MXU-input dtype; accumulation stays f32.


# ---------------------------------------------------------------------------
# Kernel helpers
# ---------------------------------------------------------------------------
def _layer_norm(x, g, b, eps=1e-6):
    mu = jnp.mean(x, axis=-1, keepdims=True)
    xc = x - mu
    var = jnp.mean(xc * xc, axis=-1, keepdims=True)
    return xc * jax.lax.rsqrt(var + eps) * g + b


def _attention(q, k, v, bias, heads):
    """Head-batched attention for one batch element.

    q: (Sq, D), k/v: (Sk, D) f32 (1/sqrt(dh) already folded into the Q proj),
    bias: (1, Sk) additive mask (0 allowed / -1e18 masked).
    Returns head-major context (H, Sq, dh) in f32."""
    sq, d = q.shape
    sk = k.shape[0]
    dh = d // heads

    qh = q.reshape(sq, heads, dh).astype(MXU_DTYPE)
    kh = k.reshape(sk, heads, dh).astype(MXU_DTYPE)
    vh = v.reshape(sk, heads, dh).astype(MXU_DTYPE)

    scores = jnp.einsum("qhd,khd->hqk", qh, kh,
                        preferred_element_type=jnp.float32)     # (H, Sq, Sk)
    scores = scores + bias                                       # (1,Sk) broadcast

    m = jnp.max(scores, axis=-1, keepdims=True)
    e = jnp.exp(scores - m)
    denom = jnp.sum(e, axis=-1, keepdims=True)
    p = e * pl.reciprocal(denom, approx=True)                    # EUP slot

    ctx = jnp.einsum("hqk,khd->hqd", p.astype(MXU_DTYPE), vh,
                     preferred_element_type=jnp.float32)         # (H, Sq, dh)
    return ctx


def _head_output_proj(ctx_h, wo_h):
    """(H,Sq,dh) x (H,dh,D) -> (Sq,D): batched matmul + sum over heads.
    Folds the output projection into the head contraction so the lane-narrow
    (Sq, H*dh) relayout never materializes."""
    per_head = jnp.einsum("hqd,hdD->hqD", ctx_h.astype(wo_h.dtype), wo_h,
                          preferred_element_type=jnp.float32)    # (H, Sq, D)
    return jnp.sum(per_head, axis=0)


# ---------------------------------------------------------------------------
# Kernel (one batch element per grid step)
# ---------------------------------------------------------------------------
def ntel_kernel(heads,
                x_ref, key_ref, val_ref, smask_ref, cmask_ref,
                ln_ref, sa_wqkv_ref, sa_bqkv_ref, sa_wo_ref,
                ca_wqkv_ref, ca_wo_ref, bvec_ref,
                w1_ref, b1_ref, w2_ref,
                o_ref):
    x = x_ref[...]                   # (S, D) f32
    key = key_ref[...]               # (Skv, D)
    value = val_ref[...]             # (Skv, D)
    D = x.shape[-1]

    # Additive mask bias built in-kernel from the small per-batch mask rows.
    self_bias = jnp.where(smask_ref[...] > 0.5, NEG_INF, 0.0)    # (1, S)
    cross_bias = jnp.where(cmask_ref[...] > 0.5, NEG_INF, 0.0)   # (1, Skv)

    ln = ln_ref[...]                 # (6, D): [i_g, i_b, q_g, q_b, ff_g, ff_b]
    bvec = bvec_ref[...]             # (6, D): [sa_bo, ca_bq, ca_bk, ca_bv, ca_bo, b2]

    # ---- self-attention: LN_i -> fused QKV -> attn -> head-folded Wo -> +res
    input_norm = _layer_norm(x, ln[0:1], ln[1:2])
    sa_w = sa_wqkv_ref[...]          # (D, 3D) bf16, Q cols pre-scaled
    qkv = jnp.dot(input_norm.astype(sa_w.dtype), sa_w,
                  preferred_element_type=jnp.float32) + sa_bqkv_ref[...]
    q, k, v = qkv[:, :D], qkv[:, D:2 * D], qkv[:, 2 * D:]
    ctx = _attention(q, k, v, self_bias, heads)
    query = _head_output_proj(ctx, sa_wo_ref[...]) + bvec[0:1] + x

    # ---- cross-attention (K/V come from different tensors -> separate dots)
    query_norm = _layer_norm(query, ln[2:3], ln[3:4])
    qc = jnp.dot(query_norm.astype(MXU_DTYPE), ca_wqkv_ref[0],
                 preferred_element_type=jnp.float32) + bvec[1:2]
    kc = jnp.dot(key.astype(MXU_DTYPE), ca_wqkv_ref[1],
                 preferred_element_type=jnp.float32) + bvec[2:3]
    vc = jnp.dot(value.astype(MXU_DTYPE), ca_wqkv_ref[2],
                 preferred_element_type=jnp.float32) + bvec[3:4]
    ctx2 = _attention(qc, kc, vc, cross_bias, heads)
    out = _head_output_proj(ctx2, ca_wo_ref[...]) + bvec[4:5] + query

    # ---- PositionwiseFeedForward: LN -> W1 -> ReLU -> W2 -> +residual
    ff_in = _layer_norm(out, ln[4:5], ln[5:6])
    inter = jnp.maximum(
        jnp.dot(ff_in.astype(MXU_DTYPE), w1_ref[...],
                preferred_element_type=jnp.float32) + b1_ref[...], 0.0)
    result = jnp.dot(inter.astype(MXU_DTYPE), w2_ref[...],
                     preferred_element_type=jnp.float32) + bvec[5:6] + out

    o_ref[...] = result.astype(o_ref.dtype)


# ---------------------------------------------------------------------------
# One-time parameter packing (hoisted out of the forward path)
# ---------------------------------------------------------------------------
def pack_params(params, heads):
    """Pack/cast parameters once: folds 1/sqrt(dh) into the Q projections,
    pre-casts MXU weights to bf16 and groups tiny tensors into a few arrays."""
    D = params["sa_wq"].shape[0]
    dh = D // heads
    scale = 1.0 / math.sqrt(dh)

    ln_pack = jnp.concatenate(
        [params["ln_i_g"], params["ln_i_b"],
         params["ln_q_g"], params["ln_q_b"],
         params["ln_ff_g"], params["ln_ff_b"]], axis=0).astype(jnp.float32)

    sa_wqkv = jnp.concatenate(
        [params["sa_wq"] * scale, params["sa_wk"], params["sa_wv"]],
        axis=1).astype(MXU_DTYPE)                                      # (D, 3D)
    sa_bqkv = jnp.concatenate(
        [params["sa_bq"] * scale, params["sa_bk"], params["sa_bv"]],
        axis=1).astype(jnp.float32)                                    # (1, 3D)
    sa_wo_h = params["sa_wo"].reshape(heads, dh, D).astype(MXU_DTYPE)  # (H, dh, D)

    ca_wqkv = jnp.stack(
        [params["ca_wq"] * scale, params["ca_wk"], params["ca_wv"]],
        axis=0).astype(MXU_DTYPE)                                      # (3, D, D)
    ca_wo_h = params["ca_wo"].reshape(heads, dh, D).astype(MXU_DTYPE)  # (H, dh, D)

    bvec = jnp.concatenate(
        [params["sa_bo"], params["ca_bq"] * scale, params["ca_bk"],
         params["ca_bv"], params["ca_bo"], params["b2"]],
        axis=0).astype(jnp.float32)                                    # (6, D)

    return dict(
        ln_pack=ln_pack, sa_wqkv=sa_wqkv, sa_bqkv=sa_bqkv, sa_wo_h=sa_wo_h,
        ca_wqkv=ca_wqkv, ca_wo_h=ca_wo_h, bvec=bvec,
        w1=params["w1"].astype(MXU_DTYPE),
        b1=params["b1"].astype(jnp.float32),
        w2=params["w2"].astype(MXU_DTYPE))


# ---------------------------------------------------------------------------
# Wrapper
# ---------------------------------------------------------------------------
def ntransformer_encoder_layer(inputs, key, value, src_mask, mask, packed, heads):
    B, S, D = inputs.shape
    _, Skv, _ = key.shape
    DFF = packed["w1"].shape[1]
    H = heads

    batched = [inputs, key, value, src_mask, mask]
    weights = [packed["ln_pack"], packed["sa_wqkv"], packed["sa_bqkv"],
               packed["sa_wo_h"], packed["ca_wqkv"], packed["ca_wo_h"],
               packed["bvec"], packed["w1"], packed["b1"], packed["w2"]]

    def batch_spec(a):
        # Squeeze the batch dim: one batch element per grid step.
        return pl.BlockSpec((None,) + tuple(a.shape[1:]),
                            lambda b: (b,) + (0,) * (a.ndim - 1))

    def resident_spec(a):
        # Constant block index across the grid -> DMA'd once, stays in VMEM.
        return pl.BlockSpec(tuple(a.shape), lambda b, n=a.ndim: (0,) * n)

    in_specs = [batch_spec(a) for a in batched] + [resident_spec(a) for a in weights]

    flops = B * (
        2 * S * D * 3 * D            # fused self QKV projection
        + 4 * S * S * D              # self-attn scores + context
        + 2 * S * D * D              # self-attn output projection
        + 2 * S * D * D              # cross Q projection
        + 2 * 2 * Skv * D * D        # cross K, V projections
        + 4 * S * Skv * D            # cross scores + context
        + 2 * S * D * D              # cross output projection
        + 2 * S * D * DFF            # FFN W1
        + 2 * S * DFF * D)           # FFN W2
    transcendentals = B * (H * S * (S + Skv) + 3 * S + 2 * H * S)
    bytes_accessed = int(
        sum(int(a.size) * a.dtype.itemsize for a in batched + weights)
        + B * S * D * 4)

    out = pl.pallas_call(
        functools.partial(ntel_kernel, heads),
        out_shape=jax.ShapeDtypeStruct((B, S, D), jnp.float32),
        grid_spec=pltpu.PrefetchScalarGridSpec(
            num_scalar_prefetch=0,
            grid=(B,),
            in_specs=in_specs,
            out_specs=pl.BlockSpec((None, S, D), lambda b: (b, 0, 0)),
        ),
        compiler_params=pltpu.CompilerParams(
            dimension_semantics=("parallel",),
            vmem_limit_bytes=64 * 1024 * 1024),
        cost_estimate=pl.CostEstimate(
            flops=flops,
            transcendentals=transcendentals,
            bytes_accessed=bytes_accessed),
    )(*batched, *weights)

    return out


# ---------------------------------------------------------------------------
# Pure-JAX reference (mirrors the PyTorch module in eval mode, f32)
# ---------------------------------------------------------------------------
def reference_forward(inputs, key, value, src_mask, mask, p, heads):
    def ln(x, g, b):
        mu = jnp.mean(x, -1, keepdims=True)
        var = jnp.mean((x - mu) ** 2, -1, keepdims=True)
        return (x - mu) / jnp.sqrt(var + 1e-6) * g[0] + b[0]

    def mha(q_in, k_in, v_in, msk, wq, bq, wk, bk, wv, bv, wo, bo):
        B, Sq, D = q_in.shape
        Sk = k_in.shape[1]
        dh = D // heads
        Q = (q_in @ wq + bq[0]).reshape(B, Sq, heads, dh).transpose(0, 2, 1, 3)
        K = (k_in @ wk + bk[0]).reshape(B, Sk, heads, dh).transpose(0, 2, 1, 3)
        V = (v_in @ wv + bv[0]).reshape(B, Sk, heads, dh).transpose(0, 2, 1, 3)
        scores = jnp.einsum("bhqd,bhkd->bhqk", Q * (1.0 / math.sqrt(dh)), K)
        scores = jnp.where(msk[:, None, :, :] > 0.5, NEG_INF, scores)
        pattn = jax.nn.softmax(scores, axis=-1)
        ctx = jnp.einsum("bhqk,bhkd->bhqd", pattn, V)
        ctx = ctx.transpose(0, 2, 1, 3).reshape(B, Sq, D)
        return ctx @ wo + bo[0]

    input_norm = ln(inputs, p["ln_i_g"], p["ln_i_b"])
    query = mha(input_norm, input_norm, input_norm, src_mask,
                p["sa_wq"], p["sa_bq"], p["sa_wk"], p["sa_bk"],
                p["sa_wv"], p["sa_bv"], p["sa_wo"], p["sa_bo"]) + inputs
    query_norm = ln(query, p["ln_q_g"], p["ln_q_b"])
    out = mha(query_norm, key, value, mask,
              p["ca_wq"], p["ca_bq"], p["ca_wk"], p["ca_bk"],
              p["ca_wv"], p["ca_bv"], p["ca_wo"], p["ca_bo"]) + query
    ff_in = ln(out, p["ln_ff_g"], p["ln_ff_b"])
    inter = jnp.maximum(ff_in @ p["w1"] + p["b1"][0], 0.0)
    return inter @ p["w2"] + p["b2"][0] + out


# ---------------------------------------------------------------------------
# Main
# ---------------------------------------------------------------------------
if __name__ == "__main__":
    B, S, SKV, D, HEADS, DFF = 2, 8, 8, 32, 4, 64

    root = jax.random.PRNGKey(0)
    keys = jax.random.split(root, 32)
    ki = iter(keys)

    def w(shape, scale=0.1):
        return (scale * jax.random.normal(next(ki), shape)).astype(jnp.float32)

    params = {
        "ln_i_g": jnp.ones((1, D), jnp.float32), "ln_i_b": jnp.zeros((1, D), jnp.float32),
        "sa_wq": w((D, D)), "sa_bq": w((1, D)),
        "sa_wk": w((D, D)), "sa_bk": w((1, D)),
        "sa_wv": w((D, D)), "sa_bv": w((1, D)),
        "sa_wo": w((D, D)), "sa_bo": w((1, D)),
        "ln_q_g": jnp.ones((1, D), jnp.float32), "ln_q_b": jnp.zeros((1, D), jnp.float32),
        "ca_wq": w((D, D)), "ca_bq": w((1, D)),
        "ca_wk": w((D, D)), "ca_bk": w((1, D)),
        "ca_wv": w((D, D)), "ca_bv": w((1, D)),
        "ca_wo": w((D, D)), "ca_bo": w((1, D)),
        "ln_ff_g": jnp.ones((1, D), jnp.float32), "ln_ff_b": jnp.zeros((1, D), jnp.float32),
        "w1": w((D, DFF)), "b1": w((1, DFF)),
        "w2": w((DFF, D)), "b2": w((1, D)),
    }

    inputs = jax.random.normal(next(ki), (B, S, D), jnp.float32)
    key = jax.random.normal(next(ki), (B, SKV, D), jnp.float32)
    value = jax.random.normal(next(ki), (B, SKV, D), jnp.float32)

    # masks: 1.0 == masked (onmt ByteTensor semantics); mask out the last kv position
    src_mask = jnp.zeros((B, 1, S), jnp.float32).at[:, :, -1].set(1.0)
    mask = jnp.zeros((B, 1, SKV), jnp.float32).at[:, :, -1].set(1.0)

    packed = pack_params(params, HEADS)   # one-time packing, hoisted out of forward

    out = ntransformer_encoder_layer(inputs, key, value, src_mask, mask, packed, HEADS)
    out = jax.block_until_ready(out)

    ref = reference_forward(inputs, key, value, src_mask, mask, params, HEADS)
    # Tolerance relaxed vs. the pure-f32 version: MXU inputs are bf16
    # (LN / softmax / accumulation remain f32).
    np.testing.assert_allclose(np.asarray(out), np.asarray(ref), rtol=2e-2, atol=2e-2)

    print("KERNEL_OK")
</pallas_src>

<mosaic_0001>
module attributes {stable_mosaic.version = 11 : i64} {
  func.func @ntel_kernel(%arg0: i32, %arg1: memref<1x8x32xf32, #tpu.memory_space<vmem>>, %arg2: memref<1x8x32xf32, #tpu.memory_space<vmem>>, %arg3: memref<1x8x32xf32, #tpu.memory_space<vmem>>, %arg4: memref<1x1x8xf32, #tpu.memory_space<vmem>>, %arg5: memref<1x1x8xf32, #tpu.memory_space<vmem>>, %arg6: memref<6x32xf32, #tpu.memory_space<vmem>>, %arg7: memref<32x96xbf16, #tpu.memory_space<vmem>>, %arg8: memref<1x96xf32, #tpu.memory_space<vmem>>, %arg9: memref<4x8x32xbf16, #tpu.memory_space<vmem>>, %arg10: memref<3x32x32xbf16, #tpu.memory_space<vmem>>, %arg11: memref<4x8x32xbf16, #tpu.memory_space<vmem>>, %arg12: memref<6x32xf32, #tpu.memory_space<vmem>>, %arg13: memref<32x64xbf16, #tpu.memory_space<vmem>>, %arg14: memref<1x64xf32, #tpu.memory_space<vmem>>, %arg15: memref<64x32xbf16, #tpu.memory_space<vmem>>, %arg16: memref<1x8x32xf32, #tpu.memory_space<vmem>>) attributes {dimension_semantics = [#tpu.dimension_semantics<parallel>], iteration_bounds = array<i64: 2>, scalar_prefetch = 0 : i64, scratch_operands = 0 : i64, tpu.core_type = #tpu.core_type<tc>, window_params = [{transform_indices = @transform_0, window_bounds = array<i64: 1, 8, 32>}, {transform_indices = @transform_1, window_bounds = array<i64: 1, 8, 32>}, {transform_indices = @transform_2, window_bounds = array<i64: 1, 8, 32>}, {transform_indices = @transform_3, window_bounds = array<i64: 1, 1, 8>}, {transform_indices = @transform_4, window_bounds = array<i64: 1, 1, 8>}, {pipeline_mode = #tpu.pipeline_mode<synchronous>, transform_indices = @transform_5, window_bounds = array<i64: 6, 32>}, {pipeline_mode = #tpu.pipeline_mode<synchronous>, transform_indices = @transform_6, window_bounds = array<i64: 32, 96>}, {pipeline_mode = #tpu.pipeline_mode<synchronous>, transform_indices = @transform_7, window_bounds = array<i64: 1, 96>}, {pipeline_mode = #tpu.pipeline_mode<synchronous>, transform_indices = @transform_8, window_bounds = array<i64: 4, 8, 32>}, {pipeline_mode = #tpu.pipeline_mode<synchronous>, transform_indices = @transform_9, window_bounds = array<i64: 3, 32, 32>}, {pipeline_mode = #tpu.pipeline_mode<synchronous>, transform_indices = @transform_10, window_bounds = array<i64: 4, 8, 32>}, {pipeline_mode = #tpu.pipeline_mode<synchronous>, transform_indices = @transform_11, window_bounds = array<i64: 6, 32>}, {pipeline_mode = #tpu.pipeline_mode<synchronous>, transform_indices = @transform_12, window_bounds = array<i64: 32, 64>}, {pipeline_mode = #tpu.pipeline_mode<synchronous>, transform_indices = @transform_13, window_bounds = array<i64: 1, 64>}, {pipeline_mode = #tpu.pipeline_mode<synchronous>, transform_indices = @transform_14, window_bounds = array<i64: 64, 32>}, {transform_indices = @transform_15, window_bounds = array<i64: 1, 8, 32>}]} {
    %c0 = arith.constant 0 : index
    %c0_0 = arith.constant 0 : index
    %c0_1 = arith.constant 0 : index
    %0 = vector.load %arg1[%c0, %c0_0, %c0_1] : memref<1x8x32xf32, #tpu.memory_space<vmem>>, vector<1x8x32xf32>
    %1 = vector.shape_cast %0 : vector<1x8x32xf32> to vector<8x32xf32>
    %c0_2 = arith.constant 0 : index
    %c0_3 = arith.constant 0 : index
    %c0_4 = arith.constant 0 : index
    %2 = vector.load %arg2[%c0_2, %c0_3, %c0_4] : memref<1x8x32xf32, #tpu.memory_space<vmem>>, vector<1x8x32xf32>
    %3 = vector.shape_cast %2 : vector<1x8x32xf32> to vector<8x32xf32>
    %c0_5 = arith.constant 0 : index
    %c0_6 = arith.constant 0 : index
    %c0_7 = arith.constant 0 : index
    %4 = vector.load %arg3[%c0_5, %c0_6, %c0_7] : memref<1x8x32xf32, #tpu.memory_space<vmem>>, vector<1x8x32xf32>
    %5 = vector.shape_cast %4 : vector<1x8x32xf32> to vector<8x32xf32>
    %c0_8 = arith.constant 0 : index
    %c0_9 = arith.constant 0 : index
    %c0_10 = arith.constant 0 : index
    %6 = vector.load %arg4[%c0_8, %c0_9, %c0_10] : memref<1x1x8xf32, #tpu.memory_space<vmem>>, vector<1x1x8xf32>
    %7 = vector.shape_cast %6 : vector<1x1x8xf32> to vector<1x8xf32>
    %cst = arith.constant 5.000000e-01 : f32
    %8 = vector.broadcast %cst : f32 to vector<1x8xf32>
    %9 = arith.cmpf ogt, %7, %8 : vector<1x8xf32>
    %cst_11 = arith.constant -9.99999984E+17 : f32
    %cst_12 = arith.constant 0.000000e+00 : f32
    %10 = vector.broadcast %cst_11 : f32 to vector<1x8xf32>
    %11 = vector.broadcast %cst_12 : f32 to vector<1x8xf32>
    %12 = arith.select %9, %10, %11 : vector<1x8xi1>, vector<1x8xf32>
    %c0_13 = arith.constant 0 : index
    %c0_14 = arith.constant 0 : index
    %c0_15 = arith.constant 0 : index
    %13 = vector.load %arg5[%c0_13, %c0_14, %c0_15] : memref<1x1x8xf32, #tpu.memory_space<vmem>>, vector<1x1x8xf32>
    %14 = vector.shape_cast %13 : vector<1x1x8xf32> to vector<1x8xf32>
    %cst_16 = arith.constant 5.000000e-01 : f32
    %15 = vector.broadcast %cst_16 : f32 to vector<1x8xf32>
    %16 = arith.cmpf ogt, %14, %15 : vector<1x8xf32>
    %cst_17 = arith.constant -9.99999984E+17 : f32
    %cst_18 = arith.constant 0.000000e+00 : f32
    %17 = vector.broadcast %cst_17 : f32 to vector<1x8xf32>
    %18 = vector.broadcast %cst_18 : f32 to vector<1x8xf32>
    %19 = arith.select %16, %17, %18 : vector<1x8xi1>, vector<1x8xf32>
    %c0_19 = arith.constant 0 : index
    %c0_20 = arith.constant 0 : index
    %20 = vector.load %arg6[%c0_19, %c0_20] : memref<6x32xf32, #tpu.memory_space<vmem>>, vector<6x32xf32>
    %c0_21 = arith.constant 0 : index
    %c0_22 = arith.constant 0 : index
    %21 = vector.load %arg12[%c0_21, %c0_22] : memref<6x32xf32, #tpu.memory_space<vmem>>, vector<6x32xf32>
    %22 = vector.extract_strided_slice %20 {offsets = [0, 0], sizes = [1, 32], strides = [1, 1]} : vector<6x32xf32> to vector<1x32xf32>
    %23 = vector.extract_strided_slice %20 {offsets = [1, 0], sizes = [1, 32], strides = [1, 1]} : vector<6x32xf32> to vector<1x32xf32>
    %cst_23 = arith.constant dense<0.000000e+00> : vector<8xf32>
    %24 = vector.multi_reduction <add>, %1, %cst_23 [1] : vector<8x32xf32> to vector<8xf32>
    %25 = vector.shape_cast %24 : vector<8xf32> to vector<8x1xf32>
    %cst_24 = arith.constant 3.200000e+01 : f32
    %26 = vector.broadcast %cst_24 : f32 to vector<8x1xf32>
    %27 = arith.divf %25, %26 : vector<8x1xf32>
    %28 = vector.broadcast %27 : vector<8x1xf32> to vector<8x32xf32>
    %29 = arith.subf %1, %28 : vector<8x32xf32>
    %30 = arith.mulf %29, %29 : vector<8x32xf32>
    %cst_25 = arith.constant dense<0.000000e+00> : vector<8xf32>
    %31 = vector.multi_reduction <add>, %30, %cst_25 [1] : vector<8x32xf32> to vector<8xf32>
    %32 = vector.shape_cast %31 : vector<8xf32> to vector<8x1xf32>
    %cst_26 = arith.constant 3.200000e+01 : f32
    %33 = vector.broadcast %cst_26 : f32 to vector<8x1xf32>
    %34 = arith.divf %32, %33 : vector<8x1xf32>
    %cst_27 = arith.constant 9.99999997E-7 : f32
    %35 = vector.broadcast %cst_27 : f32 to vector<8x1xf32>
    %36 = arith.addf %34, %35 : vector<8x1xf32>
    %37 = math.rsqrt %36 : vector<8x1xf32>
    %38 = vector.broadcast %37 : vector<8x1xf32> to vector<8x32xf32>
    %39 = arith.mulf %29, %38 : vector<8x32xf32>
    %40 = vector.broadcast %22 : vector<1x32xf32> to vector<8x32xf32>
    %41 = arith.mulf %39, %40 : vector<8x32xf32>
    %42 = vector.broadcast %23 : vector<1x32xf32> to vector<8x32xf32>
    %43 = arith.addf %41, %42 : vector<8x32xf32>
    %c0_28 = arith.constant 0 : index
    %c0_29 = arith.constant 0 : index
    %44 = vector.load %arg7[%c0_28, %c0_29] : memref<32x96xbf16, #tpu.memory_space<vmem>>, vector<32x96xbf16>
    %45 = arith.truncf %43 : vector<8x32xf32> to vector<8x32xbf16>
    %cst_30 = arith.constant dense<0.000000e+00> : vector<8x96xf32>
    %46 = tpu.matmul %45, %44, %cst_30 {dimension_numbers = #tpu.dot_dimension_numbers<[1], [0], [0], [1], [0, 0, 1, 1], [], []>} : vector<8x32xbf16>, vector<32x96xbf16>, vector<8x96xf32> -> vector<8x96xf32>
    %c0_31 = arith.constant 0 : index
    %c0_32 = arith.constant 0 : index
    %47 = vector.load %arg8[%c0_31, %c0_32] : memref<1x96xf32, #tpu.memory_space<vmem>>, vector<1x96xf32>
    %48 = vector.broadcast %47 : vector<1x96xf32> to vector<8x96xf32>
    %49 = arith.addf %46, %48 : vector<8x96xf32>
    %50 = vector.extract_strided_slice %49 {offsets = [0, 0], sizes = [8, 32], strides = [1, 1]} : vector<8x96xf32> to vector<8x32xf32>
    %51 = vector.extract_strided_slice %49 {offsets = [0, 32], sizes = [8, 32], strides = [1, 1]} : vector<8x96xf32> to vector<8x32xf32>
    %52 = vector.extract_strided_slice %49 {offsets = [0, 64], sizes = [8, 32], strides = [1, 1]} : vector<8x96xf32> to vector<8x32xf32>
    %53 = vector.shape_cast %50 : vector<8x32xf32> to vector<8x4x8xf32>
    %54 = arith.truncf %53 : vector<8x4x8xf32> to vector<8x4x8xbf16>
    %55 = vector.shape_cast %51 : vector<8x32xf32> to vector<8x4x8xf32>
    %56 = arith.truncf %55 : vector<8x4x8xf32> to vector<8x4x8xbf16>
    %57 = vector.shape_cast %52 : vector<8x32xf32> to vector<8x4x8xf32>
    %58 = arith.truncf %57 : vector<8x4x8xf32> to vector<8x4x8xbf16>
    "tpu.trace_start"() <{level = 10 : i32, message = "qhd,khd->hqk"}> : () -> ()
    %cst_33 = arith.constant dense<0.000000e+00> : vector<4x8x8xf32>
    %59 = tpu.matmul %54, %56, %cst_33 {dimension_numbers = #tpu.dot_dimension_numbers<[2], [2], [0], [0], [0, 1, 0, 0, 1, 0], [1], [1]>} : vector<8x4x8xbf16>, vector<8x4x8xbf16>, vector<4x8x8xf32> -> vector<4x8x8xf32>
    "tpu.trace_stop"() : () -> ()
    %60 = vector.shape_cast %12 : vector<1x8xf32> to vector<1x1x8xf32>
    %61 = vector.broadcast %60 : vector<1x1x8xf32> to vector<4x8x8xf32>
    %62 = arith.addf %59, %61 : vector<4x8x8xf32>
    %cst_34 = arith.constant dense<0xFF800000> : vector<4x8xf32>
    %63 = vector.multi_reduction <maximumf>, %62, %cst_34 [2] : vector<4x8x8xf32> to vector<4x8xf32>
    %64 = vector.shape_cast %63 : vector<4x8xf32> to vector<4x8x1xf32>
    %65 = vector.broadcast %64 : vector<4x8x1xf32> to vector<4x8x8xf32>
    %66 = arith.subf %62, %65 : vector<4x8x8xf32>
    %67 = math.exp %66 : vector<4x8x8xf32>
    %cst_35 = arith.constant dense<0.000000e+00> : vector<4x8xf32>
    %68 = vector.multi_reduction <add>, %67, %cst_35 [2] : vector<4x8x8xf32> to vector<4x8xf32>
    %69 = vector.shape_cast %68 : vector<4x8xf32> to vector<4x8x1xf32>
    %70 = tpu.reciprocal %69 {approx = true} : vector<4x8x1xf32> -> vector<4x8x1xf32>
    %71 = vector.broadcast %70 : vector<4x8x1xf32> to vector<4x8x8xf32>
    %72 = arith.mulf %67, %71 : vector<4x8x8xf32>
    %73 = arith.truncf %72 : vector<4x8x8xf32> to vector<4x8x8xbf16>
    "tpu.trace_start"() <{level = 10 : i32, message = "hqk,khd->hqd"}> : () -> ()
    %cst_36 = arith.constant dense<0.000000e+00> : vector<4x8x8xf32>
    %74 = tpu.matmul %73, %58, %cst_36 {dimension_numbers = #tpu.dot_dimension_numbers<[2], [0], [1], [2], [0, 0, 0, 1, 1, 2], [0], [1]>} : vector<4x8x8xbf16>, vector<8x4x8xbf16>, vector<4x8x8xf32> -> vector<4x8x8xf32>
    "tpu.trace_stop"() : () -> ()
    %c0_37 = arith.constant 0 : index
    %c0_38 = arith.constant 0 : index
    %c0_39 = arith.constant 0 : index
    %75 = vector.load %arg9[%c0_37, %c0_38, %c0_39] : memref<4x8x32xbf16, #tpu.memory_space<vmem>>, vector<4x8x32xbf16>
    %76 = arith.truncf %74 : vector<4x8x8xf32> to vector<4x8x8xbf16>
    "tpu.trace_start"() <{level = 10 : i32, message = "hqd,hdD->hqD"}> : () -> ()
    %cst_40 = arith.constant dense<0.000000e+00> : vector<4x8x32xf32>
    %77 = tpu.matmul %76, %75, %cst_40 {dimension_numbers = #tpu.dot_dimension_numbers<[2], [1], [1], [2], [0, 0, 0, 1, 1, 2], [0], [0]>} : vector<4x8x8xbf16>, vector<4x8x32xbf16>, vector<4x8x32xf32> -> vector<4x8x32xf32>
    "tpu.trace_stop"() : () -> ()
    %cst_41 = arith.constant dense<0.000000e+00> : vector<8x32xf32>
    %78 = vector.multi_reduction <add>, %77, %cst_41 [0] : vector<4x8x32xf32> to vector<8x32xf32>
    %79 = vector.extract_strided_slice %21 {offsets = [0, 0], sizes = [1, 32], strides = [1, 1]} : vector<6x32xf32> to vector<1x32xf32>
    %80 = vector.broadcast %79 : vector<1x32xf32> to vector<8x32xf32>
    %81 = arith.addf %78, %80 : vector<8x32xf32>
    %82 = arith.addf %81, %1 : vector<8x32xf32>
    %83 = vector.extract_strided_slice %20 {offsets = [2, 0], sizes = [1, 32], strides = [1, 1]} : vector<6x32xf32> to vector<1x32xf32>
    %84 = vector.extract_strided_slice %20 {offsets = [3, 0], sizes = [1, 32], strides = [1, 1]} : vector<6x32xf32> to vector<1x32xf32>
    %cst_42 = arith.constant dense<0.000000e+00> : vector<8xf32>
    %85 = vector.multi_reduction <add>, %82, %cst_42 [1] : vector<8x32xf32> to vector<8xf32>
    %86 = vector.shape_cast %85 : vector<8xf32> to vector<8x1xf32>
    %cst_43 = arith.constant 3.200000e+01 : f32
    %87 = vector.broadcast %cst_43 : f32 to vector<8x1xf32>
    %88 = arith.divf %86, %87 : vector<8x1xf32>
    %89 = vector.broadcast %88 : vector<8x1xf32> to vector<8x32xf32>
    %90 = arith.subf %82, %89 : vector<8x32xf32>
    %91 = arith.mulf %90, %90 : vector<8x32xf32>
    %cst_44 = arith.constant dense<0.000000e+00> : vector<8xf32>
    %92 = vector.multi_reduction <add>, %91, %cst_44 [1] : vector<8x32xf32> to vector<8xf32>
    %93 = vector.shape_cast %92 : vector<8xf32> to vector<8x1xf32>
    %cst_45 = arith.constant 3.200000e+01 : f32
    %94 = vector.broadcast %cst_45 : f32 to vector<8x1xf32>
    %95 = arith.divf %93, %94 : vector<8x1xf32>
    %cst_46 = arith.constant 9.99999997E-7 : f32
    %96 = vector.broadcast %cst_46 : f32 to vector<8x1xf32>
    %97 = arith.addf %95, %96 : vector<8x1xf32>
    %98 = math.rsqrt %97 : vector<8x1xf32>
    %99 = vector.broadcast %98 : vector<8x1xf32> to vector<8x32xf32>
    %100 = arith.mulf %90, %99 : vector<8x32xf32>
    %101 = vector.broadcast %83 : vector<1x32xf32> to vector<8x32xf32>
    %102 = arith.mulf %100, %101 : vector<8x32xf32>
    %103 = vector.broadcast %84 : vector<1x32xf32> to vector<8x32xf32>
    %104 = arith.addf %102, %103 : vector<8x32xf32>
    %105 = arith.truncf %104 : vector<8x32xf32> to vector<8x32xbf16>
    %c0_47 = arith.constant 0 : index
    %c0_48 = arith.constant 0 : index
    %c0_49 = arith.constant 0 : index
    %106 = vector.load %arg10[%c0_47, %c0_48, %c0_49] : memref<3x32x32xbf16, #tpu.memory_space<vmem>>, vector<1x32x32xbf16>
    %107 = vector.shape_cast %106 : vector<1x32x32xbf16> to vector<32x32xbf16>
    %cst_50 = arith.constant dense<0.000000e+00> : vector<8x32xf32>
    %108 = tpu.matmul %105, %107, %cst_50 {dimension_numbers = #tpu.dot_dimension_numbers<[1], [0], [0], [1], [0, 0, 1, 1], [], []>} : vector<8x32xbf16>, vector<32x32xbf16>, vector<8x32xf32> -> vector<8x32xf32>
    %109 = vector.extract_strided_slice %21 {offsets = [1, 0], sizes = [1, 32], strides = [1, 1]} : vector<6x32xf32> to vector<1x32xf32>
    %110 = vector.broadcast %109 : vector<1x32xf32> to vector<8x32xf32>
    %111 = arith.addf %108, %110 : vector<8x32xf32>
    %112 = arith.truncf %3 : vector<8x32xf32> to vector<8x32xbf16>
    %c1 = arith.constant 1 : index
    %c0_51 = arith.constant 0 : index
    %c0_52 = arith.constant 0 : index
    %113 = vector.load %arg10[%c1, %c0_51, %c0_52] : memref<3x32x32xbf16, #tpu.memory_space<vmem>>, vector<1x32x32xbf16>
    %114 = vector.shape_cast %113 : vector<1x32x32xbf16> to vector<32x32xbf16>
    %cst_53 = arith.constant dense<0.000000e+00> : vector<8x32xf32>
    %115 = tpu.matmul %112, %114, %cst_53 {dimension_numbers = #tpu.dot_dimension_numbers<[1], [0], [0], [1], [0, 0, 1, 1], [], []>} : vector<8x32xbf16>, vector<32x32xbf16>, vector<8x32xf32> -> vector<8x32xf32>
    %116 = vector.extract_strided_slice %21 {offsets = [2, 0], sizes = [1, 32], strides = [1, 1]} : vector<6x32xf32> to vector<1x32xf32>
    %117 = vector.broadcast %116 : vector<1x32xf32> to vector<8x32xf32>
    %118 = arith.addf %115, %117 : vector<8x32xf32>
    %119 = arith.truncf %5 : vector<8x32xf32> to vector<8x32xbf16>
    %c2 = arith.constant 2 : index
    %c0_54 = arith.constant 0 : index
    %c0_55 = arith.constant 0 : index
    %120 = vector.load %arg10[%c2, %c0_54, %c0_55] : memref<3x32x32xbf16, #tpu.memory_space<vmem>>, vector<1x32x32xbf16>
    %121 = vector.shape_cast %120 : vector<1x32x32xbf16> to vector<32x32xbf16>
    %cst_56 = arith.constant dense<0.000000e+00> : vector<8x32xf32>
    %122 = tpu.matmul %119, %121, %cst_56 {dimension_numbers = #tpu.dot_dimension_numbers<[1], [0], [0], [1], [0, 0, 1, 1], [], []>} : vector<8x32xbf16>, vector<32x32xbf16>, vector<8x32xf32> -> vector<8x32xf32>
    %123 = vector.extract_strided_slice %21 {offsets = [3, 0], sizes = [1, 32], strides = [1, 1]} : vector<6x32xf32> to vector<1x32xf32>
    %124 = vector.broadcast %123 : vector<1x32xf32> to vector<8x32xf32>
    %125 = arith.addf %122, %124 : vector<8x32xf32>
    %126 = vector.shape_cast %111 : vector<8x32xf32> to vector<8x4x8xf32>
    %127 = arith.truncf %126 : vector<8x4x8xf32> to vector<8x4x8xbf16>
    %128 = vector.shape_cast %118 : vector<8x32xf32> to vector<8x4x8xf32>
    %129 = arith.truncf %128 : vector<8x4x8xf32> to vector<8x4x8xbf16>
    %130 = vector.shape_cast %125 : vector<8x32xf32> to vector<8x4x8xf32>
    %131 = arith.truncf %130 : vector<8x4x8xf32> to vector<8x4x8xbf16>
    "tpu.trace_start"() <{level = 10 : i32, message = "qhd,khd->hqk"}> : () -> ()
    %cst_57 = arith.constant dense<0.000000e+00> : vector<4x8x8xf32>
    %132 = tpu.matmul %127, %129, %cst_57 {dimension_numbers = #tpu.dot_dimension_numbers<[2], [2], [0], [0], [0, 1, 0, 0, 1, 0], [1], [1]>} : vector<8x4x8xbf16>, vector<8x4x8xbf16>, vector<4x8x8xf32> -> vector<4x8x8xf32>
    "tpu.trace_stop"() : () -> ()
    %133 = vector.shape_cast %19 : vector<1x8xf32> to vector<1x1x8xf32>
    %134 = vector.broadcast %133 : vector<1x1x8xf32> to vector<4x8x8xf32>
    %135 = arith.addf %132, %134 : vector<4x8x8xf32>
    %cst_58 = arith.constant dense<0xFF800000> : vector<4x8xf32>
    %136 = vector.multi_reduction <maximumf>, %135, %cst_58 [2] : vector<4x8x8xf32> to vector<4x8xf32>
    %137 = vector.shape_cast %136 : vector<4x8xf32> to vector<4x8x1xf32>
    %138 = vector.broadcast %137 : vector<4x8x1xf32> to vector<4x8x8xf32>
    %139 = arith.subf %135, %138 : vector<4x8x8xf32>
    %140 = math.exp %139 : vector<4x8x8xf32>
    %cst_59 = arith.constant dense<0.000000e+00> : vector<4x8xf32>
    %141 = vector.multi_reduction <add>, %140, %cst_59 [2] : vector<4x8x8xf32> to vector<4x8xf32>
    %142 = vector.shape_cast %141 : vector<4x8xf32> to vector<4x8x1xf32>
    %143 = tpu.reciprocal %142 {approx = true} : vector<4x8x1xf32> -> vector<4x8x1xf32>
    %144 = vector.broadcast %143 : vector<4x8x1xf32> to vector<4x8x8xf32>
    %145 = arith.mulf %140, %144 : vector<4x8x8xf32>
    %146 = arith.truncf %145 : vector<4x8x8xf32> to vector<4x8x8xbf16>
    "tpu.trace_start"() <{level = 10 : i32, message = "hqk,khd->hqd"}> : () -> ()
    %cst_60 = arith.constant dense<0.000000e+00> : vector<4x8x8xf32>
    %147 = tpu.matmul %146, %131, %cst_60 {dimension_numbers = #tpu.dot_dimension_numbers<[2], [0], [1], [2], [0, 0, 0, 1, 1, 2], [0], [1]>} : vector<4x8x8xbf16>, vector<8x4x8xbf16>, vector<4x8x8xf32> -> vector<4x8x8xf32>
    "tpu.trace_stop"() : () -> ()
    %c0_61 = arith.constant 0 : index
    %c0_62 = arith.constant 0 : index
    %c0_63 = arith.constant 0 : index
    %148 = vector.load %arg11[%c0_61, %c0_62, %c0_63] : memref<4x8x32xbf16, #tpu.memory_space<vmem>>, vector<4x8x32xbf16>
    %149 = arith.truncf %147 : vector<4x8x8xf32> to vector<4x8x8xbf16>
    "tpu.trace_start"() <{level = 10 : i32, message = "hqd,hdD->hqD"}> : () -> ()
    %cst_64 = arith.constant dense<0.000000e+00> : vector<4x8x32xf32>
    %150 = tpu.matmul %149, %148, %cst_64 {dimension_numbers = #tpu.dot_dimension_numbers<[2], [1], [1], [2], [0, 0, 0, 1, 1, 2], [0], [0]>} : vector<4x8x8xbf16>, vector<4x8x32xbf16>, vector<4x8x32xf32> -> vector<4x8x32xf32>
    "tpu.trace_stop"() : () -> ()
    %cst_65 = arith.constant dense<0.000000e+00> : vector<8x32xf32>
    %151 = vector.multi_reduction <add>, %150, %cst_65 [0] : vector<4x8x32xf32> to vector<8x32xf32>
    %152 = vector.extract_strided_slice %21 {offsets = [4, 0], sizes = [1, 32], strides = [1, 1]} : vector<6x32xf32> to vector<1x32xf32>
    %153 = vector.broadcast %152 : vector<1x32xf32> to vector<8x32xf32>
    %154 = arith.addf %151, %153 : vector<8x32xf32>
    %155 = arith.addf %154, %82 : vector<8x32xf32>
    %156 = vector.extract_strided_slice %20 {offsets = [4, 0], sizes = [1, 32], strides = [1, 1]} : vector<6x32xf32> to vector<1x32xf32>
    %157 = vector.extract_strided_slice %20 {offsets = [5, 0], sizes = [1, 32], strides = [1, 1]} : vector<6x32xf32> to vector<1x32xf32>
    %cst_66 = arith.constant dense<0.000000e+00> : vector<8xf32>
    %158 = vector.multi_reduction <add>, %155, %cst_66 [1] : vector<8x32xf32> to vector<8xf32>
    %159 = vector.shape_cast %158 : vector<8xf32> to vector<8x1xf32>
    %cst_67 = arith.constant 3.200000e+01 : f32
    %160 = vector.broadcast %cst_67 : f32 to vector<8x1xf32>
    %161 = arith.divf %159, %160 : vector<8x1xf32>
    %162 = vector.broadcast %161 : vector<8x1xf32> to vector<8x32xf32>
    %163 = arith.subf %155, %162 : vector<8x32xf32>
    %164 = arith.mulf %163, %163 : vector<8x32xf32>
    %cst_68 = arith.constant dense<0.000000e+00> : vector<8xf32>
    %165 = vector.multi_reduction <add>, %164, %cst_68 [1] : vector<8x32xf32> to vector<8xf32>
    %166 = vector.shape_cast %165 : vector<8xf32> to vector<8x1xf32>
    %cst_69 = arith.constant 3.200000e+01 : f32
    %167 = vector.broadcast %cst_69 : f32 to vector<8x1xf32>
    %168 = arith.divf %166, %167 : vector<8x1xf32>
    %cst_70 = arith.constant 9.99999997E-7 : f32
    %169 = vector.broadcast %cst_70 : f32 to vector<8x1xf32>
    %170 = arith.addf %168, %169 : vector<8x1xf32>
    %171 = math.rsqrt %170 : vector<8x1xf32>
    %172 = vector.broadcast %171 : vector<8x1xf32> to vector<8x32xf32>
    %173 = arith.mulf %163, %172 : vector<8x32xf32>
    %174 = vector.broadcast %156 : vector<1x32xf32> to vector<8x32xf32>
    %175 = arith.mulf %173, %174 : vector<8x32xf32>
    %176 = vector.broadcast %157 : vector<1x32xf32> to vector<8x32xf32>
    %177 = arith.addf %175, %176 : vector<8x32xf32>
    %178 = arith.truncf %177 : vector<8x32xf32> to vector<8x32xbf16>
    %c0_71 = arith.constant 0 : index
    %c0_72 = arith.constant 0 : index
    %179 = vector.load %arg13[%c0_71, %c0_72] : memref<32x64xbf16, #tpu.memory_space<vmem>>, vector<32x64xbf16>
    %cst_73 = arith.constant dense<0.000000e+00> : vector<8x64xf32>
    %180 = tpu.matmul %178, %179, %cst_73 {dimension_numbers = #tpu.dot_dimension_numbers<[1], [0], [0], [1], [0, 0, 1, 1], [], []>} : vector<8x32xbf16>, vector<32x64xbf16>, vector<8x64xf32> -> vector<8x64xf32>
    %c0_74 = arith.constant 0 : index
    %c0_75 = arith.constant 0 : index
    %181 = vector.load %arg14[%c0_74, %c0_75] : memref<1x64xf32, #tpu.memory_space<vmem>>, vector<1x64xf32>
    %182 = vector.broadcast %181 : vector<1x64xf32> to vector<8x64xf32>
    %183 = arith.addf %180, %182 : vector<8x64xf32>
    %cst_76 = arith.constant 0.000000e+00 : f32
    %184 = vector.broadcast %cst_76 : f32 to vector<8x64xf32>
    %185 = arith.maximumf %183, %184 : vector<8x64xf32>
    %186 = arith.truncf %185 : vector<8x64xf32> to vector<8x64xbf16>
    %c0_77 = arith.constant 0 : index
    %c0_78 = arith.constant 0 : index
    %187 = vector.load %arg15[%c0_77, %c0_78] : memref<64x32xbf16, #tpu.memory_space<vmem>>, vector<64x32xbf16>
    %cst_79 = arith.constant dense<0.000000e+00> : vector<8x32xf32>
    %188 = tpu.matmul %186, %187, %cst_79 {dimension_numbers = #tpu.dot_dimension_numbers<[1], [0], [0], [1], [0, 0, 1, 1], [], []>} : vector<8x64xbf16>, vector<64x32xbf16>, vector<8x32xf32> -> vector<8x32xf32>
    %189 = vector.extract_strided_slice %21 {offsets = [5, 0], sizes = [1, 32], strides = [1, 1]} : vector<6x32xf32> to vector<1x32xf32>
    %190 = vector.broadcast %189 : vector<1x32xf32> to vector<8x32xf32>
    %191 = arith.addf %188, %190 : vector<8x32xf32>
    %192 = arith.addf %191, %155 : vector<8x32xf32>
    %c0_80 = arith.constant 0 : index
    %c0_81 = arith.constant 0 : index
    %c0_82 = arith.constant 0 : index
    %193 = vector.load %arg16[%c0_80, %c0_81, %c0_82] : memref<1x8x32xf32, #tpu.memory_space<vmem>>, vector<1x8x32xf32>
    %194 = vector.shape_cast %193 : vector<1x8x32xf32> to vector<8x32xf32>
    %195 = vector.shape_cast %192 : vector<8x32xf32> to vector<1x8x32xf32>
    tpu.vector_store %arg16[%c0_80, %c0_81, %c0_82], %195 {strides = array<i32>} : memref<1x8x32xf32, #tpu.memory_space<vmem>>, vector<1x8x32xf32>,
    return
  }
  func.func @transform_0(%arg0: i32) -> (i32, i32, i32) {
    %c0_i32 = arith.constant 0 : i32
    %c0_i32_0 = arith.constant 0 : i32
    %c0_i32_1 = arith.constant 0 : i32
    return %arg0, %c0_i32, %c0_i32_0 : i32, i32, i32
  }
  func.func @transform_1(%arg0: i32) -> (i32, i32, i32) {
    %c0_i32 = arith.constant 0 : i32
    %c0_i32_0 = arith.constant 0 : i32
    %c0_i32_1 = arith.constant 0 : i32
    return %arg0, %c0_i32, %c0_i32_0 : i32, i32, i32
  }
  func.func @transform_2(%arg0: i32) -> (i32, i32, i32) {
    %c0_i32 = arith.constant 0 : i32
    %c0_i32_0 = arith.constant 0 : i32
    %c0_i32_1 = arith.constant 0 : i32
    return %arg0, %c0_i32, %c0_i32_0 : i32, i32, i32
  }
  func.func @transform_3(%arg0: i32) -> (i32, i32, i32) {
    %c0_i32 = arith.constant 0 : i32
    %c0_i32_0 = arith.constant 0 : i32
    %c0_i32_1 = arith.constant 0 : i32
    return %arg0, %c0_i32, %c0_i32_0 : i32, i32, i32
  }
  func.func @transform_4(%arg0: i32) -> (i32, i32, i32) {
    %c0_i32 = arith.constant 0 : i32
    %c0_i32_0 = arith.constant 0 : i32
    %c0_i32_1 = arith.constant 0 : i32
    return %arg0, %c0_i32, %c0_i32_0 : i32, i32, i32
  }
  func.func @transform_5(%arg0: i32) -> (i32, i32) {
    %c0_i32 = arith.constant 0 : i32
    %c0_i32_0 = arith.constant 0 : i32
    %c0_i32_1 = arith.constant 0 : i32
    return %c0_i32, %c0_i32_0 : i32, i32
  }
  func.func @transform_6(%arg0: i32) -> (i32, i32) {
    %c0_i32 = arith.constant 0 : i32
    %c0_i32_0 = arith.constant 0 : i32
    %c0_i32_1 = arith.constant 0 : i32
    return %c0_i32, %c0_i32_0 : i32, i32
  }
  func.func @transform_7(%arg0: i32) -> (i32, i32) {
    %c0_i32 = arith.constant 0 : i32
    %c0_i32_0 = arith.constant 0 : i32
    %c0_i32_1 = arith.constant 0 : i32
    return %c0_i32, %c0_i32_0 : i32, i32
  }
  func.func @transform_8(%arg0: i32) -> (i32, i32, i32) {
    %c0_i32 = arith.constant 0 : i32
    %c0_i32_0 = arith.constant 0 : i32
    %c0_i32_1 = arith.constant 0 : i32
    %c0_i32_2 = arith.constant 0 : i32
    return %c0_i32, %c0_i32_0, %c0_i32_1 : i32, i32, i32
  }
  func.func @transform_9(%arg0: i32) -> (i32, i32, i32) {
    %c0_i32 = arith.constant 0 : i32
    %c0_i32_0 = arith.constant 0 : i32
    %c0_i32_1 = arith.constant 0 : i32
    %c0_i32_2 = arith.constant 0 : i32
    return %c0_i32, %c0_i32_0, %c0_i32_1 : i32, i32, i32
  }
  func.func @transform_10(%arg0: i32) -> (i32, i32, i32) {
    %c0_i32 = arith.constant 0 : i32
    %c0_i32_0 = arith.constant 0 : i32
    %c0_i32_1 = arith.constant 0 : i32
    %c0_i32_2 = arith.constant 0 : i32
    return %c0_i32, %c0_i32_0, %c0_i32_1 : i32, i32, i32
  }
  func.func @transform_11(%arg0: i32) -> (i32, i32) {
    %c0_i32 = arith.constant 0 : i32
    %c0_i32_0 = arith.constant 0 : i32
    %c0_i32_1 = arith.constant 0 : i32
    return %c0_i32, %c0_i32_0 : i32, i32
  }
  func.func @transform_12(%arg0: i32) -> (i32, i32) {
    %c0_i32 = arith.constant 0 : i32
    %c0_i32_0 = arith.constant 0 : i32
    %c0_i32_1 = arith.constant 0 : i32
    return %c0_i32, %c0_i32_0 : i32, i32
  }
  func.func @transform_13(%arg0: i32) -> (i32, i32) {
    %c0_i32 = arith.constant 0 : i32
    %c0_i32_0 = arith.constant 0 : i32
    %c0_i32_1 = arith.constant 0 : i32
    return %c0_i32, %c0_i32_0 : i32, i32
  }
  func.func @transform_14(%arg0: i32) -> (i32, i32) {
    %c0_i32 = arith.constant 0 : i32
    %c0_i32_0 = arith.constant 0 : i32
    %c0_i32_1 = arith.constant 0 : i32
    return %c0_i32, %c0_i32_0 : i32, i32
  }
  func.func @transform_15(%arg0: i32) -> (i32, i32, i32) {
    %c0_i32 = arith.constant 0 : i32
    %c0_i32_0 = arith.constant 0 : i32
    %c0_i32_1 = arith.constant 0 : i32
    return %arg0, %c0_i32, %c0_i32_0 : i32, i32, i32
  }
}

</mosaic_0001>

<bundles_post_ra>
// kernel: tpu_custom_call.1
= control target key start
LH: loop header
LB: loop body
LE: loop exit
PB: predicated region body
PF: predicated region fallthrough
CT: control target
= control target key end

     0   :  { %s6667_s0 = inlined_call_operand.hbm [shape: f32[2,8,32], index: 0, kind: input, shape index: {}]   ;;  %s6668_s1 = inlined_call_operand.hbm [shape: f32[2,8,32], index: 1, kind: input, shape index: {}]   ;;  %s6669_s2 = inlined_call_operand.hbm [shape: f32[2,8,32], index: 2, kind: input, shape index: {}]   ;;  %s6670_s3 = inlined_call_operand.hbm [shape: f32[2,1,8], index: 3, kind: input, shape index: {}]   ;;  %s6671_s4 = inlined_call_operand.hbm [shape: f32[2,1,8], index: 4, kind: input, shape index: {}]   ;;  %s6672_s5 = inlined_call_operand.hbm [shape: f32[6,32], index: 5, kind: input, shape index: {}]   ;;  %s6673_s6 = inlined_call_operand.hbm [shape: bf16[32,96], index: 6, kind: input, shape index: {}]   ;;  %s6674_s7 = inlined_call_operand.hbm [shape: f32[1,96], index: 7, kind: input, shape index: {}]   ;;  %s6675_s8 = inlined_call_operand.hbm [shape: bf16[4,8,32], index: 8, kind: input, shape index: {}]   ;;  %s6676_s9 = inlined_call_operand.hbm [shape: bf16[3,32,32], index: 9, kind: input, shape index: {}]   ;;  %s6677_s10 = inlined_call_operand.hbm [shape: bf16[4,8,32], index: 10, kind: input, shape index: {}]   ;;  %s6678_s11 = inlined_call_operand.hbm [shape: f32[6,32], index: 11, kind: input, shape index: {}]   ;;  %s6679_s12 = inlined_call_operand.hbm [shape: bf16[32,64], index: 12, kind: input, shape index: {}]   ;;  %s6680_s13 = inlined_call_operand.hbm [shape: f32[1,64], index: 13, kind: input, shape index: {}]   ;;  %s6681_s14 = inlined_call_operand.hbm [shape: bf16[64,32], index: 14, kind: input, shape index: {}]   ;;  %s6682_s15 = inlined_call_operand.hbm [shape: f32[2,8,32], index: 15, kind: output, shape index: {}]  }
   0x1   :  { %6719 = sst [smem:[#allocation45_spill]] %s6667_s0 }
   0x2   :  { %6720 = sst [smem:[#allocation46_spill]] %s6668_s1 }
   0x3   :  { %6721 = sst [smem:[#allocation47_spill]] %s6669_s2 }
   0x4   :  { %6722 = sst [smem:[#allocation48_spill]] %s6670_s3 }
   0x5   :  { %6723 = sst [smem:[#allocation49_spill]] %s6672_s5 }
   0x6   :  { %6724 = sst [smem:[#allocation50_spill]] %s6673_s6 }
   0x7   :  { %6725 = sst [smem:[#allocation51_spill]] %s6674_s7 }
   0x8   :  { %6726 = sst [smem:[#allocation52_spill]] %s6675_s8 }
   0x9   :  { %6727 = sst [smem:[#allocation53_spill]] %s6676_s9 }
   0xa   :  { %6728 = sst [smem:[#allocation54_spill]] %s6677_s10 }
   0xb   :  { %6729 = sst [smem:[#allocation55_spill]] %s6678_s11 }
   0xc   :  { %6730 = sst [smem:[#allocation56_spill]] %s6679_s12 }
   0xd   :  { %6731 = sst [smem:[#allocation57_spill]] %s6680_s13 }
   0xe   :  { %6732 = sst [smem:[#allocation58_spill]] %s6681_s14 }
   0xf   :  { %6733 = sst [smem:[#allocation59_spill]] %s6682_s15 }
  0x10   :  { %20 = vsyncpa [#allocation3], 0 }
  0x11   :  { %22 = vsyncpa [#allocation3 + $0x1], 0 }
  0x12   :  { %23 = vsyncpa [#allocation6], 0 }
  0x13   :  { %25 = vsyncpa [#allocation6 + $0x1], 0 }
  0x14   :  { %26 = vsyncpa [#allocation9], 0 }
  0x15   :  { %28 = vsyncpa [#allocation9 + $0x1], 0 }
  0x16   :  { %29 = vsyncpa [#allocation12], 0 }
  0x17   :  { %30 = vsyncpa [#allocation15], 0 }
  0x18   :  { %31 = vsyncpa [#allocation18], 0 }
  0x19   :  { %32 = vsyncpa [#allocation21], 0 }
  0x1a   :  { %33 = vsyncpa [#allocation24], 0 }
  0x1b   :  { %34 = vsyncpa [#allocation4], 0 }
  0x1c   :  { %36 = vsyncpa [#allocation4 + $0x1], 0  ;;  %s5631_s18 = smov 0   ;;  %s5633_s19 = smov 0  }
  0x1d   :  { %s5635_s20 = smov 0   ;;  %s5637_s21 = smov 0  }
  0x1e LB: > { %6734 = sst [smem:[#allocation36_spill]] %s5509_s18  ;;  %s5523_s22 = smov [#allocation11]   ;;  %s5521_s21 = sphi %s5637_s21, %s6797_s21   ;;  %s5517_s20 = sphi %s5635_s20, %s6799_s20   ;;  %s5513_s19 = sphi %s5633_s19, %s6801_s19   ;;  %s5509_s18 = sphi %s5631_s18, %s6800_s18  }
  0x1f   : > { %6735 = sst [smem:[#allocation37_spill]] %s5517_s20  ;;  %s426_s23 = sshll.u32 %s5523_s22, 4  ;;  %s427_s23 = int_to_ptr.vmem [resolvable:$true] %s426_s23 }
  0x20   : > { %6736 = sst [smem:[#allocation38_spill]] %s5521_s21  ;;  %s5652_s24 = sadd.s32 4294967295, %s5521_s21  }
  0x21   : > { %6737 = sst [smem:[#allocation39_spill]] %s5652_s24  ;;  %p4398_p0 = scmp.ge.s32.totalorder %s5521_s21, 1 }
  0x22   : > { %p6686_p1 = scmp.eq.s32.totalorder %s5652_s24, 0  ;;  %p413_p2 = scmp.lt.s32.totalorder %s5521_s21, 3 }
  0x23   : > { %s5524_s26 = smov [#allocation14]   ;;  %s5525_s29 = smov [#allocation17]  }
  0x24   : > { %p5657_p3 = pnand %p4398_p0, %p413_p2  ;;  %s450_s27 = sshll.u32 %s5524_s26, 4  ;;  %s5664_s27 = int_to_ptr.vmem [resolvable:$true] %s450_s27 }
  0x25   : > { %s473_s30 = sshll.u32 %s5525_s29, 4  ;;  %s6741_s5 = sld [smem:[#allocation49_spill]]  ;;  %s5672_s30 = int_to_ptr.vmem [resolvable:$true] %s473_s30 }
  0x26   : > { %s6738_s25 = scalar_select %p5657_p3, 1, 0 }
  0x27   : > { %p4815_p5 = pneg %p5657_p3 }
  0x28   : > { %6739 = sst [smem:[#allocation40_spill]] %s6738_s25 }
  0x29   : > { %p5668_p6 = pnand %p4815_p5, %p6686_p1 }
  0x2b   : > { %s6740_s28 = scalar_select %p5668_p6, 1, 0 }
  0x2c   : > { %s4997_s22 = scalar_lea.hbm %s6741_s5, 128  ;;  %p5682_p8 = pneg %p5668_p6 }
  0x2d   : > { %p4998_p7 = scmp.ne.s32.totalorder %s6741_s5, %s4997_s22  ;;  %p5004_p11 = scmp.lt.u32.totalorder %s4997_s22, %s6741_s5 }
  0x2e   : > { %s6742_s26 = scalar_select %p5682_p8, 1, 0 }
  0x2f   : > { %p5000_p9 = pnand %p5682_p8, %p4998_p7 }
  0x31   : > { %p5001_p10 = pneg %p5000_p9 }
  0x33   : > { %p5006_p12 = pnand %p5004_p11, %p5001_p10 }
  0x35   : > { %5009 = shalt.err (!%p5006_p12)
}
  0x36   : > { %s5010_s16 = scalar_lea.vmem %s427_s23, 128  ;;  %p5018_p5 = scmp.lt.s32.totalorder %s427_s23, %s427_s23 }
  0x37   : > { %p5011_p13 = scmp.ne.s32.totalorder %s427_s23, %s5010_s16  ;;  %p5019_p4 = scmp.lt.s32.totalorder %s5010_s16, %s5010_s16 }
  0x39   : > { %p5013_p0 = pnand %p5011_p13, %p5682_p8  ;;  %p5020_p1 = por %p5019_p4, %p5018_p5 }
  0x3b   : > { %p5014_p2 = pneg %p5013_p0 }
  0x3d   : > { %p5021_p3 = pnand %p5020_p1, %p5014_p2 }
  0x3f   : > { %5024 = shalt.err (!%p5021_p3)
}
  0x40   : > { %4818 = dma.hbm_to_vmem [thread:$0]  (!%p5668_p6), %s6741_s5, 128, %s427_s23, [#allocation12]  }
  0x41   : > { %s6743_s7 = sld [smem:[#allocation51_spill]] }
  0x47   : > { %s5025_s22 = scalar_lea.hbm %s6743_s7, 16 }
  0x48   : > { %p5026_p7 = scmp.ne.s32.totalorder %s6743_s7, %s5025_s22  ;;  %p5032_p1 = scmp.lt.u32.totalorder %s5025_s22, %s6743_s7 }
  0x4a   : > { %p5028_p9 = pnand %p5026_p7, %p5682_p8 }
  0x4c   : > { %p5029_p4 = pneg %p5028_p9 }
  0x4e   : > { %p5034_p3 = pnand %p5032_p1, %p5029_p4 }
  0x50   : > { %5037 = shalt.err (!%p5034_p3)
}
  0x51   : > { %s5038_s23 = scalar_lea.vmem %s5664_s27, 16  ;;  %s5045_s14 = scalar_lea.vmem %s5664_s27, 32 }
  0x52   : > { %p5039_p10 = scmp.ne.s32.totalorder %s5664_s27, %s5038_s23  ;;  %p5046_p13 = scmp.lt.s32.totalorder %s5664_s27, %s5664_s27 }
  0x53   : > { %p5047_p0 = scmp.lt.s32.totalorder %s5045_s14, %s5038_s23 }
  0x54   : > { %p5041_p11 = pnand %p5039_p10, %p5682_p8 }
  0x55   : > { %p5048_p2 = por %p5047_p0, %p5046_p13 }
  0x56   : > { %p5042_p12 = pneg %p5041_p11 }
  0x58   : > { %p5049_p5 = pnand %p5048_p2, %p5042_p12 }
  0x5a   : > { %5052 = shalt.err (!%p5049_p5)
}
  0x5b   : > { %4824 = dma.hbm_to_vmem [thread:$0]  (!%p5668_p6), %s6743_s7, 16, %s5664_s27, [#allocation15]  }
  0x5c   : > { %s6744_s9 = sld [smem:[#allocation53_spill]] }
  0x62   : > { %s5053_s17 = scalar_lea.hbm %s6744_s9, 768 }
  0x63   : > { %p5054_p7 = scmp.ne.s32.totalorder %s6744_s9, %s5053_s17  ;;  %p5060_p1 = scmp.lt.u32.totalorder %s5053_s17, %s6744_s9 }
  0x65   : > { %p5056_p9 = pnand %p5054_p7, %p5682_p8 }
  0x67   : > { %p5057_p4 = pneg %p5056_p9 }
  0x69   : > { %p5062_p3 = pnand %p5060_p1, %p5057_p4 }
  0x6b   : > { %5065 = shalt.err (!%p5062_p3)
}
  0x6c   : > { %s5066_s27 = scalar_lea.vmem %s5672_s30, 768  ;;  %p5074_p13 = scmp.lt.s32.totalorder %s5672_s30, %s5672_s30 }
  0x6d   : > { %p5067_p10 = scmp.ne.s32.totalorder %s5672_s30, %s5066_s27  ;;  %p5075_p0 = scmp.lt.s32.totalorder %s5066_s27, %s5066_s27 }
  0x6f   : > { %p5069_p11 = pnand %p5067_p10, %p5682_p8  ;;  %p5076_p2 = por %p5075_p0, %p5074_p13 }
  0x71   : > { %p5070_p12 = pneg %p5069_p11 }
  0x73   : > { %p5077_p5 = pnand %p5076_p2, %p5070_p12 }
  0x75   : > { %5080 = shalt.err (!%p5077_p5)
}
  0x76   : > { %s6692_s14 = smov 64   ;;  %s6694_s0 = smov 4  }
  0x77   : > { %4830 = dma.hbm_to_vmem [thread:$0]  (!%p5668_p6), %s6744_s9, 768, %s5672_s30, [#allocation18], %s6692_s14, %s6692_s14, %s6694_s0  }
  0x78   : > { %s5528_s2 = smov [#allocation20]   ;;  %s5529_s22 = smov [#allocation23]  }
  0x79   : > { %s500_s17 = sshll.u32 %s5528_s2, 4  ;;  %s524_s29 = sshll.u32 %s5529_s22, 4  ;;  %s501_s17 = int_to_ptr.vmem [resolvable:$true] %s500_s17  ;;  %s525_s29 = int_to_ptr.vmem [resolvable:$true] %s524_s29 }
  0x7a   : > { %s6745_s11 = sld [smem:[#allocation55_spill]] }
  0x80   : > { %s5081_s27 = scalar_lea.hbm %s6745_s11, 128 }
  0x81   : > { %p5082_p7 = scmp.ne.s32.totalorder %s6745_s11, %s5081_s27  ;;  %p5088_p1 = scmp.lt.u32.totalorder %s5081_s27, %s6745_s11 }
  0x83   : > { %p5084_p9 = pnand %p5082_p7, %p5682_p8 }
  0x85   : > { %p5085_p4 = pneg %p5084_p9 }
  0x87   : > { %p5090_p3 = pnand %p5088_p1, %p5085_p4 }
  0x89   : > { %5093 = shalt.err (!%p5090_p3)
}
  0x8a   : > { %s5094_s30 = scalar_lea.vmem %s501_s17, 128  ;;  %p5102_p13 = scmp.lt.s32.totalorder %s501_s17, %s501_s17 }
  0x8b   : > { %p5095_p10 = scmp.ne.s32.totalorder %s501_s17, %s5094_s30  ;;  %p5103_p0 = scmp.lt.s32.totalorder %s5094_s30, %s5094_s30 }
  0x8d   : > { %p5097_p11 = pnand %p5095_p10, %p5682_p8  ;;  %p5104_p2 = por %p5103_p0, %p5102_p13 }
  0x8f   : > { %p5098_p12 = pneg %p5097_p11 }
  0x91   : > { %p5105_p5 = pnand %p5104_p2, %p5098_p12 }
  0x93   : > { %5108 = shalt.err (!%p5105_p5)
}
  0x94   : > { %4836 = dma.hbm_to_vmem [thread:$0]  (!%p5668_p6), %s6745_s11, 128, %s501_s17, [#allocation21]  }
  0x95   : > { %s6746_s13 = sld [smem:[#allocation57_spill]] }
  0x9b   : > { %s5109_s15 = scalar_lea.hbm %s6746_s13, 16 }
  0x9c   : > { %p5110_p7 = scmp.ne.s32.totalorder %s6746_s13, %s5109_s15  ;;  %p5116_p1 = scmp.lt.u32.totalorder %s5109_s15, %s6746_s13 }
  0x9e   : > { %p5112_p9 = pnand %p5110_p7, %p5682_p8 }
  0xa0   : > { %p5113_p4 = pneg %p5112_p9 }
  0xa2   : > { %p5118_p3 = pnand %p5116_p1, %p5113_p4 }
  0xa4   : > { %5121 = shalt.err (!%p5118_p3)
}
  0xa5   : > { %s5122_s23 = scalar_lea.vmem %s525_s29, 16  ;;  %s5129_s17 = scalar_lea.vmem %s525_s29, 32 }
  0xa6   : > { %p5123_p10 = scmp.ne.s32.totalorder %s525_s29, %s5122_s23  ;;  %p5130_p13 = scmp.lt.s32.totalorder %s525_s29, %s525_s29 }
  0xa7   : > { %p5131_p0 = scmp.lt.s32.totalorder %s5129_s17, %s5122_s23 }
  0xa8   : > { %p5125_p11 = pnand %p5123_p10, %p5682_p8 }
  0xa9   : > { %p5132_p2 = por %p5131_p0, %p5130_p13 }
  0xaa   : > { %p5126_p12 = pneg %p5125_p11 }
  0xac   : > { %p5133_p5 = pnand %p5132_p2, %p5126_p12 }
  0xae   : > { %5136 = shalt.err (!%p5133_p5)
}
  0xaf   : > { %4842 = dma.hbm_to_vmem [thread:$0]  (!%p5668_p6), %s6746_s13, 16, %s525_s29, [#allocation24]  }
  0xb0   : > { %s4397_s5 = sadd.s32 4294967294, %s5521_s21   ;;  %s5786_s7 = sadd.s32 1, %s5521_s21  }
  0xb1   : > { %6747 = sst [smem:[#allocation41_spill]] %s5786_s7  ;;  %s49_s10 = sadd.s32 1, %s5517_s20 }
  0xb2   : > { %s46_s12 = ssub.s32 %s5521_s21, %s5786_s7  ;;  %p56_p7 = scmp.ne.s32.totalorder %s5517_s20, %s5513_s19 }
  0xb3   : > { %p47_p9 = scmp.eq.s32.totalorder %s46_s12, 0  ;;  %p57_p4 = scmp.eq.s32.totalorder %s5521_s21, 0 }
  0xb4   : > { %p62_p1 = scmp.ne.s32.totalorder %s5513_s19, %s5509_s18  ;;  %p400_p3 = scmp.eq.s32.totalorder %s5652_s24, 1 }
  0xb5   : > { %s5798_s15 = scalar_select %p47_p9, %s5517_s20, %s49_s10  }
  0xb6   : > { %p58_p10 = por %p57_p4, %p56_p7  ;;  %p6749_p11 = scmp.eq.s32.totalorder %s5652_s24, 0 }
  0xb7   : > { %6748 = sst [smem:[#allocation42_spill]] %s5798_s15  ;;  %p5806_p13 = por %p400_p3, %p56_p7 }
  0xb8   : > { %p5802_p12 = por %p6749_p11, %p62_p1  ;;  %p406_p0 = scmp.eq.s32.totalorder %s4397_s5, 1 }
  0xb9   : > { %s6751_s25 = scalar_select %p5806_p13, 1, 0 }
  0xba   : > { %s6750_s29 = scalar_select %p5802_p12, 1, 0 }
  0xbb   : > { %6752 = sst [smem:[#allocation43_spill]] %s6751_s25  ;;  %p4876_p2 = scmp.lt.s32.totalorder %s5521_s21, 2 }
  0xbc   : > { %s5812_s2 = sand.u32 1, %s5517_s20   ;;  %p5814_p5 = por %p406_p0, %p62_p1 }
  0xbd   : > { %s5819_s16 = sshll.u32 %s5812_s2, 3  ;;  %s5822_s23 = sshll.u32 %s5521_s21, 7 }
  0xbe   : > { %s6753_s22 = scalar_select %p5814_p5, 1, 0 }
  0xbf   : > { %p5824_p9 = pnand %p4876_p2, %p58_p10  ;;  %s6697_s27 = sand.u32 1, %s5521_s21  }
  0xc0   : > { %6754 = sst [smem:[#allocation44_spill]] %s6753_s22  ;;  %s6756_s1 = sld [smem:[#allocation46_spill]] }
  0xc1   : > { %s6755_s17 = scalar_select %p5824_p9, 1, 0 }
  0xc2   : > { %s570_s12 = scalar_lea.vmem [#allocation5], %s5819_s16  ;;  %s5840_s0 = scalar_lea.sflag [#allocation6], %s6697_s27 }
  0xc3   : > { %s577_s14 = sshll.u32 %s570_s12, 4  ;;  %p5846_p4 = pneg %p5824_p9  ;;  %s5836_s14 = int_to_ptr.vmem [resolvable:$true] %s577_s14 }
  0xc5   : > { %s6757_s11 = scalar_select %p5846_p4, 1, 0 }
  0xc6   : > { %s5833_s10 = scalar_lea.hbm %s6756_s1, %s5822_s23  ;;  %s5142_s12 = scalar_lea.hbm %s6756_s1, 256 }
  0xc7   : > { %s5137_s9 = scalar_lea.hbm %s5833_s10, 128  ;;  %p5143_p10 = scmp.lt.u32.totalorder %s5833_s10, %s6756_s1 }
  0xc8   : > { %p5138_p7 = scmp.ne.s32.totalorder %s5833_s10, %s5137_s9  ;;  %p5144_p11 = scmp.lt.u32.totalorder %s5142_s12, %s5137_s9 }
  0xc9   : > { %p5146_p2 = scmp.lt.u32.totalorder %s5137_s9, %s5833_s10 }
  0xca   : > { %p5140_p1 = pnand %p5846_p4, %p5138_p7  ;;  %p5145_p0 = por %p5144_p11, %p5143_p10 }
  0xcc   : > { %p5141_p3 = pneg %p5140_p1  ;;  %p5147_p5 = por %p5146_p2, %p5145_p0 }
  0xce   : > { %p5148_p13 = pnand %p5147_p5, %p5141_p3 }
  0xd0   : > { %5151 = shalt.err (!%p5148_p13)
}
  0xd1   : > { %s5152_s27 = scalar_lea.vmem %s5836_s14, 128  ;;  %s5530_s30 = smov [#allocation5]  }
  0xd2   : > { %p5153_p7 = scmp.ne.s32.totalorder %s5836_s14, %s5152_s27  ;;  %s5157_s5 = sshll.u32 %s5530_s30, 4  ;;  %s5158_s5 = int_to_ptr.vmem [resolvable:$false] %s5157_s5 }
  0xd3   : > { %s5159_s13 = scalar_lea.vmem %s5158_s5, 256  ;;  %p5160_p6 = scmp.lt.s32.totalorder %s5836_s14, %s5158_s5 }
  0xd4   : > { %p5155_p1 = pnand %p5153_p7, %p5846_p4  ;;  %p5161_p8 = scmp.lt.s32.totalorder %s5159_s13, %s5152_s27 }
  0xd6   : > { %p5156_p12 = pneg %p5155_p1  ;;  %p5162_p10 = por %p5161_p8, %p5160_p6 }
  0xd8   : > { %p5163_p11 = pnand %p5162_p10, %p5156_p12 }
  0xda   : > { %5166 = shalt.err (!%p5163_p11)
}
  0xdb   : > { %4852 = dma.hbm_to_vmem [thread:$0]  (!%p5824_p9), %s5833_s10, 128, %s5836_s14, %s5840_s0  }
  0xdc   : > { %s4416_s9 = sshll.u32 %s5521_s21, 4  ;;  %s6758_s3 = sld [smem:[#allocation48_spill]] }
  0xdd   : > { %s605_s27 = scalar_lea.vmem [#allocation8], %s5812_s2  ;;  %s5882_s20 = scalar_lea.hbm %s6671_s4, %s4416_s9 }
  0xde   : > { %s612_s5 = sshll.u32 %s605_s27, 4  ;;  %s6759_s14 = sand.u32 1, %s5521_s21   ;;  %s5877_s5 = int_to_ptr.vmem [resolvable:$true] %s612_s5 }
  0xdf   : > { %s5886_s10 = scalar_lea.sflag [#allocation9], %s6759_s14 }
  0xe2   : > { %s5874_s30 = scalar_lea.hbm %s6758_s3, %s4416_s9  ;;  %s5172_s22 = scalar_lea.hbm %s6758_s3, 32 }
  0xe3   : > { %s5167_s7 = scalar_lea.hbm %s5874_s30, 16  ;;  %p5173_p13 = scmp.lt.u32.totalorder %s5874_s30, %s6758_s3 }
  0xe4   : > { %p5168_p6 = scmp.ne.s32.totalorder %s5874_s30, %s5167_s7  ;;  %p5174_p5 = scmp.lt.u32.totalorder %s5172_s22, %s5167_s7 }
  0xe5   : > { %p5176_p0 = scmp.lt.u32.totalorder %s5167_s7, %s5874_s30 }
  0xe6   : > { %p5170_p8 = pnand %p5168_p6, %p5846_p4  ;;  %p5175_p3 = por %p5174_p5, %p5173_p13 }
  0xe8   : > { %p5171_p12 = pneg %p5170_p8  ;;  %p5177_p2 = por %p5176_p0, %p5175_p3 }
  0xea   : > { %p5178_p7 = pnand %p5177_p2, %p5171_p12 }
  0xec   : > { %5181 = shalt.err (!%p5178_p7)
}
  0xed   : > { %s5182_s1 = scalar_lea.vmem %s5877_s5, 16  ;;  %s5531_s9 = smov [#allocation8]  }
  0xee   : > { %p5183_p1 = scmp.ne.s32.totalorder %s5877_s5, %s5182_s1  ;;  %s5187_s13 = sshll.u32 %s5531_s9, 4  ;;  %s5188_s13 = int_to_ptr.vmem [resolvable:$false] %s5187_s13 }
  0xef   : > { %s5189_s18 = scalar_lea.vmem %s5188_s13, 32  ;;  %p5190_p6 = scmp.lt.s32.totalorder %s5877_s5, %s5188_s13 }
  0xf0   : > { %p5185_p10 = pnand %p5183_p1, %p5846_p4  ;;  %p5191_p8 = scmp.lt.s32.totalorder %s5189_s18, %s5182_s1 }
  0xf2   : > { %p5186_p11 = pneg %p5185_p10  ;;  %p5192_p13 = por %p5191_p8, %p5190_p6 }
  0xf4   : > { %p5193_p5 = pnand %p5192_p13, %p5186_p11 }
  0xf6   : > { %5196 = shalt.err (!%p5193_p5)
}
  0xf7   : > { %4858 = dma.hbm_to_vmem [thread:$0]  (!%p5824_p9), %s5874_s30, 16, %s5877_s5, %s5886_s10  }
  0xf8   : > { %s5532_s7 = smov [#allocation13]   ;;  %s5533_s14 = smov [#allocation16]  }
  0xf9   : > { %s436_s22 = sshll.u32 %s5532_s7, 4  ;;  %s460_s15 = sshll.u32 %s5533_s14, 4  ;;  %s437_s22 = int_to_ptr.vmem [resolvable:$true] %s436_s22  ;;  %s5910_s15 = int_to_ptr.vmem [resolvable:$true] %s460_s15 }
  0xfa   : > { %s6760_s6 = sld [smem:[#allocation50_spill]]  ;;  %p6761_p3 = scmp.ne.s32.totalorder %s6742_s26, 0 }
 0x100   : > { %s5197_s1 = scalar_lea.hbm %s6760_s6, 256 }
 0x101   : > { %p5198_p12 = scmp.ne.s32.totalorder %s6760_s6, %s5197_s1  ;;  %p5204_p7 = scmp.lt.u32.totalorder %s5197_s1, %s6760_s6 }
 0x103   : > { %p5200_p0 = pnand %p5198_p12, %p6761_p3 }
 0x105   : > { %p5201_p2 = pneg %p5200_p0 }
 0x107   : > { %p5206_p1 = pnand %p5204_p7, %p5201_p2 }
 0x109   : > { %5209 = shalt.err (!%p5206_p1)
}
 0x10a   : > { %s5210_s5 = scalar_lea.vmem %s437_s22, 256  ;;  %p5218_p8 = scmp.lt.s32.totalorder %s437_s22, %s437_s22 }
 0x10b   : > { %p5211_p10 = scmp.ne.s32.totalorder %s437_s22, %s5210_s5  ;;  %p5219_p13 = scmp.lt.s32.totalorder %s5210_s5, %s5210_s5 }
 0x10d   : > { %p5213_p11 = pnand %p5211_p10, %p6761_p3  ;;  %p5220_p5 = por %p5219_p13, %p5218_p8 }
 0x10f   : > { %p5214_p6 = pneg %p5213_p11 }
 0x111   : > { %p5221_p9 = pnand %p5220_p5, %p5214_p6 }
 0x113   : > { %5224 = shalt.err (!%p5221_p9)
}
 0x114   : > { %p6762_p12 = scmp.ne.s32.totalorder %s6740_s28, 0  ;;  %s6763_s7 = smov 4  }
 0x115   : > { %s6764_s14 = smov 64   ;;  %s6765_s8 = sld [smem:[#allocation52_spill]] }
 0x116   : > { %4821 = dma.hbm_to_vmem [thread:$0]  (!%p6762_p12), %s6760_s6, 256, %s437_s22, [#allocation12], %s6764_s14, %s6764_s14, %s6763_s7  }
 0x11b   : > { %s5225_s13 = scalar_lea.hbm %s6765_s8, 256 }
 0x11c   : > { %p5226_p0 = scmp.ne.s32.totalorder %s6765_s8, %s5225_s13  ;;  %p5232_p7 = scmp.lt.u32.totalorder %s5225_s13, %s6765_s8 }
 0x11e   : > { %p5228_p9 = pnand %p5226_p0, %p6761_p3 }
 0x120   : > { %p5229_p2 = pneg %p5228_p9 }
 0x122   : > { %p5234_p1 = pnand %p5232_p7, %p5229_p2 }
 0x124   : > { %5237 = shalt.err (!%p5234_p1)
}
 0x125   : > { %s5238_s22 = scalar_lea.vmem %s5910_s15, 256  ;;  %p5246_p8 = scmp.lt.s32.totalorder %s5910_s15, %s5910_s15 }
 0x126   : > { %p5239_p10 = scmp.ne.s32.totalorder %s5910_s15, %s5238_s22  ;;  %p5247_p13 = scmp.lt.s32.totalorder %s5238_s22, %s5238_s22 }
 0x128   : > { %p5241_p11 = pnand %p5239_p10, %p6761_p3  ;;  %p5248_p5 = por %p5247_p13, %p5246_p8 }
 0x12a   : > { %p5242_p6 = pneg %p5241_p11 }
 0x12c   : > { %p5249_p0 = pnand %p5248_p5, %p5242_p6 }
 0x12e   : > { %5252 = shalt.err (!%p5249_p0)
}
 0x12f   : > { %4827 = dma.hbm_to_vmem [thread:$0]  (!%p6762_p12), %s6765_s8, 256, %s5910_s15, [#allocation15], %s6764_s14, %s6764_s14, %s6763_s7  }
 0x130   : > { %s5534_s27 = smov [#allocation19]   ;;  %s5535_s9 = smov [#allocation22]  }
 0x131   : > { %s486_s1 = sshll.u32 %s5534_s27, 4  ;;  %s510_s13 = sshll.u32 %s5535_s9, 4  ;;  %s487_s1 = int_to_ptr.vmem [resolvable:$true] %s486_s1  ;;  %s5959_s13 = int_to_ptr.vmem [resolvable:$true] %s510_s13 }
 0x132   : > { %s6766_s5 = sld [smem:[#allocation54_spill]] }
 0x138   : > { %s5253_s22 = scalar_lea.hbm %s6766_s5, 256 }
 0x139   : > { %p5254_p9 = scmp.ne.s32.totalorder %s6766_s5, %s5253_s22  ;;  %p5260_p1 = scmp.lt.u32.totalorder %s5253_s22, %s6766_s5 }
 0x13b   : > { %p5256_p2 = pnand %p5254_p9, %p6761_p3 }
 0x13d   : > { %p5257_p7 = pneg %p5256_p2 }
 0x13f   : > { %p5262_p10 = pnand %p5260_p1, %p5257_p7 }
 0x141   : > { %5265 = shalt.err (!%p5262_p10)
}
 0x142   : > { %s5266_s12 = scalar_lea.vmem %s487_s1, 256  ;;  %p5274_p13 = scmp.lt.s32.totalorder %s487_s1, %s487_s1 }
 0x143   : > { %p5267_p11 = scmp.ne.s32.totalorder %s487_s1, %s5266_s12  ;;  %p5275_p5 = scmp.lt.s32.totalorder %s5266_s12, %s5266_s12 }
 0x145   : > { %p5269_p6 = pnand %p5267_p11, %p6761_p3  ;;  %p5276_p0 = por %p5275_p5, %p5274_p13 }
 0x147   : > { %p5270_p8 = pneg %p5269_p6 }
 0x149   : > { %p5277_p4 = pnand %p5276_p0, %p5270_p8 }
 0x14b   : > { %5280 = shalt.err (!%p5277_p4)
}
 0x14c   : > { %4833 = dma.hbm_to_vmem [thread:$0]  (!%p6762_p12), %s6766_s5, 256, %s487_s1, [#allocation18], %s6764_s14, %s6764_s14, %s6763_s7  }
 0x14d   : > { %s6767_s18 = sld [smem:[#allocation56_spill]] }
 0x153   : > { %s6768_s30 = smov %s6767_s18  ;;  %s5281_s22 = scalar_lea.hbm %s6767_s18, 256 }
 0x154   : > { %p5282_p9 = scmp.ne.s32.totalorder %s6768_s30, %s5281_s22  ;;  %p5288_p7 = scmp.lt.u32.totalorder %s5281_s22, %s6768_s30 }
 0x156   : > { %p5284_p4 = pnand %p5282_p9, %p6761_p3 }
 0x158   : > { %p5285_p2 = pneg %p5284_p4 }
 0x15a   : > { %p5290_p1 = pnand %p5288_p7, %p5285_p2 }
 0x15c   : > { %5293 = shalt.err (!%p5290_p1)
}
 0x15d   : > { %s5294_s1 = scalar_lea.vmem %s5959_s13, 256  ;;  %p5302_p8 = scmp.lt.s32.totalorder %s5959_s13, %s5959_s13 }
 0x15e   : > { %p5295_p10 = scmp.ne.s32.totalorder %s5959_s13, %s5294_s1  ;;  %p5303_p13 = scmp.lt.s32.totalorder %s5294_s1, %s5294_s1 }
 0x160   : > { %p5297_p11 = pnand %p5295_p10, %p6761_p3  ;;  %p5304_p5 = por %p5303_p13, %p5302_p8 }
 0x162   : > { %p5298_p6 = pneg %p5297_p11 }
 0x164   : > { %p5305_p0 = pnand %p5304_p5, %p5298_p6 }
 0x166   : > { %5308 = shalt.err (!%p5305_p0)
}
 0x167   : > { %4839 = dma.hbm_to_vmem [thread:$0]  (!%p6762_p12), %s6768_s30, 256, %s5959_s13, [#allocation21], %s6764_s14, %s6764_s14, %s6763_s7  }
 0x168   : > { %s5536_s21 = smov [#allocation25]   ;;  %s6769_s22 = sld [smem:[#allocation45_spill]] }
 0x169   : > { %s534_s27 = sshll.u32 %s5536_s21, 4  ;;  %s6770_s1 = sld [smem:[#allocation58_spill]]  ;;  %s535_s27 = int_to_ptr.vmem [resolvable:$true] %s534_s27 }
 0x16e   : > { %s6012_s3 = scalar_lea.hbm %s6769_s22, %s5822_s23 }
 0x16f   : > { %s5309_s5 = scalar_lea.hbm %s6770_s1, 512 }
 0x170   : > { %p5310_p9 = scmp.ne.s32.totalorder %s6770_s1, %s5309_s5  ;;  %p5316_p7 = scmp.lt.u32.totalorder %s5309_s5, %s6770_s1 }
 0x172   : > { %p5312_p4 = pnand %p5310_p9, %p6761_p3 }
 0x174   : > { %p5313_p2 = pneg %p5312_p4 }
 0x176   : > { %p5318_p1 = pnand %p5316_p7, %p5313_p2 }
 0x178   : > { %5321 = shalt.err (!%p5318_p1)
}
 0x179   : > { %s5322_s6 = scalar_lea.vmem %s535_s27, 512  ;;  %p5330_p8 = scmp.lt.s32.totalorder %s535_s27, %s535_s27 }
 0x17a   : > { %p5323_p10 = scmp.ne.s32.totalorder %s535_s27, %s5322_s6  ;;  %p5331_p13 = scmp.lt.s32.totalorder %s5322_s6, %s5322_s6 }
 0x17c   : > { %p5325_p11 = pnand %p5323_p10, %p6761_p3  ;;  %p5332_p5 = por %p5331_p13, %p5330_p8 }
 0x17e   : > { %p5326_p6 = pneg %p5325_p11 }
 0x180   : > { %p5333_p0 = pnand %p5332_p5, %p5326_p6 }
 0x182   : > { %5336 = shalt.err (!%p5333_p0)
}
 0x183   : > { %4845 = dma.hbm_to_vmem [thread:$0]  (!%p6762_p12), %s6770_s1, 512, %s535_s27, [#allocation24], %s6764_s14, %s6764_s14, %s6763_s7  }
 0x184   : > { %s552_s26 = scalar_lea.vmem [#allocation2], %s5819_s16  ;;  %s6771_s9 = sld [smem:[#allocation47_spill]] }
 0x185   : > { %s559_s5 = sshll.u32 %s552_s26, 4  ;;  %s549_s15 = scalar_lea.sflag [#allocation3], %s5812_s2  ;;  %s6036_s5 = int_to_ptr.vmem [resolvable:$true] %s559_s5 }
 0x186   : > { %s5337_s12 = scalar_lea.hbm %s6012_s3, 128  ;;  %p6772_p9 = scmp.ne.s32.totalorder %s6757_s11, 0 }
 0x187   : > { %p5338_p3 = scmp.ne.s32.totalorder %s6012_s3, %s5337_s12  ;;  %s5342_s6 = scalar_lea.hbm %s6769_s22, 256 }
 0x188   : > { %p5343_p12 = scmp.lt.u32.totalorder %s6012_s3, %s6769_s22  ;;  %p5344_p7 = scmp.lt.u32.totalorder %s5342_s6, %s5337_s12 }
 0x189   : > { %p5340_p4 = pnand %p5338_p3, %p6772_p9  ;;  %p5346_p10 = scmp.lt.u32.totalorder %s5337_s12, %s6012_s3 }
 0x18a   : > { %s6042_s18 = scalar_lea.hbm %s6771_s9, %s5822_s23  ;;  %p5345_p1 = por %p5344_p7, %p5343_p12 }
 0x18b   : > { %p5341_p2 = pneg %p5340_p4 }
 0x18c   : > { %p5347_p11 = por %p5346_p10, %p5345_p1 }
 0x18e   : > { %p5348_p6 = pnand %p5347_p11, %p5341_p2 }
 0x190   : > { %5351 = shalt.err (!%p5348_p6)
}
 0x191   : > { %s5352_s23 = scalar_lea.vmem %s6036_s5, 128  ;;  %s5537_s27 = smov [#allocation2]  }
 0x192   : > { %p5353_p8 = scmp.ne.s32.totalorder %s6036_s5, %s5352_s23  ;;  %s5357_s24 = sshll.u32 %s5537_s27, 4  ;;  %s5358_s24 = int_to_ptr.vmem [resolvable:$false] %s5357_s24 }
 0x193   : > { %s5359_s25 = scalar_lea.vmem %s5358_s24, 256  ;;  %p5360_p0 = scmp.lt.s32.totalorder %s6036_s5, %s5358_s24 }
 0x194   : > { %p5355_p13 = pnand %p5353_p8, %p6772_p9  ;;  %p5361_p3 = scmp.lt.s32.totalorder %s5359_s25, %s5352_s23 }
 0x196   : > { %p5356_p5 = pneg %p5355_p13  ;;  %p5362_p4 = por %p5361_p3, %p5360_p0 }
 0x198   : > { %p5363_p12 = pnand %p5362_p4, %p5356_p5 }
 0x19a   : > { %5366 = shalt.err (!%p5363_p12)
}
 0x19b   : > { %p6773_p2 = scmp.ne.s32.totalorder %s6755_s17, 0  ;;  %s588_s26 = scalar_lea.vmem [#allocation7], %s5819_s16 }
 0x19c   : > { %s595_s28 = sshll.u32 %s588_s26, 4  ;;  %s622_s21 = scalar_lea.vmem [#allocation10], %s5812_s2  ;;  %s6067_s28 = int_to_ptr.vmem [resolvable:$true] %s595_s28 }
 0x19d   : > { %4849 = dma.hbm_to_vmem [thread:$0]  (!%p6773_p2), %s6012_s3, 128, %s6036_s5, %s549_s15  }
 0x19e   : > { %s629_s12 = sshll.u32 %s622_s21, 4  ;;  %s5367_s13 = scalar_lea.hbm %s6042_s18, 128  ;;  %s630_s12 = int_to_ptr.vmem [resolvable:$true] %s629_s12 }
 0x19f   : > { %p5368_p7 = scmp.ne.s32.totalorder %s6042_s18, %s5367_s13  ;;  %s5372_s7 = scalar_lea.hbm %s6771_s9, 256 }
 0x1a0   : > { %p5373_p11 = scmp.lt.u32.totalorder %s6042_s18, %s6771_s9  ;;  %p5374_p6 = scmp.lt.u32.totalorder %s5372_s7, %s5367_s13 }
 0x1a1   : > { %p5370_p1 = pnand %p5368_p7, %p6772_p9  ;;  %p5376_p13 = scmp.lt.u32.totalorder %s5367_s13, %s6042_s18 }
 0x1a2   : > { %p5375_p8 = por %p5374_p6, %p5373_p11 }
 0x1a3   : > { %p5371_p10 = pneg %p5370_p1 }
 0x1a4   : > { %p5377_p5 = por %p5376_p13, %p5375_p8 }
 0x1a6   : > { %p5378_p0 = pnand %p5377_p5, %p5371_p10 }
 0x1a8   : > { %5381 = shalt.err (!%p5378_p0)
}
 0x1a9   : > { %s5382_s2 = scalar_lea.vmem %s6067_s28, 128  ;;  %s5538_s16 = smov [#allocation7]  }
 0x1aa   : > { %p5383_p3 = scmp.ne.s32.totalorder %s6067_s28, %s5382_s2  ;;  %s5387_s3 = sshll.u32 %s5538_s16, 4  ;;  %s5388_s3 = int_to_ptr.vmem [resolvable:$false] %s5387_s3 }
 0x1ab   : > { %s5389_s5 = scalar_lea.vmem %s5388_s3, 256  ;;  %p5390_p7 = scmp.lt.s32.totalorder %s6067_s28, %s5388_s3 }
 0x1ac   : > { %p5385_p4 = pnand %p5383_p3, %p6772_p9  ;;  %p5391_p1 = scmp.lt.s32.totalorder %s5389_s5, %s5382_s2 }
 0x1ae   : > { %p5386_p12 = pneg %p5385_p4  ;;  %p5392_p11 = por %p5391_p1, %p5390_p7 }
 0x1b0   : > { %p5393_p6 = pnand %p5392_p11, %p5386_p12 }
 0x1b2   : > { %5396 = shalt.err (!%p5393_p6)
}
 0x1b3   : > { %4855 = dma.hbm_to_vmem [thread:$0]  (!%p6773_p2), %s6042_s18, 128, %s6067_s28, %s5840_s0  }
 0x1b4   : > { %s5397_s15 = scalar_lea.hbm %s5882_s20, 16  ;;  %s5402_s25 = scalar_lea.hbm %s6671_s4, 32 }
 0x1b5   : > { %p5398_p10 = scmp.ne.s32.totalorder %s5882_s20, %s5397_s15  ;;  %p5403_p5 = scmp.lt.u32.totalorder %s5882_s20, %s6671_s4 }
 0x1b6   : > { %p5404_p0 = scmp.lt.u32.totalorder %s5402_s25, %s5397_s15  ;;  %p5406_p4 = scmp.lt.u32.totalorder %s5397_s15, %s5882_s20 }
 0x1b7   : > { %p5400_p8 = pnand %p5398_p10, %p6772_p9 }
 0x1b8   : > { %p5405_p3 = por %p5404_p0, %p5403_p5 }
 0x1b9   : > { %p5401_p13 = pneg %p5400_p8 }
 0x1ba   : > { %p5407_p12 = por %p5406_p4, %p5405_p3 }
 0x1bc   : > { %p5408_p7 = pnand %p5407_p12, %p5401_p13 }
 0x1be   : > { %5411 = shalt.err (!%p5408_p7)
}
 0x1bf   : > { %s5412_s0 = scalar_lea.vmem %s630_s12, 16  ;;  %s5539_s18 = smov [#allocation10]  }
 0x1c0   : > { %p5413_p1 = scmp.ne.s32.totalorder %s630_s12, %s5412_s0  ;;  %s5417_s28 = sshll.u32 %s5539_s18, 4  ;;  %s5418_s28 = int_to_ptr.vmem [resolvable:$false] %s5417_s28 }
 0x1c1   : > { %s5419_s13 = scalar_lea.vmem %s5418_s28, 32  ;;  %p5420_p10 = scmp.lt.s32.totalorder %s630_s12, %s5418_s28 }
 0x1c2   : > { %p5415_p11 = pnand %p5413_p1, %p6772_p9  ;;  %p5421_p8 = scmp.lt.s32.totalorder %s5419_s13, %s5412_s0 }
 0x1c4   : > { %p5416_p6 = pneg %p5415_p11  ;;  %p5422_p2 = por %p5421_p8, %p5420_p10 }
 0x1c6   : > { %p5423_p0 = pnand %p5422_p2, %p5416_p6 }
 0x1c8   : > { %5426 = shalt.err (!%p5423_p0)
}
 0x1c9   : > { %p6774_p5 = scmp.ne.s32.totalorder %s6755_s17, 0  ;;  %s6775_s8 = sld [smem:[#allocation40_spill]] }
 0x1cb   : > { %4861 = dma.hbm_to_vmem [thread:$0]  (!%p6774_p5), %s5882_s20, 16, %s630_s12, %s5886_s10  }
 0x1cf   : > { %p6776_p13 = scmp.ne.s32.totalorder %s6775_s8, 0 }
 0x1d0   : > { %s6113_s11 = sand.u32 (!%p6776_p13), 1, %s5513_s19   ;;  %p6777_p9 = scmp.ne.s32.totalorder (!%p6776_p13), %s6750_s29, 0 }
 0x1d1   : > { %638 = sbr.rel (%p6776_p13) target bundleno = 5029 (0x13a5), region = 80  ;;  %s6116_s6 = sshll.u32 (!%p6776_p13), %s6113_s11, 3 }
 0x1d2   : > { %s641_s7 = scalar_lea.sflag (!%p6776_p13), [#allocation3], %s6113_s11  ;;  %s644_s14 = scalar_lea.vmem (!%p6776_p13), [#allocation2], %s6116_s6 }
 0x1d8   : > { %5472 = dma.done.wait (%p6777_p9), %s641_s7, 128  }
 0x1d9   : > { %5474 = vsyncadd (%p6777_p9), %s641_s7, 4294967168  ;;  %s6778_s20 = sld [smem:[#allocation39_spill]]  ;;  %s653_s12 = scalar_lea.vmem [#allocation5], %s6116_s6 }
 0x1df   : > { %s649_s17 = sand.u32 1, %s6778_s20  }
 0x1e0   : > { %s650_s10 = scalar_lea.sflag [#allocation6], %s649_s17 }
 0x1e1   : > { %5476 = dma.done.wait (%p6777_p9), %s650_s10, 256  }
 0x1e2   : > { %5478 = vsyncadd (%p6777_p9), %s650_s10, 4294967040  ;;  %s662_s23 = scalar_lea.vmem [#allocation7], %s6116_s6  ;;  %s668_s2 = scalar_lea.sflag [#allocation9], %s649_s17 }
 0x1e3   : > { %s670_s16 = scalar_lea.vmem [#allocation8], %s6113_s11 }
 0x1e4   : > { %5480 = dma.done.wait (%p6777_p9), %s668_s2, 32  }
 0x1e5   : > { %5482 = vsyncadd (%p6777_p9), %s668_s2, 4294967264  ;;  %s678_s3 = scalar_lea.vmem [#allocation10], %s6113_s11  ;;  %p6779_p2 = scmp.eq.s32.totalorder %s6778_s20, 0 }
 0x1e7   : > { %5484 = dma.done.wait (%p6779_p2), [#allocation12], 384   ;;  %p6780_p3 = pmov %p6779_p2 }
 0x1e8   : > { %p6781_p4 = pmov %p6779_p2 }
 0x1e9   : > { %5486 = vsyncadd (%p6780_p3), [#allocation12], 4294966912 }
 0x1ea   : > { %5488 = dma.done.wait (%p6781_p4), [#allocation15], 272   ;;  %p6782_p12 = pmov %p6779_p2 }
 0x1eb   : > { %p6783_p7 = pmov %p6779_p2 }
 0x1ec   : > { %5490 = vsyncadd (%p6782_p12), [#allocation15], 4294967024 }
 0x1ed   : > { %5492 = dma.done.wait (%p6783_p7), [#allocation18], 1024   ;;  %p6784_p1 = pmov %p6779_p2 }
 0x1ef   : > { %5494 = vsyncadd (%p6784_p1), [#allocation18], 4294966272  ;;  %p6785_p11 = pmov %p6784_p1 }
 0x1f0   : > { %p6786_p6 = pmov %p6784_p1 }
 0x1f1   : > { %5496 = dma.done.wait (%p6785_p11), [#allocation21], 384  }
 0x1f2   : > { %5498 = vsyncadd (%p6786_p6), [#allocation21], 4294966912  ;;  %p6787_p10 = pmov %p6784_p1 }
 0x1f3   : > { %p6788_p8 = pmov %p6784_p1 }
 0x1f4   : > { %5500 = dma.done.wait (%p6787_p10), [#allocation24], 528  }
 0x1f5   : > { %5502 = vsyncadd (%p6788_p8), [#allocation24], 4294966768  ;;  %vm795_vm0 = vcmask 261120   ;;  %v784_v0 = vld [vmem:[%s644_s14] sm:$0xff]  ;;  %v5540_v8 = vmov 0.0   ;;  %vm5541_vm1 = vmmov 0   ;;  %v810_v12 = vlaneseq }
 0x1f6   : > { %v796_v1 = vsel %vm795_vm0, %v784_v0, 0.0  ;;  %v4942_v7 = vld [vmem:[#allocation13] sm:$0xff]   ;;  %4567 = vmatprep.subr.bf16.mxu0 %v5540_v8  ;;  %4571 = vmatprep.mubr.msk.bf16.mxu0 %vm5541_vm1, %v5540_v8  ;;  %v4943_v9 = vld [vmem:[#allocation13 + $0x8] sm:$0xff]   ;;  %v6174_v16 = vld [vmem:[#allocation11] sm:$0x3f]  ;;  %s5542_s29 = smov 104  }
 0x1f7   : > { %797 = vadd.xlane.f32.xlu0 %v796_v1  ;;  %4568 = vmatpush3.bf16.msra.mxu0 %v4942_v7  ;;  %v6169_v14 = vshrl.u32 %v810_v12, 7  ;;  %v4433_v25 = vld [vmem:[#allocation14] ss:$0 sm:$0xff]  ;;  %s5543_s5 = smov 120   ;;  %s5544_s15 = smov 112   ;;  %vm1639_vm2 = vcmask 1043456  }
 0x1f8   : > { %4575 = vmatprep.subr.bf16.mxu1 %v5540_v8  ;;  %4569 = vmatprep.subr.bf16.mxu0 %v5540_v8  ;;  %s5545_s27 = smov 96   ;;  %v5546_v36 = vmov 1983009808   ;;  %v5547_v38 = vmov 1934713408   ;;  %vm1635_vm3 = vcmask 64512  }
 0x1f9   : > { %4577 = vmatprep.mubr.msk.bf16.mxu1 %vm5541_vm1, %v5540_v8  ;;  %v6172_v15 = vsub.s32 0, %v6169_v14  ;;  %v817_v17 = vsub.s32 1, %v6169_v14  ;;  %v900_v37 = vunpack.c.l.s4 %v5546_v36  ;;  %v932_v39 = vunpack.c.l.s4 %v5547_v38  ;;  %s5549_s24 = smov 64   ;;  %s6789_s25 = sld [smem:[#allocation43_spill]] }
 0x1fa   : > { %vm4092_vm6 = vcmask 523264   ;;  %s4496_s26 = sshll.u32 %s6778_s20, 7  ;;  %s782_s21 = scalar_lea.vmem [#allocation26], %s6116_s6 }
 0x1fb   : > { %4570 = vmatpush3.bf16.msra.mxu0 %v4943_v9  ;;  %v813_v18 = vrot.slane %v6174_v16, %v6172_v15  ;;  %v818_v21 = vrot.slane %v6174_v16, %v817_v17  ;;  %v901_v41 = vunpack.c.0.s8 %v900_v37  ;;  %v933_v43 = vunpack.c.0.s8 %v932_v39  ;;  %s4152_s0 = sshll.u32 %s782_s21, 4  ;;  %s6790_s13 = sld [smem:[#allocation59_spill]]  ;;  %s6624_s0 = int_to_ptr.vmem [resolvable:$true] %s4152_s0 }
 0x1fc   : > { %4599 = vmatprep.subr.bf16.mxu0 %v5540_v8  ;;  %s4139_s7 = scalar_lea.sflag [#allocation4], %s6113_s11  ;;  %s5427_s6 = scalar_lea.vmem %s6624_s0, 128 }
 0x1fd   : > { %v6204_v45 = vsub.s32 %v901_v41, %v6169_v14  ;;  %v6210_v52 = vsub.s32 %v933_v43, %v6169_v14  ;;  %p5428_p0 = scmp.ne.s32.totalorder %s6624_s0, %s5427_s6 }
 0x1ff   : > { %p6791_p5 = scmp.ne.s32.totalorder %s6789_s25, 0 }
 0x201   : > { %s6622_s8 = scalar_lea.hbm %s6790_s13, %s4496_s26  ;;  %p5429_p13 = pnand %p5428_p0, %p6791_p5 }
 0x203   : > { %p5430_p9 = pneg %p5429_p13 }
 0x284   : > { %v798_v2 = vpop.xlane.xlu0 %797 }
 0x285   : > { %v800_v3 = vmul.f32 0.03125, %v798_v2 }
 0x287   : > { %v801_v4 = vsub.f32 %v784_v0, %v800_v3 }
 0x289   : > { %v802_v5 = vmul.f32 %v801_v4, %v801_v4 }
 0x28b   : > { %v803_v6 = vsel %vm795_vm0, %v802_v5, 0.0 }
 0x28c   : > { %804 = vadd.xlane.f32.xlu0 %v803_v6 }
 0x319   : > { %v805_v10 = vpop.xlane.xlu0 %804 }
 0x31a   : > { %v806_v11 = vmul.f32 0.03125, %v805_v10 }
 0x31c   : > { %v807_v13 = vadd.f32 1e-06, %v806_v11 }
 0x31e   : > { %4956 = vrsqrt.f32 %v807_v13 }
 0x328   : > { %v4957_v19 = vpop.eup %4956 }
 0x329   : > { %v809_v20 = vmul.f32 %v4957_v19, %v801_v4 }
 0x32b   : > { %v814_v22 = vmul.f32 %v813_v18, %v809_v20 }
 0x32d   : > { %v819_v23 = vadd.f32 %v818_v21, %v814_v22 }
 0x32f   : > { %v824_v24 = vpack.c.bf16 %v819_v23, %v819_v23 }
 0x331   : > { %4572 = vmatmul.mubr.msk.bf16.vlgmr.msra.gmra.mrb[0].mxu0 %vm795_vm0, %v824_v24 }
 0x332   : > { %4601 = vmatprep.mubr.msk.bf16.mxu0 %vm5541_vm1, %v5540_v8 }
 0x404   : > { %v881_v26 = vpop.f32.mrb[0].mxu0 }
 0x405   : > { %v6185_v27 = vadd.f32 %v4433_v25, %v881_v26  ;;  %v4573_v28 = vpop.f32.mrb[1].mxu0 }
 0x406   : > { %v884_v29 = vpop.f32.mrb[2].mxu0 }
 0x407   : > { %894 = vrot.lane.b32.xlu0 %v6185_v27, %s5542_s29  ;;  %888 = vrot.lane.b32.xlu1 %v6185_v27, %s5543_s5  ;;  %v4574_v30 = vpop.f32.mrb[3].mxu0 }
 0x40b   : > { %891 = vrot.lane.b32.xlu1 %v6185_v27, %s5544_s15 }
 0x40f   : > { %973 = vrot.lane.b32.xlu1 %v6185_v27, %s5545_s27 }
 0x479   : > { %v6194_v31 = vpop.permute.xlu1 %888  ;;  %v6200_v33 = vpop.permute.xlu0 %894 }
 0x47a   : > { %975 = vrot.lane.b32.xlu1 %v6194_v31, %s5545_s27 }
 0x47d   : > { %v6197_v32 = vpop.permute.xlu1 %891 }
 0x47e   : > { %977 = vrot.lane.b32.xlu1 %v6197_v32, %s5545_s27 }
 0x481   : > { %v974_v34 = vpop.permute.xlu1 %973 }
 0x482   : > { %979 = vrot.lane.b32.xlu1 %v6200_v33, %s5545_s27 }
 0x4ec   : > { %v976_v35 = vpop.permute.xlu1 %975 }
 0x4f0   : > { %v978_v40 = vpop.permute.xlu1 %977 }
 0x4f1   : > { %v985_v42 = vcombine.low %v974_v34, %v978_v40  ;;  %v986_v46 = vcombine.high %v974_v34, %v978_v40 }
 0x4f3   : > { %v993_v49 = vrot.slane %v985_v42, %v6204_v45  ;;  %v1000_v53 = vrot.slane %v986_v46, %v6204_v45 }
 0x4f4   : > { %v980_v44 = vpop.permute.xlu1 %979 }
 0x4f5   : > { %v1001_v47 = vcombine.low %v976_v35, %v980_v44  ;;  %v1002_v48 = vcombine.high %v976_v35, %v980_v44 }
 0x4f7   : > { %v1009_v50 = vrot.slane %v1001_v47, %v6204_v45  ;;  %v1016_v51 = vrot.slane %v1002_v48, %v6204_v45 }
 0x4f9   : > { %v1017_v54 = vcombine.low %v993_v49, %v1009_v50  ;;  %v1018_v55 = vcombine.high %v993_v49, %v1009_v50  ;;  %v1033_v58 = vcombine.low %v1000_v53, %v1016_v51  ;;  %v1034_v0 = vcombine.high %v1000_v53, %v1016_v51 }
 0x4fa   : > { %v5548_v49 = vmov 0  }
 0x4fb   : > { %v1025_v56 = vrot.slane %v1017_v54, %v6210_v52  ;;  %v1032_v57 = vrot.slane %v1018_v55, %v6210_v52  ;;  %v1041_v63 = vrot.slane %v1033_v58, %v6210_v52  ;;  %v1048_v4 = vrot.slane %v1034_v0, %v6210_v52 }
 0x4fd   : > { %v1053_v59 = vpack.c.bf16 %v1025_v56, %v1025_v56  ;;  %v1049_v60 = vcombine.high %v1025_v56, %v5540_v8  ;;  %v1050_v62 = vcombine.high %v1032_v57, %v5540_v8  ;;  %v1055_v1 = vpack.c.bf16 %v1032_v57, %v1032_v57 }
 0x4fe   : > { %v1051_v3 = vcombine.high %v1041_v63, %v5540_v8  ;;  %v1057_v5 = vpack.c.bf16 %v1041_v63, %v1041_v63  ;;  %v1052_v7 = vcombine.high %v1048_v4, %v5540_v8  ;;  %v1059_v9 = vpack.c.bf16 %v1048_v4, %v1048_v4 }
 0x4ff   : > { %1217 = vxpose.xlu1.c.b16.start.end [1/1] (short) (narrow) %v1053_v59, 16  ;;  %v1054_v61 = vpack.c.bf16 %v1049_v60, %v1049_v60  ;;  %v1056_v2 = vpack.c.bf16 %v1050_v62, %v1050_v62  ;;  %v913_v4 = vcombine.low %v6194_v31, %v6200_v33 }
 0x500   : > { %v1058_v6 = vpack.c.bf16 %v1051_v3, %v1051_v3  ;;  %v1060_v10 = vpack.c.bf16 %v1052_v7, %v1052_v7  ;;  %v898_v3 = vcombine.high %v6185_v27, %v6197_v32 }
 0x501   : > { %1233 = vxpose.xlu0.c.b16.start.end [1/1] (short) (narrow) %v1054_v61, 16 }
 0x502   : > { %v912_v7 = vrot.slane %v898_v3, %v6204_v45 }
 0x503   : > { %1249 = vxpose.xlu1.c.b16.start.end [1/1] (short) (narrow) %v1055_v1, 16 }
 0x505   : > { %1265 = vxpose.xlu0.c.b16.start.end [1/1] (short) (narrow) %v1056_v2, 16  ;;  %v897_v2 = vcombine.low %v6185_v27, %v6197_v32 }
 0x507   : > { %1281 = vxpose.xlu1.c.b16.start.end [1/1] (short) (narrow) %v1057_v5, 16  ;;  %v914_v5 = vcombine.high %v6194_v31, %v6200_v33 }
 0x509   : > { %1297 = vxpose.xlu0.c.b16.start.end [1/1] (short) (narrow) %v1058_v6, 16  ;;  %v905_v6 = vrot.slane %v897_v2, %v6204_v45 }
 0x50b   : > { %1313 = vxpose.xlu1.c.b16.start.end [1/1] (short) (narrow) %v1059_v9, 16  ;;  %v921_v9 = vrot.slane %v913_v4, %v6204_v45 }
 0x50d   : > { %1329 = vxpose.xlu0.c.b16.start.end [1/1] (short) (narrow) %v1060_v10, 16  ;;  %v928_v10 = vrot.slane %v914_v5, %v6204_v45 }
 0x565   : > { %v1225_v11 = vpop.trf.xlu1 }
 0x567   : > { %v1241_v12 = vpop.trf.xlu0 }
 0x569   : > { %v1257_v13 = vpop.trf.xlu1 }
 0x56b   : > { %v1273_v18 = vpop.trf.xlu0 }
 0x56d   : > { %v1289_v19 = vpop.trf.xlu1 }
 0x56e   : > { %v1345_v21 = vcombine.low %v1225_v11, %v1289_v19  ;;  %v929_v11 = vcombine.low %v905_v6, %v921_v9 }
 0x56f   : > { %v1305_v20 = vpop.trf.xlu0 }
 0x570   : > { %v1379_v23 = vcombine.low %v1241_v12, %v1305_v20  ;;  %v1352_v26 = vrot.slane %v1345_v21, %v6204_v45  ;;  %v945_v12 = vcombine.low %v912_v7, %v928_v10  ;;  %v937_v20 = vrot.slane %v929_v11, %v6210_v52 }
 0x571   : > { %v1321_v22 = vpop.trf.xlu1 }
 0x572   : > { %v1353_v24 = vcombine.low %v1257_v13, %v1321_v22  ;;  %v1386_v30 = vrot.slane %v1379_v23, %v6204_v45  ;;  %v930_v13 = vcombine.high %v905_v6, %v921_v9  ;;  %v953_v21 = vrot.slane %v945_v12, %v6210_v52 }
 0x573   : > { %v1337_v25 = vpop.trf.xlu0 }
 0x574   : > { %v1360_v28 = vrot.slane %v1353_v24, %v6204_v45  ;;  %v1387_v29 = vcombine.low %v1273_v18, %v1337_v25  ;;  %v946_v18 = vcombine.high %v912_v7, %v928_v10  ;;  %v944_v23 = vrot.slane %v930_v13, %v6210_v52 }
 0x576   : > { %v1361_v34 = vcombine.low %v1352_v26, %v1360_v28  ;;  %v1394_v35 = vrot.slane %v1387_v29, %v6204_v45  ;;  %v1362_v36 = vcombine.high %v1352_v26, %v1360_v28  ;;  %v960_v24 = vrot.slane %v946_v18, %v6210_v52 }
 0x577   : > { %v961_v26 = vcombine.high %v937_v20, %v5540_v8  ;;  %v963_v28 = vcombine.high %v953_v21, %v5540_v8 }
 0x578   : > { %v1395_v37 = vcombine.low %v1386_v30, %v1394_v35  ;;  %v1396_v38 = vcombine.high %v1386_v30, %v1394_v35  ;;  %v1369_v39 = vrot.slane %v1361_v34, %v6210_v52  ;;  %v1376_v46 = vrot.slane %v1362_v36, %v6210_v52 }
 0x579   : > { %v962_v30 = vcombine.high %v944_v23, %v5540_v8  ;;  %v964_v34 = vcombine.high %v960_v24, %v5540_v8  ;;  %v4439_v36 = vpack.c.bf16 %v963_v28, %v961_v26 }
 0x57a   : > { %v1403_v40 = vrot.slane %v1395_v37, %v6210_v52  ;;  %v1410_v41 = vrot.slane %v1396_v38, %v6210_v52  ;;  %v1417_v43 = vshrl.u32 %v1369_v39, 16  ;;  %v1433_v53 = vshrl.u32 %v1376_v46, 16 }
 0x57b   : > { %v1377_v54 = vcombine.high %v1369_v39, %v5548_v49  ;;  %v1378_v60 = vcombine.high %v1376_v46, %v5548_v49  ;;  %v4440_v38 = vpack.c.bf16 %v964_v34, %v962_v30 }
 0x57c   : > { %v1415_v42 = vpack.i.b16 %v1403_v40, %v1369_v39  ;;  %v1418_v44 = vshrl.u32 %v1403_v40, 16  ;;  %v1434_v48 = vshrl.u32 %v1410_v41, 16  ;;  %v1411_v50 = vcombine.high %v1403_v40, %v5548_v49 }
 0x57d   : > { %v1431_v51 = vpack.i.b16 %v1410_v41, %v1376_v46  ;;  %v1412_v57 = vcombine.high %v1410_v41, %v5548_v49  ;;  %v1425_v59 = vshrl.u32 %v1377_v54, 16  ;;  %v1441_v0 = vshrl.u32 %v1378_v60, 16 }
 0x57e   : > { %1445 = vxpose.xlu1.c.b16.start.end [1/1] (short) (narrow) %v1415_v42, 16  ;;  %v1419_v47 = vpack.i.b16 %v1418_v44, %v1417_v43  ;;  %v1435_v55 = vpack.i.b16 %v1434_v48, %v1433_v53  ;;  %v1426_v56 = vshrl.u32 %v1411_v50, 16  ;;  %v1423_v58 = vpack.i.b16 %v1411_v50, %v1377_v54 }
 0x57f   : > { %v1442_v62 = vshrl.u32 %v1412_v57, 16  ;;  %v1439_v63 = vpack.i.b16 %v1412_v57, %v1378_v60  ;;  %v4437_v40 = vpack.c.bf16 %v953_v21, %v937_v20  ;;  %v4438_v42 = vpack.c.bf16 %v960_v24, %v944_v23 }
 0x580   : > { %1461 = vxpose.xlu0.c.b16.start.end [1/1] (short) (narrow) %v1419_v47, 16  ;;  %v1427_v61 = vpack.i.b16 %v1426_v56, %v1425_v59  ;;  %v1187_v47 = vrot.slane %v4439_v36, %v6204_v45  ;;  %v1195_v53 = vrot.slane %v4440_v38, %v6204_v45 }
 0x581   : > { %v1443_v1 = vpack.i.b16 %v1442_v62, %v1441_v0  ;;  %v1162_v54 = vrot.slane %v4437_v40, %v6204_v45 }
 0x582   : > { %1509 = vxpose.xlu1.c.b16.start.end [1/1] (short) (narrow) %v1431_v51, 16 }
 0x584   : > { %1525 = vxpose.xlu0.c.b16.start.end [1/1] (short) (narrow) %v1435_v55, 16  ;;  %v1170_v55 = vrot.slane %v4438_v42, %v6204_v45 }
 0x586   : > { %1477 = vxpose.xlu1.c.b16.start.end [1/1] (short) (narrow) %v1423_v58, 16 }
 0x588   : > { %1493 = vxpose.xlu0.c.b16.start.end [1/1] (short) (narrow) %v1427_v61, 16  ;;  %v1196_v61 = vcombine.low %v1187_v47, %v1195_v53 }
 0x58a   : > { %1541 = vxpose.xlu1.c.b16.start.end [1/1] (short) (narrow) %v1439_v63, 16  ;;  %v1171_v63 = vcombine.low %v1162_v54, %v1170_v55 }
 0x58c   : > { %1557 = vxpose.xlu0.c.b16.start.end [1/1] (short) (narrow) %v1443_v1, 16  ;;  %v1203_v1 = vrot.slane %v1196_v61, %v6210_v52  ;;  %v1178_v5 = vrot.slane %v1171_v63, %v6210_v52 }
 0x58e   : > { %v1207_v7 = vpack.i.b16 %v1203_v1, %v1178_v5  ;;  %v1209_v11 = vshrl.u32 %v1203_v1, 16  ;;  %v1208_v13 = vshrl.u32 %v1178_v5, 16  ;;  %v1179_v24 = vcombine.high %v1178_v5, %v5548_v49 }
 0x590   : > { %v1214_v30 = vshrl.u32 %v1179_v24, 16 }
 0x5e4   : > { %v1453_v19 = vpop.trf.xlu1 }
 0x5e6   : > { %v1469_v22 = vpop.trf.xlu0 }
 0x5e8   : > { %v1517_v25 = vpop.trf.xlu1 }
 0x5e9   : > { %v1573_v39 = vcombine.low %v1453_v19, %v1517_v25  ;;  %v1210_v19 = vpack.i.b16 %v1209_v11, %v1208_v13 }
 0x5ea   : > { %v1533_v29 = vpop.trf.xlu0 }
 0x5eb   : > { %v1598_v43 = vcombine.low %v1469_v22, %v1533_v29  ;;  %v1580_v48 = vrot.slane %v1573_v39, %v6204_v45  ;;  %v1204_v22 = vcombine.high %v1203_v1, %v5548_v49 }
 0x5ec   : > { %v1485_v35 = vpop.trf.xlu1 }
 0x5ed   : > { %v1605_v56 = vrot.slane %v1598_v43, %v6204_v45  ;;  %v1213_v26 = vpack.i.b16 %v1204_v22, %v1179_v24  ;;  %v1215_v29 = vshrl.u32 %v1204_v22, 16 }
 0x5ee   : > { %v1501_v37 = vpop.trf.xlu0 }
 0x5ef   : > { %v1216_v34 = vpack.i.b16 %v1215_v29, %v1214_v30 }
 0x5f0   : > { %v1549_v41 = vpop.trf.xlu1 }
 0x5f1   : > { %v1581_v44 = vcombine.low %v1485_v35, %v1549_v41  ;;  %v787_v35 = vld [vmem:[%s670_s16] sm:$0x1] }
 0x5f2   : > { %v1565_v46 = vpop.trf.xlu0  ;;  %vm788_vm4 = vcmp.gt.f32.partialorder %v787_v35, 0.5 }
 0x5f3   : > { %v1588_v50 = vrot.slane %v1581_v44, %v6204_v45  ;;  %v1606_v51 = vcombine.low %v1501_v37, %v1565_v46  ;;  %v789_v36 = vsel %vm788_vm4, -1e+18, %v5540_v8 }
 0x5f4   : > { %v1153_v37 = vrot.slane %v789_v36, %v6172_v15 }
 0x5f5   : > { %v1589_v57 = vcombine.low %v1580_v48, %v1588_v50  ;;  %v1613_v58 = vrot.slane %v1606_v51, %v6204_v45 }
 0x5f7   : > { %v1596_v59 = vrot.slane %v1589_v57, %v6210_v52  ;;  %v1614_v60 = vcombine.low %v1605_v56, %v1613_v58 }
 0x5f9   : > { %v1621_v62 = vrot.slane %v1614_v60, %v6210_v52  ;;  %v1626_v2 = vshrl.u32 %v1596_v59, 16  ;;  %v1597_v12 = vcombine.high %v1596_v59, %v5548_v49 }
 0x5fb   : > { %v1625_v0 = vpack.i.b16 %v1621_v62, %v1596_v59  ;;  %v1627_v3 = vshrl.u32 %v1621_v62, 16  ;;  %v1622_v10 = vcombine.high %v1621_v62, %v5548_v49  ;;  %v1632_v23 = vshrl.u32 %v1597_v12, 16 }
 0x5fd   : > { %v1641_v4 = vsel %vm1639_vm2, %v1625_v0, 0  ;;  %v1628_v6 = vpack.i.b16 %v1627_v3, %v1626_v2  ;;  %v1631_v18 = vpack.i.b16 %v1622_v10, %v1597_v12  ;;  %v1633_v21 = vshrl.u32 %v1622_v10, 16 }
 0x5fe   : > { %4576 = vmatpush3.bf16.msra.mxu1 %v1641_v4 }
 0x5ff   : > { %4581 = vmatprep.subr.bf16.mxu1 %v5540_v8  ;;  %v1687_v9 = vsel %vm1639_vm2, %v1628_v6, 0  ;;  %v1733_v20 = vsel %vm1639_vm2, %v1631_v18, 0  ;;  %v1634_v25 = vpack.i.b16 %v1633_v21, %v1632_v23 }
 0x601   : > { %4578 = vmatmul.mubr.msk.bf16.vlgmr.msra.gmra.mrb[0].mxu1 %vm1635_vm3, %v1207_v7  ;;  %v1779_v28 = vsel %vm1639_vm2, %v1634_v25, 0 }
 0x602   : > { %4582 = vmatpush3.bf16.msra.mxu1 %v1687_v9  ;;  %4583 = vmatprep.mubr.msk.bf16.mxu1 %vm5541_vm1, %v5540_v8 }
 0x603   : > { %4587 = vmatprep.subr.bf16.mxu1 %v5540_v8 }
 0x609   : > { %4584 = vmatmul.mubr.msk.bf16.vlgmr.msra.gmra.mrb[4].mxu1 %vm1635_vm3, %v1210_v19 }
 0x60a   : > { %4588 = vmatpush3.bf16.msra.mxu1 %v1733_v20  ;;  %4589 = vmatprep.mubr.msk.bf16.mxu1 %vm5541_vm1, %v5540_v8 }
 0x60b   : > { %4593 = vmatprep.subr.bf16.mxu1 %v5540_v8 }
 0x611   : > { %4590 = vmatmul.mubr.msk.bf16.vlgmr.msra.gmra.mrb[8].mxu1 %vm1635_vm3, %v1213_v26 }
 0x612   : > { %4594 = vmatpush3.bf16.msra.mxu1 %v1779_v28  ;;  %4595 = vmatprep.mubr.msk.bf16.mxu1 %vm5541_vm1, %v5540_v8 }
 0x613   : > { %4605 = vmatprep.subr.bf16.mxu1 %v5540_v8 }
 0x619   : > { %4596 = vmatmul.mubr.msk.bf16.vlgmr.msra.gmra.mrb[12].mxu1 %vm1635_vm3, %v1216_v34 }
 0x61a   : > { %4607 = vmatprep.mubr.msk.bf16.mxu1 %vm5541_vm1, %v5540_v8 }
 0x6d4   : > { %v1677_v38 = vpop.f32.mrb[0].mxu1 }
 0x6d5   : > { %v1678_v39 = vadd.f32 %v1677_v38, %v1153_v37  ;;  %v4579_v40 = vpop.f32.mrb[1].mxu1 }
 0x6d6   : > { %v1680_v41 = vpop.f32.mrb[2].mxu1 }
 0x6d7   : > { %v4580_v42 = vpop.f32.mrb[3].mxu1  ;;  %v1821_v43 = vsel %vm1635_vm3, %v1678_v39, -inf }
 0x6d8   : > { %1822 = vmax.xlane.f32.xlu1 %v1821_v43 }
 0x6dc   : > { %v1723_v44 = vpop.f32.mrb[4].mxu1 }
 0x6dd   : > { %v1724_v46 = vadd.f32 %v1723_v44, %v1153_v37  ;;  %v4585_v47 = vpop.f32.mrb[5].mxu1 }
 0x6de   : > { %v1726_v48 = vpop.f32.mrb[6].mxu1 }
 0x6df   : > { %v4586_v50 = vpop.f32.mrb[7].mxu1  ;;  %v1824_v51 = vsel %vm1635_vm3, %v1724_v46, -inf }
 0x6e0   : > { %1825 = vmax.xlane.f32.xlu0 %v1824_v51 }
 0x6e4   : > { %v1769_v53 = vpop.f32.mrb[8].mxu1 }
 0x6e5   : > { %v1770_v54 = vadd.f32 %v1769_v53, %v1153_v37  ;;  %v4591_v55 = vpop.f32.mrb[9].mxu1 }
 0x6e6   : > { %v1772_v56 = vpop.f32.mrb[10].mxu1 }
 0x6e7   : > { %v4592_v57 = vpop.f32.mrb[11].mxu1  ;;  %v1827_v58 = vsel %vm1635_vm3, %v1770_v54, -inf }
 0x6e8   : > { %1828 = vmax.xlane.f32.xlu1 %v1827_v58 }
 0x6ec   : > { %v1815_v59 = vpop.f32.mrb[12].mxu1 }
 0x6ed   : > { %v1816_v60 = vadd.f32 %v1815_v59, %v1153_v37  ;;  %v4597_v61 = vpop.f32.mrb[13].mxu1 }
 0x6ee   : > { %v1818_v62 = vpop.f32.mrb[14].mxu1 }
 0x6ef   : > { %v4598_v63 = vpop.f32.mrb[15].mxu1  ;;  %v1830_v0 = vsel %vm1635_vm3, %v1816_v60, -inf }
 0x6f0   : > { %1831 = vmax.xlane.f32.xlu0 %v1830_v0 }
 0x6f9   : > { %1061 = vrot.lane.b32.xlu1 %v6185_v27, %s5549_s24 }
 0x765   : > { %v1823_v1 = vpop.xlane.xlu1 %1822 }
 0x766   : > { %v1833_v2 = vsub.f32 %v1678_v39, %v1823_v1 }
 0x768   : > { %v1837_v3 = vmul.f32 1.442695, %v1833_v2 }
 0x76a   : > { %4958 = vpow2.f32 %v1837_v3 }
 0x76d   : > { %v1826_v4 = vpop.xlane.xlu0 %1825 }
 0x76e   : > { %v1834_v5 = vsub.f32 %v1724_v46, %v1826_v4 }
 0x770   : > { %v1839_v6 = vmul.f32 1.442695, %v1834_v5 }
 0x772   : > { %4960 = vpow2.f32 %v1839_v6 }
 0x774   : > { %v6298_v7 = vpop.eup %4958 }
 0x775   : > { %v1845_v9 = vsel %vm1635_vm3, %v6298_v7, 0.0  ;;  %v1829_v13 = vpop.xlane.xlu1 %1828 }
 0x776   : > { %1846 = vadd.xlane.f32.xlu1 %v1845_v9  ;;  %v1835_v18 = vsub.f32 %v1770_v54, %v1829_v13 }
 0x778   : > { %v1841_v20 = vmul.f32 1.442695, %v1835_v18 }
 0x77c   : > { %v6302_v10 = vpop.eup %4960 }
 0x77d   : > { %v1848_v11 = vsel %vm1635_vm3, %v6302_v10, 0.0  ;;  %v1832_v27 = vpop.xlane.xlu0 %1831 }
 0x77e   : > { %1849 = vadd.xlane.f32.xlu0 %v1848_v11  ;;  %v1836_v12 = vsub.f32 %v1816_v60, %v1832_v27 }
 0x780   : > { %v1843_v19 = vmul.f32 1.442695, %v1836_v12 }
 0x782   : > { %4962 = vpow2.f32 %v1843_v19 }
 0x783   : > { %4964 = vpow2.f32 %v1841_v20 }
 0x787   : > { %1065 = vrot.lane.b32.xlu1 %v6197_v32, %s5549_s24 }
 0x78b   : > { %1067 = vrot.lane.b32.xlu1 %v6200_v33, %s5549_s24 }
 0x78c   : > { %v6309_v21 = vpop.eup %4962 }
 0x78d   : > { %v1854_v22 = vsel %vm1635_vm3, %v6309_v21, 0.0  ;;  %v6313_v23 = vpop.eup %4964 }
 0x78e   : > { %v1851_v32 = vsel %vm1635_vm3, %v6313_v23, 0.0 }
 0x794   : > { %1063 = vrot.lane.b32.xlu0 %v6194_v31, %s5549_s24  ;;  %v1062_v31 = vpop.permute.xlu1 %1061 }
 0x7af   : > { %1855 = vadd.xlane.f32.xlu1 %v1854_v22 }
 0x7b3   : > { %1852 = vadd.xlane.f32.xlu0 %v1851_v32 }
 0x803   : > { %v1847_v33 = vpop.xlane.xlu1 %1846 }
 0x804   : > { %4966 = vrcp.f32 %v1847_v33 }
 0x807   : > { %v1066_v24 = vpop.permute.xlu1 %1065 }
 0x808   : > { %v1073_v26 = vcombine.low %v1062_v31, %v1066_v24  ;;  %v1074_v28 = vcombine.high %v1062_v31, %v1066_v24 }
 0x80a   : > { %v1081_v36 = vrot.slane %v1073_v26, %v6204_v45  ;;  %v1088_v37 = vrot.slane %v1074_v28, %v6204_v45 }
 0x80b   : > { %v1850_v25 = vpop.xlane.xlu0 %1849  ;;  %v1068_v29 = vpop.permute.xlu1 %1067 }
 0x80c   : > { %4968 = vrcp.f32 %v1850_v25 }
 0x80e   : > { %v4967_v63 = vpop.eup %4966 }
 0x80f   : > { %v1064_v30 = vpop.permute.xlu0 %1063  ;;  %v1861_v5 = vmul.f32 %v4967_v63, %v6298_v7 }
 0x810   : > { %v1089_v34 = vcombine.low %v1064_v30, %v1068_v29  ;;  %v1090_v35 = vcombine.high %v1064_v30, %v1068_v29 }
 0x811   : > { %v1865_v33 = vpack.c.bf16 %v1861_v5, %v1861_v5  ;;  %v785_v5 = vld [vmem:[%s653_s12] sm:$0xff] }
 0x812   : > { %v1097_v38 = vrot.slane %v1089_v34, %v6204_v45  ;;  %v1104_v39 = vrot.slane %v1090_v35, %v6204_v45 }
 0x814   : > { %v1105_v40 = vcombine.low %v1081_v36, %v1097_v38  ;;  %v1106_v41 = vcombine.high %v1081_v36, %v1097_v38  ;;  %v1121_v42 = vcombine.low %v1088_v37, %v1104_v39  ;;  %v1122_v43 = vcombine.high %v1088_v37, %v1104_v39  ;;  %v2115_v38 = vld [vmem:[#allocation16] sm:$0xf] }
 0x815   : > { %v2127_v39 = vsel %vm1639_vm2, %v2115_v38, 0 }
 0x816   : > { %v1113_v44 = vrot.slane %v1105_v40, %v6210_v52  ;;  %v1120_v46 = vrot.slane %v1106_v41, %v6210_v52  ;;  %v1129_v47 = vrot.slane %v1121_v42, %v6210_v52  ;;  %v1136_v48 = vrot.slane %v1122_v43, %v6210_v52  ;;  %v4969_v2 = vpop.eup %4968  ;;  %v2118_v42 = vld [vmem:[#allocation16 + $0xc] sm:$0xf] }
 0x817   : > { %v1862_v13 = vmul.f32 %v4969_v2, %v6302_v10 }
 0x818   : > { %v1137_v50 = vcombine.high %v1113_v44, %v5540_v8  ;;  %v1138_v51 = vcombine.high %v1120_v46, %v5540_v8  ;;  %v1139_v53 = vcombine.high %v1129_v47, %v5540_v8  ;;  %v1140_v54 = vcombine.high %v1136_v48, %v5540_v8 }
 0x819   : > { %v4445_v55 = vpack.c.bf16 %v1129_v47, %v1113_v44  ;;  %v4446_v56 = vpack.c.bf16 %v1136_v48, %v1120_v46  ;;  %v1866_v25 = vpack.c.bf16 %v1862_v13, %v1862_v13 }
 0x81a   : > { %v4447_v57 = vpack.c.bf16 %v1139_v53, %v1137_v50  ;;  %v4448_v58 = vpack.c.bf16 %v1140_v54, %v1138_v51  ;;  %v2265_v54 = vsel %vm1639_vm2, %v2118_v42, 0 }
 0x81b   : > { %v1876_v59 = vrot.slane %v4445_v55, %v6204_v45  ;;  %v1884_v60 = vrot.slane %v4446_v56, %v6204_v45 }
 0x81c   : > { %v1901_v61 = vrot.slane %v4447_v57, %v6204_v45  ;;  %v1909_v62 = vrot.slane %v4448_v58, %v6204_v45 }
 0x81d   : > { %v1885_v0 = vcombine.low %v1876_v59, %v1884_v60 }
 0x81e   : > { %v1910_v1 = vcombine.low %v1901_v61, %v1909_v62 }
 0x81f   : > { %v1892_v3 = vrot.slane %v1885_v0, %v6210_v52 }
 0x820   : > { %v1917_v4 = vrot.slane %v1910_v1, %v6210_v52 }
 0x821   : > { %v1893_v6 = vcombine.high %v1892_v3, %v5548_v49  ;;  %v1922_v11 = vshrl.u32 %v1892_v3, 16 }
 0x822   : > { %v1921_v9 = vpack.i.b16 %v1917_v4, %v1892_v3  ;;  %v1923_v27 = vshrl.u32 %v1917_v4, 16  ;;  %v1918_v12 = vcombine.high %v1917_v4, %v5548_v49  ;;  %v4944_v3 = vld [vmem:[#allocation17 + $0x10] sm:$0xff]   ;;  %v4945_v4 = vld [vmem:[#allocation17 + $0x18] sm:$0xff]  }
 0x823   : > { %v1928_v18 = vshrl.u32 %v1893_v6, 16 }
 0x824   : > { %v1935_v19 = vsel %vm1639_vm2, %v1921_v9, 0  ;;  %v1924_v20 = vpack.i.b16 %v1923_v27, %v1922_v11  ;;  %v1927_v22 = vpack.i.b16 %v1918_v12, %v1893_v6  ;;  %v1929_v32 = vshrl.u32 %v1918_v12, 16 }
 0x825   : > { %4600 = vmatpush3.bf16.msra.mxu0 %v1935_v19  ;;  %v2407_v6 = vpack.c.bf16 %v785_v5, %v785_v5 }
 0x826   : > { %v1981_v31 = vsel %vm1639_vm2, %v1924_v20, 0  ;;  %4611 = vmatprep.subr.bf16.mxu0 %v5540_v8  ;;  %v1930_v7 = vpack.i.b16 %v1929_v32, %v1928_v18  ;;  %v2027_v24 = vsel %vm1639_vm2, %v1927_v22, 0 }
 0x827   : > { %4606 = vmatpush3.bf16.msra.mxu1 %v1981_v31 }
 0x828   : > { %4602 = vmatmul.mubr.msk.bf16.vlgmr.msra.gmra.mrb[4].mxu0 %vm1635_vm3, %v1865_v33  ;;  %4617 = vmatprep.subr.bf16.mxu1 %v5540_v8  ;;  %v2073_v10 = vsel %vm1639_vm2, %v1930_v7, 0 }
 0x829   : > { %4612 = vmatpush3.bf16.msra.mxu0 %v2027_v24  ;;  %4613 = vmatprep.mubr.msk.bf16.mxu0 %vm5541_vm1, %v5540_v8 }
 0x82a   : > { %4608 = vmatmul.mubr.msk.bf16.vlgmr.msra.gmra.mrb[16].mxu1 %vm1635_vm3, %v1866_v25  ;;  %4623 = vmatprep.subr.bf16.mxu0 %v5540_v8 }
 0x82b   : > { %4618 = vmatpush3.bf16.msra.mxu1 %v2073_v10  ;;  %4619 = vmatprep.mubr.msk.bf16.mxu1 %vm5541_vm1, %v5540_v8  ;;  %v6390_v10 = vld [vmem:[#allocation20] sm:$0x3f] }
 0x82c   : > { %4629 = vmatprep.subr.bf16.mxu1 %v5540_v8 }
 0x83c   : > { %v1856_v26 = vpop.xlane.xlu1 %1855 }
 0x83d   : > { %4970 = vrcp.f32 %v1856_v26 }
 0x840   : > { %v1853_v28 = vpop.xlane.xlu0 %1852 }
 0x841   : > { %4972 = vrcp.f32 %v1853_v28 }
 0x847   : > { %v4971_v29 = vpop.eup %4970 }
 0x848   : > { %v1864_v30 = vmul.f32 %v4971_v29, %v6309_v21  ;;  %v2116_v21 = vld [vmem:[#allocation16 + $0x4] sm:$0xf] }
 0x849   : > { %v2173_v40 = vsel %vm1639_vm2, %v2116_v21, 0  ;;  %v4994_v21 = vld [vmem:[%s644_s14] sm:$0xff]  ;;  %s5550_s14 = smov [#allocation26]  }
 0x84a   : > { %v1868_v34 = vpack.c.bf16 %v1864_v30, %v1864_v30  ;;  %s5431_s20 = sshll.u32 %s5550_s14, 4  ;;  %s5432_s20 = int_to_ptr.vmem [resolvable:$false] %s5431_s20 }
 0x84b   : > { %v4973_v35 = vpop.eup %4972  ;;  %s5433_s17 = scalar_lea.vmem %s5432_s20, 256  ;;  %p5434_p2 = scmp.lt.s32.totalorder %s6624_s0, %s5432_s20 }
 0x84c   : > { %v1863_v36 = vmul.f32 %v4973_v35, %v6313_v23  ;;  %4620 = vmatmul.mubr.msk.bf16.vlgmr.msra.gmra.mrb[20].mxu1 %vm1635_vm3, %v1868_v34  ;;  %v2117_v23 = vld [vmem:[#allocation16 + $0x8] sm:$0xf]  ;;  %v2317_v34 = vrot.slane %v6390_v10, %v6172_v15  ;;  %p5435_p3 = scmp.lt.s32.totalorder %s5433_s17, %s5427_s6 }
 0x84d   : > { %4631 = vmatprep.mubr.msk.bf16.mxu1 %vm5541_vm1, %v5540_v8  ;;  %4630 = vmatpush3.bf16.msra.mxu1 %v2173_v40  ;;  %v2219_v46 = vsel %vm1639_vm2, %v2117_v23, 0 }
 0x84e   : > { %v1867_v37 = vpack.c.bf16 %v1863_v36, %v1863_v36  ;;  %4641 = vmatprep.subr.bf16.mxu1 %v5540_v8  ;;  %p5436_p4 = por %p5435_p3, %p5434_p2 }
 0x850   : > { %4614 = vmatmul.mubr.msk.bf16.vlgmr.msra.gmra.mrb[8].mxu0 %vm1635_vm3, %v1867_v37  ;;  %p5437_p12 = pnand %p5436_p4, %p5430_p9 }
 0x851   : > { %4625 = vmatprep.mubr.msk.bf16.mxu0 %vm5541_vm1, %v5540_v8  ;;  %4624 = vmatpush3.bf16.msra.mxu0 %v2127_v39 }
 0x852   : > { %4635 = vmatprep.subr.bf16.mxu0 %v5540_v8 }
 0x8fb   : > { %v1971_v41 = vpop.f32.mrb[4].mxu0 }
 0x8fc   : > { %v2119_v43 = vpack.c.bf16 %v1971_v41, %v1971_v41  ;;  %v4603_v44 = vpop.f32.mrb[5].mxu0  ;;  %v2335_v41 = vsub.s32 2, %v6169_v14 }
 0x8fd   : > { %v1974_v47 = vpop.f32.mrb[6].mxu0  ;;  %v2017_v48 = vpop.f32.mrb[16].mxu1 }
 0x8fe   : > { %v2120_v50 = vpack.c.bf16 %v2017_v48, %v2017_v48  ;;  %v4604_v51 = vpop.f32.mrb[7].mxu0  ;;  %v4609_v53 = vpop.f32.mrb[17].mxu1  ;;  %4626 = vmatmul.mubr.msk.bf16.vlgmr.msra.gmra.mrb[12].mxu0 %vm1635_vm3, %v2119_v43  ;;  %v2416_v42 = vrot.slane %v6390_v10, %v2335_v41 }
 0x8ff   : > { %v2020_v55 = vpop.f32.mrb[18].mxu1  ;;  %4636 = vmatpush3.bf16.msra.mxu0 %v2219_v46  ;;  %4637 = vmatprep.mubr.msk.bf16.mxu0 %vm5541_vm1, %v5540_v8 }
 0x900   : > { %v4610_v56 = vpop.f32.mrb[19].mxu1  ;;  %4632 = vmatmul.mubr.msk.bf16.vlgmr.msra.gmra.mrb[24].mxu1 %vm1635_vm3, %v2120_v50  ;;  %4647 = vmatprep.subr.bf16.mxu0 %v5540_v8 }
 0x901   : > { %4642 = vmatpush3.bf16.msra.mxu1 %v2265_v54  ;;  %4643 = vmatprep.mubr.msk.bf16.mxu1 %vm5541_vm1, %v5540_v8  ;;  %v4946_v56 = vld [vmem:[#allocation17] sm:$0xff]  }
 0x902   : > { %4655 = vmatprep.subr.bf16.mxu1 %v5540_v8 }
 0x91f   : > { %v2109_v57 = vpop.f32.mrb[20].mxu1 }
 0x920   : > { %v2122_v58 = vpack.c.bf16 %v2109_v57, %v2109_v57  ;;  %v4621_v59 = vpop.f32.mrb[21].mxu1  ;;  %v4947_v57 = vld [vmem:[#allocation17 + $0x8] sm:$0xff]  }
 0x921   : > { %v2112_v60 = vpop.f32.mrb[22].mxu1 }
 0x922   : > { %v4622_v61 = vpop.f32.mrb[23].mxu1  ;;  %4644 = vmatmul.mubr.msk.bf16.vlgmr.msra.gmra.mrb[28].mxu1 %vm1635_vm3, %v2122_v58 }
 0x923   : > { %v2063_v62 = vpop.f32.mrb[8].mxu0  ;;  %4659 = vmatprep.mubr.msk.bf16.mxu1 %vm5541_vm1, %v5540_v8  ;;  %4656 = vmatpush3.bf16.msra.mxu1 %v4944_v3 }
 0x924   : > { %v2121_v63 = vpack.c.bf16 %v2063_v62, %v2063_v62  ;;  %v4615_v0 = vpop.f32.mrb[9].mxu0  ;;  %4657 = vmatprep.subr.bf16.mxu1 %v5540_v8 }
 0x925   : > { %v2066_v1 = vpop.f32.mrb[10].mxu0 }
 0x926   : > { %v4616_v2 = vpop.f32.mrb[11].mxu0  ;;  %4638 = vmatmul.mubr.msk.bf16.vlgmr.msra.gmra.mrb[16].mxu0 %vm1635_vm3, %v2121_v63 }
 0x927   : > { %4651 = vmatprep.mubr.msk.bf16.mxu0 %vm5541_vm1, %v5540_v8  ;;  %4658 = vmatpush3.bf16.msra.mxu1 %v4945_v4 }
 0x928   : > { %4671 = vmatprep.subr.bf16.mxu1 %v5540_v8  ;;  %4648 = vmatpush3.bf16.msra.mxu0 %v4946_v56 }
 0x929   : > { %4649 = vmatprep.subr.bf16.mxu0 %v5540_v8 }
 0x92a   : > { %4660 = vmatmul.mubr.msk.bf16.vlgmr.msra.gmra.mrb[32].mxu1 %vm795_vm0, %v2407_v6 }
 0x92b   : > { %4673 = vmatprep.mubr.msk.bf16.mxu1 %vm5541_vm1, %v5540_v8 }
 0x92c   : > { %4650 = vmatpush3.bf16.msra.mxu0 %v4947_v57 }
 0x92d   : > { %4663 = vmatprep.subr.bf16.mxu0 %v5540_v8 }
 0x9d1   : > { %v2163_v9 = vpop.f32.mrb[12].mxu0 }
 0x9d2   : > { %v4627_v11 = vpop.f32.mrb[13].mxu0  ;;  %v2307_v13 = vsel %vm795_vm0, %v2163_v9, 0.0 }
 0x9d3   : > { %v2166_v27 = vpop.f32.mrb[14].mxu0  ;;  %v2209_v12 = vpop.f32.mrb[24].mxu1 }
 0x9d4   : > { %v2308_v18 = vsel %vm795_vm0, %v2209_v12, 0.0  ;;  %v4628_v19 = vpop.f32.mrb[15].mxu0  ;;  %v4633_v20 = vpop.f32.mrb[25].mxu1 }
 0x9d5   : > { %v2309_v22 = vadd.f32 %v2308_v18, %v2307_v13  ;;  %v2212_v32 = vpop.f32.mrb[26].mxu1  ;;  %v2340_v20 = vsub.s32 3, %v6169_v14 }
 0x9d6   : > { %v4634_v31 = vpop.f32.mrb[27].mxu1 }
 0x9f5   : > { %v2301_v33 = vpop.f32.mrb[28].mxu1 }
 0x9f6   : > { %v4645_v7 = vpop.f32.mrb[29].mxu1  ;;  %v2312_v36 = vsel %vm795_vm0, %v2301_v33, 0.0 }
 0x9f7   : > { %v2304_v24 = vpop.f32.mrb[30].mxu1  ;;  %v2336_v7 = vrot.slane %v6174_v16, %v2335_v41 }
 0x9f8   : > { %v4646_v25 = vpop.f32.mrb[31].mxu1 }
 0x9f9   : > { %v2255_v26 = vpop.f32.mrb[16].mxu0 }
 0x9fa   : > { %v2310_v28 = vsel %vm795_vm0, %v2255_v26, 0.0  ;;  %v4639_v29 = vpop.f32.mrb[17].mxu0 }
 0x9fb   : > { %v2311_v30 = vadd.f32 %v2310_v28, %v2309_v22  ;;  %v2258_v35 = vpop.f32.mrb[18].mxu0  ;;  %v6422_v28 = vld [vmem:[#allocation11] sm:$0x3f] }
 0x9fc   : > { %v4640_v37 = vpop.f32.mrb[19].mxu0  ;;  %v2341_v29 = vrot.slane %v6422_v28, %v2340_v20 }
 0x9fd   : > { %v2313_v38 = vadd.f32 %v2312_v36, %v2311_v30  ;;  %v2466_v43 = vpop.f32.mrb[32].mxu1 }
 0x9fe   : > { %v2467_v44 = vadd.f32 %v2466_v43, %v2416_v42  ;;  %v4661_v46 = vpop.f32.mrb[33].mxu1 }
 0x9ff   : > { %v2318_v39 = vadd.f32 %v2317_v34, %v2313_v38  ;;  %v2469_v47 = vpop.f32.mrb[34].mxu1 }
 0xa00   : > { %2624 = vrot.lane.b32.xlu1 %v2467_v44, %s5543_s5  ;;  %v4662_v48 = vpop.f32.mrb[35].mxu1 }
 0xa01   : > { %v6398_v40 = vadd.f32 %v4994_v21, %v2318_v39 }
 0xa03   : > { %v2320_v23 = vsel %vm795_vm0, %v6398_v40, 0.0 }
 0xa04   : > { %2321 = vadd.xlane.f32.xlu0 %v2320_v23  ;;  %2630 = vrot.lane.b32.xlu1 %v2467_v44, %s5542_s29 }
 0xa72   : > { %v2625_v58 = vpop.permute.xlu1 %2624 }
 0xa76   : > { %v2631_v59 = vpop.permute.xlu1 %2630 }
 0xa77   : > { %v2649_v61 = vcombine.low %v2625_v58, %v2631_v59  ;;  %v2650_v63 = vcombine.high %v2625_v58, %v2631_v59 }
 0xa79   : > { %v2657_v1 = vrot.slane %v2649_v61, %v6204_v45  ;;  %v2664_v3 = vrot.slane %v2650_v63, %v6204_v45 }
 0xa91   : > { %v2322_v50 = vpop.xlane.xlu0 %2321 }
 0xa92   : > { %v2323_v51 = vmul.f32 0.03125, %v2322_v50 }
 0xa94   : > { %v2324_v53 = vsub.f32 %v6398_v40, %v2323_v51 }
 0xa96   : > { %v2325_v54 = vmul.f32 %v2324_v53, %v2324_v53 }
 0xa98   : > { %v2326_v55 = vsel %vm795_vm0, %v2325_v54, 0.0 }
 0xa99   : > { %2327 = vadd.xlane.f32.xlu0 %v2326_v55 }
 0xaaf   : > { %2627 = vrot.lane.b32.xlu0 %v2467_v44, %s5544_s15 }
 0xb26   : > { %v2328_v60 = vpop.xlane.xlu0 %2327 }
 0xb27   : > { %v2329_v62 = vmul.f32 0.03125, %v2328_v60 }
 0xb29   : > { %v2330_v0 = vadd.f32 1e-06, %v2329_v62 }
 0xb2a   : > { %v2628_v2 = vpop.permute.xlu0 %2627 }
 0xb2b   : > { %4974 = vrsqrt.f32 %v2330_v0  ;;  %v2633_v4 = vcombine.low %v2467_v44, %v2628_v2  ;;  %v2634_v5 = vcombine.high %v2467_v44, %v2628_v2 }
 0xb2d   : > { %v2641_v6 = vrot.slane %v2633_v4, %v6204_v45  ;;  %v2648_v9 = vrot.slane %v2634_v5, %v6204_v45 }
 0xb2f   : > { %v2665_v11 = vcombine.low %v2641_v6, %v2657_v1  ;;  %v2666_v27 = vcombine.high %v2641_v6, %v2657_v1  ;;  %v2681_v12 = vcombine.low %v2648_v9, %v2664_v3  ;;  %v2682_v19 = vcombine.high %v2648_v9, %v2664_v3 }
 0xb31   : > { %v2673_v13 = vrot.slane %v2665_v11, %v6210_v52  ;;  %v2680_v18 = vrot.slane %v2666_v27, %v6210_v52  ;;  %v2689_v33 = vrot.slane %v2681_v12, %v6210_v52  ;;  %v2696_v35 = vrot.slane %v2682_v19, %v6210_v52 }
 0xb33   : > { %v2701_v22 = vpack.c.bf16 %v2673_v13, %v2673_v13  ;;  %v2697_v32 = vcombine.high %v2673_v13, %v5540_v8  ;;  %v2698_v31 = vcombine.high %v2680_v18, %v5540_v8  ;;  %v2699_v34 = vcombine.high %v2689_v33, %v5540_v8 }
 0xb34   : > { %v2703_v37 = vpack.c.bf16 %v2680_v18, %v2680_v18  ;;  %v2700_v39 = vcombine.high %v2696_v35, %v5540_v8  ;;  %v2705_v23 = vpack.c.bf16 %v2689_v33, %v2689_v33  ;;  %v2707_v42 = vpack.c.bf16 %v2696_v35, %v2696_v35 }
 0xb35   : > { %v4975_v24 = vpop.eup %4974  ;;  %2863 = vxpose.xlu1.c.b16.start.end [1/1] (short) (narrow) %v2701_v22, 16  ;;  %v2702_v25 = vpack.c.bf16 %v2697_v32, %v2697_v32  ;;  %v2704_v30 = vpack.c.bf16 %v2698_v31, %v2698_v31  ;;  %v2706_v38 = vpack.c.bf16 %v2699_v34, %v2699_v34 }
 0xb36   : > { %v2332_v26 = vmul.f32 %v4975_v24, %v2324_v53  ;;  %v2708_v41 = vpack.c.bf16 %v2700_v39, %v2700_v39 }
 0xb37   : > { %2879 = vxpose.xlu0.c.b16.start.end [1/1] (short) (narrow) %v2702_v25, 16 }
 0xb38   : > { %v2337_v36 = vmul.f32 %v2336_v7, %v2332_v26 }
 0xb39   : > { %2911 = vxpose.xlu1.c.b16.start.end [1/1] (short) (narrow) %v2704_v30, 16 }
 0xb3a   : > { %v2342_v16 = vadd.f32 %v2341_v29, %v2337_v36  ;;  %v2351_v36 = vrot.slane %v6390_v10, %v817_v17 }
 0xb3b   : > { %2895 = vxpose.xlu0.c.b16.start.end [1/1] (short) (narrow) %v2703_v37, 16 }
 0xb3c   : > { %v2343_v21 = vpack.c.bf16 %v2342_v16, %v2342_v16 }
 0xb3d   : > { %2943 = vxpose.xlu1.c.b16.start.end [1/1] (short) (narrow) %v2706_v38, 16 }
 0xb3e   : > { %4652 = vmatmul.mubr.msk.bf16.vlgmr.msra.gmra.mrb[20].mxu0 %vm795_vm0, %v2343_v21 }
 0xb3f   : > { %2927 = vxpose.xlu0.c.b16.start.end [1/1] (short) (narrow) %v2705_v23, 16  ;;  %4667 = vmatprep.mubr.msk.bf16.mxu0 %vm5541_vm1, %v5540_v8  ;;  %v4948_v23 = vld [vmem:[#allocation17 + $0x20] sm:$0xff]  }
 0xb40   : > { %4664 = vmatpush3.bf16.msra.mxu0 %v4948_v23 }
 0xb41   : > { %2975 = vxpose.xlu1.c.b16.start.end [1/1] (short) (narrow) %v2708_v41, 16  ;;  %4665 = vmatprep.subr.bf16.mxu0 %v5540_v8  ;;  %v4949_v41 = vld [vmem:[#allocation17 + $0x28] sm:$0xff]  }
 0xb43   : > { %2959 = vxpose.xlu0.c.b16.start.end [1/1] (short) (narrow) %v2707_v42, 16  ;;  %v786_v42 = vld [vmem:[%s662_s23] sm:$0xff] }
 0xb44   : > { %4666 = vmatpush3.bf16.msra.mxu0 %v4949_v41  ;;  %v2472_v17 = vpack.c.bf16 %v786_v42, %v786_v42 }
 0xb45   : > { %4677 = vmatprep.subr.bf16.mxu0 %v5540_v8 }
 0xb47   : > { %4668 = vmatmul.mubr.msk.bf16.vlgmr.msra.gmra.mrb[24].mxu0 %vm795_vm0, %v2472_v17 }
 0xb48   : > { %4679 = vmatprep.mubr.msk.bf16.mxu0 %vm5541_vm1, %v5540_v8 }
 0xb9b   : > { %v2871_v43 = vpop.trf.xlu1 }
 0xb9d   : > { %v2887_v44 = vpop.trf.xlu0 }
 0xb9f   : > { %v2919_v46 = vpop.trf.xlu1 }
 0xba1   : > { %v2903_v47 = vpop.trf.xlu0 }
 0xba3   : > { %v2951_v48 = vpop.trf.xlu1 }
 0xba4   : > { %v3025_v50 = vcombine.low %v2887_v44, %v2951_v48 }
 0xba5   : > { %v2935_v51 = vpop.trf.xlu0 }
 0xba6   : > { %v2991_v53 = vcombine.low %v2871_v43, %v2935_v51  ;;  %v3032_v55 = vrot.slane %v3025_v50, %v6204_v45 }
 0xba7   : > { %v2983_v54 = vpop.trf.xlu1 }
 0xba8   : > { %v3033_v56 = vcombine.low %v2919_v46, %v2983_v54  ;;  %v2998_v58 = vrot.slane %v2991_v53, %v6204_v45 }
 0xba9   : > { %v2967_v57 = vpop.trf.xlu0 }
 0xbaa   : > { %v3040_v59 = vrot.slane %v3033_v56, %v6204_v45  ;;  %v2999_v60 = vcombine.low %v2903_v47, %v2967_v57 }
 0xbac   : > { %v3041_v61 = vcombine.low %v3032_v55, %v3040_v59  ;;  %v3042_v62 = vcombine.high %v3032_v55, %v3040_v59  ;;  %v3006_v63 = vrot.slane %v2999_v60, %v6204_v45 }
 0xbae   : > { %v3007_v0 = vcombine.low %v2998_v58, %v3006_v63  ;;  %v3008_v1 = vcombine.high %v2998_v58, %v3006_v63  ;;  %v3049_v2 = vrot.slane %v3041_v61, %v6210_v52  ;;  %v3056_v3 = vrot.slane %v3042_v62, %v6210_v52 }
 0xbb0   : > { %v3015_v4 = vrot.slane %v3007_v0, %v6210_v52  ;;  %v3057_v5 = vcombine.high %v3049_v2, %v5548_v49  ;;  %v3022_v6 = vrot.slane %v3008_v1, %v6210_v52  ;;  %v3064_v9 = vshrl.u32 %v3049_v2, 16 }
 0xbb1   : > { %v3058_v11 = vcombine.high %v3056_v3, %v5548_v49  ;;  %v3080_v33 = vshrl.u32 %v3056_v3, 16 }
 0xbb2   : > { %v3061_v27 = vpack.i.b16 %v3049_v2, %v3015_v4  ;;  %v3023_v12 = vcombine.high %v3015_v4, %v5548_v49  ;;  %v3077_v13 = vpack.i.b16 %v3056_v3, %v3022_v6  ;;  %v3063_v18 = vshrl.u32 %v3015_v4, 16 }
 0xbb3   : > { %v3024_v19 = vcombine.high %v3022_v6, %v5548_v49  ;;  %v3088_v22 = vshrl.u32 %v3058_v11, 16  ;;  %v3079_v31 = vshrl.u32 %v3022_v6, 16  ;;  %v3072_v34 = vshrl.u32 %v3057_v5, 16 }
 0xbb4   : > { %3091 = vxpose.xlu0.c.b16.start.end [1/1] (short) (narrow) %v3061_v27, 16  ;;  %v3069_v32 = vpack.i.b16 %v3057_v5, %v3023_v12  ;;  %3155 = vxpose.xlu1.c.b16.start.end [1/1] (short) (narrow) %v3077_v13, 16  ;;  %v3065_v7 = vpack.i.b16 %v3064_v9, %v3063_v18  ;;  %v3071_v30 = vshrl.u32 %v3023_v12, 16 }
 0xbb5   : > { %v3087_v24 = vshrl.u32 %v3024_v19, 16  ;;  %v3085_v25 = vpack.i.b16 %v3058_v11, %v3024_v19  ;;  %v3081_v29 = vpack.i.b16 %v3080_v33, %v3079_v31 }
 0xbb6   : > { %v3073_v35 = vpack.i.b16 %v3072_v34, %v3071_v30 }
 0xbb7   : > { %v3089_v26 = vpack.i.b16 %v3088_v22, %v3087_v24 }
 0xbb8   : > { %3123 = vxpose.xlu0.c.b16.start.end [1/1] (short) (narrow) %v3069_v32, 16  ;;  %3107 = vxpose.xlu1.c.b16.start.end [1/1] (short) (narrow) %v3065_v7, 16 }
 0xbbc   : > { %3171 = vxpose.xlu0.c.b16.start.end [1/1] (short) (narrow) %v3081_v29, 16 }
 0xbc0   : > { %3139 = vxpose.xlu0.c.b16.start.end [1/1] (short) (narrow) %v3073_v35, 16 }
 0xc11   : > { %v2401_v37 = vpop.f32.mrb[20].mxu0 }
 0xc12   : > { %v2402_v16 = vadd.f32 %v2401_v37, %v2351_v36  ;;  %v4653_v38 = vpop.f32.mrb[21].mxu0 }
 0xc13   : > { %v2404_v39 = vpop.f32.mrb[22].mxu0 }
 0xc14   : > { %2541 = vrot.lane.b32.xlu1 %v2402_v16, %s5544_s15  ;;  %2538 = vrot.lane.b32.xlu0 %v2402_v16, %s5543_s5  ;;  %v4654_v21 = vpop.f32.mrb[23].mxu0 }
 0xc18   : > { %2544 = vrot.lane.b32.xlu1 %v2402_v16, %s5542_s29 }
 0xc1a   : > { %v3099_v43 = vpop.trf.xlu0  ;;  %v3163_v46 = vpop.trf.xlu1 }
 0xc1b   : > { %v3219_v30 = vcombine.low %v3099_v43, %v3163_v46 }
 0xc1d   : > { %v3226_v39 = vrot.slane %v3219_v30, %v6204_v45 }
 0xc1e   : > { %v3131_v44 = vpop.trf.xlu0  ;;  %v3115_v48 = vpop.trf.xlu1 }
 0xc22   : > { %v3179_v47 = vpop.trf.xlu0 }
 0xc23   : > { %v3244_v18 = vcombine.low %v3115_v48, %v3179_v47 }
 0xc25   : > { %v3251_v33 = vrot.slane %v3244_v18, %v6204_v45 }
 0xc26   : > { %v3147_v50 = vpop.trf.xlu0 }
 0xc32   : > { %3203 = vxpose.xlu0.c.b16.start.end [1/1] (short) (narrow) %v3089_v26, 16 }
 0xc3b   : > { %3187 = vxpose.xlu1.c.b16.start.end [1/1] (short) (narrow) %v3085_v25, 16 }
 0xc86   : > { %v2542_v51 = vpop.permute.xlu1 %2541  ;;  %v2539_v55 = vpop.permute.xlu0 %2538 }
 0xc87   : > { %v2547_v53 = vcombine.low %v2402_v16, %v2542_v51  ;;  %v2548_v54 = vcombine.high %v2402_v16, %v2542_v51 }
 0xc89   : > { %v2555_v59 = vrot.slane %v2547_v53, %v6204_v45  ;;  %v2562_v60 = vrot.slane %v2548_v54, %v6204_v45 }
 0xc8a   : > { %v2545_v56 = vpop.permute.xlu1 %2544 }
 0xc8b   : > { %v2563_v57 = vcombine.low %v2539_v55, %v2545_v56  ;;  %v2564_v58 = vcombine.high %v2539_v55, %v2545_v56 }
 0xc8d   : > { %v2571_v61 = vrot.slane %v2563_v57, %v6204_v45  ;;  %v2578_v62 = vrot.slane %v2564_v58, %v6204_v45 }
 0xc8f   : > { %v2579_v63 = vcombine.low %v2555_v59, %v2571_v61  ;;  %v2580_v0 = vcombine.high %v2555_v59, %v2571_v61  ;;  %v2595_v1 = vcombine.low %v2562_v60, %v2578_v62  ;;  %v2596_v2 = vcombine.high %v2562_v60, %v2578_v62 }
 0xc91   : > { %v2587_v3 = vrot.slane %v2579_v63, %v6210_v52  ;;  %v2594_v4 = vrot.slane %v2580_v0, %v6210_v52  ;;  %v2603_v5 = vrot.slane %v2595_v1, %v6210_v52  ;;  %v2610_v6 = vrot.slane %v2596_v2, %v6210_v52 }
 0xc93   : > { %v2611_v9 = vcombine.high %v2587_v3, %v5540_v8  ;;  %v2612_v11 = vcombine.high %v2594_v4, %v5540_v8  ;;  %v2613_v27 = vcombine.high %v2603_v5, %v5540_v8  ;;  %v2614_v12 = vcombine.high %v2610_v6, %v5540_v8 }
 0xc94   : > { %v4466_v7 = vpack.c.bf16 %v2603_v5, %v2587_v3  ;;  %v4467_v24 = vpack.c.bf16 %v2610_v6, %v2594_v4 }
 0xc95   : > { %v4468_v22 = vpack.c.bf16 %v2613_v27, %v2611_v9  ;;  %v4469_v32 = vpack.c.bf16 %v2614_v12, %v2612_v11  ;;  %v2531_v9 = vpop.f32.mrb[24].mxu0 }
 0xc96   : > { %v2808_v34 = vrot.slane %v4466_v7, %v6204_v45  ;;  %v2816_v35 = vrot.slane %v4467_v24, %v6204_v45  ;;  %v4669_v11 = vpop.f32.mrb[25].mxu0 }
 0xc97   : > { %v2833_v25 = vrot.slane %v4468_v22, %v6204_v45  ;;  %v2841_v26 = vrot.slane %v4469_v32, %v6204_v45  ;;  %v2534_v27 = vpop.f32.mrb[26].mxu0 }
 0xc98   : > { %v3211_v13 = vpop.trf.xlu0  ;;  %v2817_v23 = vcombine.low %v2808_v34, %v2816_v35  ;;  %v4670_v12 = vpop.f32.mrb[27].mxu0 }
 0xc99   : > { %v3252_v19 = vcombine.low %v3147_v50, %v3211_v13  ;;  %v2842_v16 = vcombine.low %v2833_v25, %v2841_v26  ;;  %v790_v13 = vld [vmem:[%s678_s3] sm:$0x1] }
 0xc9a   : > { %v2824_v46 = vrot.slane %v2817_v23, %v6210_v52  ;;  %vm791_vm5 = vcmp.gt.f32.partialorder %v790_v13, 0.5 }
 0xc9b   : > { %v3259_v31 = vrot.slane %v3252_v19, %v6204_v45  ;;  %v2849_v42 = vrot.slane %v2842_v16, %v6210_v52  ;;  %v792_v18 = vsel %vm791_vm5, -1e+18, %v5540_v8 }
 0xc9c   : > { %v2854_v60 = vshrl.u32 %v2824_v46, 16  ;;  %v2825_v2 = vcombine.high %v2824_v46, %v5548_v49  ;;  %v2799_v19 = vrot.slane %v792_v18, %v6172_v15 }
 0xc9d   : > { %v3260_v29 = vcombine.low %v3251_v33, %v3259_v31  ;;  %v2855_v51 = vshrl.u32 %v2849_v42, 16  ;;  %v2853_v59 = vpack.i.b16 %v2849_v42, %v2824_v46  ;;  %v2850_v0 = vcombine.high %v2849_v42, %v5548_v49 }
 0xc9e   : > { %v2860_v5 = vshrl.u32 %v2825_v2, 16  ;;  %v2481_v46 = vrot.slane %v6390_v10, %v2340_v20 }
 0xc9f   : > { %v3267_v38 = vrot.slane %v3260_v29, %v6210_v52  ;;  %v2856_v63 = vpack.i.b16 %v2855_v51, %v2854_v60  ;;  %v2861_v3 = vshrl.u32 %v2850_v0, 16  ;;  %v2859_v4 = vpack.i.b16 %v2850_v0, %v2825_v2 }
 0xca1   : > { %v3195_v36 = vpop.trf.xlu1  ;;  %v3268_v17 = vcombine.high %v3267_v38, %v5548_v49  ;;  %v2862_v6 = vpack.i.b16 %v2861_v3, %v2860_v5 }
 0xca2   : > { %v3227_v37 = vcombine.low %v3131_v44, %v3195_v36  ;;  %v3273_v44 = vshrl.u32 %v3267_v38, 16 }
 0xca3   : > { %v3279_v53 = vshrl.u32 %v3268_v17, 16 }
 0xca4   : > { %v3234_v21 = vrot.slane %v3227_v37, %v6204_v45 }
 0xca6   : > { %v3235_v41 = vcombine.low %v3226_v39, %v3234_v21 }
 0xca8   : > { %v3242_v43 = vrot.slane %v3235_v41, %v6210_v52 }
 0xcaa   : > { %v3271_v47 = vpack.i.b16 %v3267_v38, %v3242_v43  ;;  %v3272_v48 = vshrl.u32 %v3242_v43, 16  ;;  %v3243_v50 = vcombine.high %v3242_v43, %v5548_v49 }
 0xcac   : > { %v3285_v54 = vsel %vm1639_vm2, %v3271_v47, 0  ;;  %v3274_v55 = vpack.i.b16 %v3273_v44, %v3272_v48  ;;  %v3277_v56 = vpack.i.b16 %v3268_v17, %v3243_v50  ;;  %v3278_v57 = vshrl.u32 %v3243_v50, 16 }
 0xcad   : > { %4672 = vmatpush3.bf16.msra.mxu1 %v3285_v54  ;;  %v2532_v47 = vadd.f32 %v2531_v9, %v2481_v46 }
 0xcae   : > { %v3331_v58 = vsel %vm1639_vm2, %v3274_v55, 0  ;;  %4683 = vmatprep.subr.bf16.mxu1 %v5540_v8  ;;  %v3280_v61 = vpack.i.b16 %v3279_v53, %v3278_v57  ;;  %v3377_v62 = vsel %vm1639_vm2, %v3277_v56, 0 }
 0xcaf   : > { %4678 = vmatpush3.bf16.msra.mxu0 %v3331_v58 }
 0xcb0   : > { %4674 = vmatmul.mubr.msk.bf16.vlgmr.msra.gmra.mrb[36].mxu1 %vm1635_vm3, %v2853_v59  ;;  %4689 = vmatprep.subr.bf16.mxu0 %v5540_v8  ;;  %v3423_v1 = vsel %vm1639_vm2, %v3280_v61, 0 }
 0xcb1   : > { %4684 = vmatpush3.bf16.msra.mxu1 %v3377_v62  ;;  %4685 = vmatprep.mubr.msk.bf16.mxu1 %vm5541_vm1, %v5540_v8 }
 0xcb2   : > { %4680 = vmatmul.mubr.msk.bf16.vlgmr.msra.gmra.mrb[28].mxu0 %vm1635_vm3, %v2856_v63  ;;  %4695 = vmatprep.subr.bf16.mxu1 %v5540_v8 }
 0xcb3   : > { %4690 = vmatpush3.bf16.msra.mxu0 %v3423_v1  ;;  %4691 = vmatprep.mubr.msk.bf16.mxu0 %vm5541_vm1, %v5540_v8 }
 0xcb4   : > { %4701 = vmatprep.subr.bf16.mxu0 %v5540_v8 }
 0xcb8   : > { %4686 = vmatmul.mubr.msk.bf16.vlgmr.msra.gmra.mrb[40].mxu1 %vm1635_vm3, %v2859_v4 }
 0xcb9   : > { %4697 = vmatprep.mubr.msk.bf16.mxu1 %vm5541_vm1, %v5540_v8 }
 0xcba   : > { %4692 = vmatmul.mubr.msk.bf16.vlgmr.msra.gmra.mrb[32].mxu0 %vm1635_vm3, %v2862_v6 }
 0xcbb   : > { %4703 = vmatprep.mubr.msk.bf16.mxu0 %vm5541_vm1, %v5540_v8 }
 0xd83   : > { %v3321_v22 = vpop.f32.mrb[36].mxu1 }
 0xd84   : > { %v3322_v32 = vadd.f32 %v3321_v22, %v2799_v19  ;;  %v4675_v31 = vpop.f32.mrb[37].mxu1 }
 0xd85   : > { %v3324_v33 = vpop.f32.mrb[38].mxu1  ;;  %v3367_v7 = vpop.f32.mrb[28].mxu0 }
 0xd86   : > { %v3368_v24 = vadd.f32 %v3367_v7, %v2799_v19  ;;  %v4676_v25 = vpop.f32.mrb[39].mxu1  ;;  %v4681_v26 = vpop.f32.mrb[29].mxu0  ;;  %v3465_v29 = vsel %vm1635_vm3, %v3322_v32, -inf }
 0xd87   : > { %3466 = vmax.xlane.f32.xlu1 %v3465_v29  ;;  %v3370_v30 = vpop.f32.mrb[30].mxu0 }
 0xd88   : > { %v4682_v34 = vpop.f32.mrb[31].mxu0  ;;  %v3468_v35 = vsel %vm1635_vm3, %v3368_v24, -inf }
 0xd89   : > { %3469 = vmax.xlane.f32.xlu0 %v3468_v35 }
 0xd8b   : > { %v3413_v36 = vpop.f32.mrb[40].mxu1 }
 0xd8c   : > { %v3414_v37 = vadd.f32 %v3413_v36, %v2799_v19  ;;  %v4687_v16 = vpop.f32.mrb[41].mxu1 }
 0xd8d   : > { %v3416_v15 = vpop.f32.mrb[42].mxu1  ;;  %v3459_v38 = vpop.f32.mrb[32].mxu0 }
 0xd8e   : > { %v3460_v39 = vadd.f32 %v3459_v38, %v2799_v19  ;;  %v4688_v21 = vpop.f32.mrb[43].mxu1  ;;  %v4693_v23 = vpop.f32.mrb[33].mxu0  ;;  %v3471_v41 = vsel %vm1635_vm3, %v3414_v37, -inf }
 0xd8f   : > { %3472 = vmax.xlane.f32.xlu1 %v3471_v41  ;;  %v3462_v42 = vpop.f32.mrb[34].mxu0 }
 0xd90   : > { %v4694_v17 = vpop.f32.mrb[35].mxu0  ;;  %v3474_v43 = vsel %vm1635_vm3, %v3460_v39, -inf }
 0xd91   : > { %3475 = vmax.xlane.f32.xlu0 %v3474_v43 }
 0xda0   : > { %2710 = vrot.lane.b32.xlu1 %v2532_v47, %s5543_s5 }
 0xe14   : > { %v3467_v48 = vpop.xlane.xlu1 %3466 }
 0xe15   : > { %v3477_v44 = vsub.f32 %v3322_v32, %v3467_v48 }
 0xe16   : > { %v3470_v50 = vpop.xlane.xlu0 %3469 }
 0xe17   : > { %v3481_v51 = vmul.f32 1.442695, %v3477_v44  ;;  %v3478_v53 = vsub.f32 %v3368_v24, %v3470_v50 }
 0xe19   : > { %4976 = vpow2.f32 %v3481_v51  ;;  %v3483_v54 = vmul.f32 1.442695, %v3478_v53 }
 0xe1b   : > { %4978 = vpow2.f32 %v3483_v54 }
 0xe1c   : > { %v3473_v58 = vpop.xlane.xlu1 %3472 }
 0xe1d   : > { %v3479_v60 = vsub.f32 %v3414_v37, %v3473_v58 }
 0xe1e   : > { %v3476_v59 = vpop.xlane.xlu0 %3475 }
 0xe1f   : > { %v3480_v61 = vsub.f32 %v3460_v39, %v3476_v59  ;;  %v3485_v62 = vmul.f32 1.442695, %v3479_v60 }
 0xe20   : > { %v2711_v4 = vpop.permute.xlu1 %2710 }
 0xe21   : > { %v3487_v63 = vmul.f32 1.442695, %v3480_v61  ;;  %4980 = vpow2.f32 %v3485_v62 }
 0xe23   : > { %v6518_v55 = vpop.eup %4976  ;;  %4982 = vpow2.f32 %v3487_v63 }
 0xe24   : > { %v3489_v56 = vsel %vm1635_vm3, %v6518_v55, 0.0 }
 0xe25   : > { %v6522_v57 = vpop.eup %4978  ;;  %3490 = vadd.xlane.f32.xlu1 %v3489_v56 }
 0xe26   : > { %v3492_v20 = vsel %vm1635_vm3, %v6522_v57, 0.0 }
 0xe27   : > { %3493 = vadd.xlane.f32.xlu0 %v3492_v20 }
 0xe2b   : > { %v6528_v0 = vpop.eup %4980 }
 0xe2c   : > { %v3495_v2 = vsel %vm1635_vm3, %v6528_v0, 0.0 }
 0xe2d   : > { %v6530_v1 = vpop.eup %4982 }
 0xe2e   : > { %v3498_v3 = vsel %vm1635_vm3, %v6530_v1, 0.0 }
 0xe36   : > { %2716 = vrot.lane.b32.xlu1 %v2532_v47, %s5542_s29 }
 0xe3d   : > { %2713 = vrot.lane.b32.xlu0 %v2532_v47, %s5544_s15 }
 0xe5a   : > { %3496 = vadd.xlane.f32.xlu1 %v3495_v2 }
 0xe5c   : > { %3499 = vadd.xlane.f32.xlu0 %v3498_v3 }
 0xeb2   : > { %v3491_v5 = vpop.xlane.xlu1 %3490 }
 0xeb3   : > { %4984 = vrcp.f32 %v3491_v5 }
 0xeb4   : > { %v3494_v6 = vpop.xlane.xlu0 %3493 }
 0xeb5   : > { %4986 = vrcp.f32 %v3494_v6 }
 0xeb6   : > { %v2717_v9 = vpop.permute.xlu1 %2716 }
 0xeb7   : > { %v2735_v11 = vcombine.low %v2711_v4, %v2717_v9  ;;  %v2736_v27 = vcombine.high %v2711_v4, %v2717_v9 }
 0xeb8   : > { %v2714_v12 = vpop.permute.xlu0 %2713 }
 0xeb9   : > { %v2719_v13 = vcombine.low %v2532_v47, %v2714_v12  ;;  %v2720_v18 = vcombine.high %v2532_v47, %v2714_v12  ;;  %v2743_v19 = vrot.slane %v2735_v11, %v6204_v45  ;;  %v2750_v22 = vrot.slane %v2736_v27, %v6204_v45 }
 0xebb   : > { %v2727_v32 = vrot.slane %v2719_v13, %v6204_v45  ;;  %v2734_v31 = vrot.slane %v2720_v18, %v6204_v45  ;;  %v3759_v18 = vld [vmem:[#allocation19] sm:$0xf] }
 0xebd   : > { %v2751_v33 = vcombine.low %v2727_v32, %v2743_v19  ;;  %v2752_v7 = vcombine.high %v2727_v32, %v2743_v19  ;;  %v2767_v24 = vcombine.low %v2734_v31, %v2750_v22  ;;  %v2768_v25 = vcombine.high %v2734_v31, %v2750_v22  ;;  %v4985_v43 = vpop.eup %4984  ;;  %v3762_v31 = vld [vmem:[#allocation19 + $0xc] sm:$0xf] }
 0xebe   : > { %v3505_v51 = vmul.f32 %v4985_v43, %v6518_v55  ;;  %v3771_v19 = vsel %vm1639_vm2, %v3759_v18, 0 }
 0xebf   : > { %v2759_v26 = vrot.slane %v2751_v33, %v6210_v52  ;;  %v2766_v29 = vrot.slane %v2752_v7, %v6210_v52  ;;  %v2775_v30 = vrot.slane %v2767_v24, %v6210_v52  ;;  %v2782_v34 = vrot.slane %v2768_v25, %v6210_v52  ;;  %v4987_v48 = vpop.eup %4986 }
 0xec0   : > { %v3506_v59 = vmul.f32 %v4987_v48, %v6522_v57  ;;  %v3509_v2 = vpack.c.bf16 %v3505_v51, %v3505_v51 }
 0xec1   : > { %v2783_v35 = vcombine.high %v2759_v26, %v5540_v8  ;;  %v2784_v36 = vcombine.high %v2766_v29, %v5540_v8  ;;  %v2785_v37 = vcombine.high %v2775_v30, %v5540_v8  ;;  %v2786_v16 = vcombine.high %v2782_v34, %v5540_v8 }
 0xec2   : > { %v4474_v15 = vpack.c.bf16 %v2775_v30, %v2759_v26  ;;  %v4475_v38 = vpack.c.bf16 %v2782_v34, %v2766_v29  ;;  %v3510_v3 = vpack.c.bf16 %v3506_v59, %v3506_v59  ;;  %v3960_v59 = vsub.s32 4, %v6169_v14 }
 0xec3   : > { %v4476_v39 = vpack.c.bf16 %v2785_v37, %v2783_v35  ;;  %v4477_v21 = vpack.c.bf16 %v2786_v16, %v2784_v36  ;;  %v3909_v35 = vsel %vm1639_vm2, %v3762_v31, 0 }
 0xec4   : > { %v3520_v23 = vrot.slane %v4474_v15, %v6204_v45  ;;  %v3528_v41 = vrot.slane %v4475_v38, %v6204_v45 }
 0xec5   : > { %v3545_v42 = vrot.slane %v4476_v39, %v6204_v45  ;;  %v3553_v17 = vrot.slane %v4477_v21, %v6204_v45 }
 0xec6   : > { %v3529_v46 = vcombine.low %v3520_v23, %v3528_v41 }
 0xec7   : > { %v3554_v47 = vcombine.low %v3545_v42, %v3553_v17 }
 0xec8   : > { %v3536_v44 = vrot.slane %v3529_v46, %v6210_v52 }
 0xec9   : > { %v3561_v50 = vrot.slane %v3554_v47, %v6210_v52 }
 0xeca   : > { %v3537_v53 = vcombine.high %v3536_v44, %v5548_v49  ;;  %v3566_v56 = vshrl.u32 %v3536_v44, 16 }
 0xecb   : > { %v3565_v54 = vpack.i.b16 %v3561_v50, %v3536_v44  ;;  %v3567_v20 = vshrl.u32 %v3561_v50, 16  ;;  %v3562_v58 = vcombine.high %v3561_v50, %v5548_v49 }
 0xecc   : > { %v3572_v45 = vshrl.u32 %v3537_v53, 16 }
 0xecd   : > { %v3579_v60 = vsel %vm1639_vm2, %v3565_v54, 0  ;;  %v3568_v61 = vpack.i.b16 %v3567_v20, %v3566_v56  ;;  %v3571_v62 = vpack.i.b16 %v3562_v58, %v3537_v53  ;;  %v3573_v63 = vshrl.u32 %v3562_v58, 16 }
 0xece   : > { %4696 = vmatpush3.bf16.msra.mxu1 %v3579_v60 }
 0xecf   : > { %v3625_v52 = vsel %vm1639_vm2, %v3568_v61, 0  ;;  %4707 = vmatprep.subr.bf16.mxu1 %v5540_v8  ;;  %v3574_v55 = vpack.i.b16 %v3573_v63, %v3572_v45  ;;  %v3671_v49 = vsel %vm1639_vm2, %v3571_v62, 0 }
 0xed0   : > { %4702 = vmatpush3.bf16.msra.mxu0 %v3625_v52 }
 0xed1   : > { %4698 = vmatmul.mubr.msk.bf16.vlgmr.msra.gmra.mrb[44].mxu1 %vm1635_vm3, %v3509_v2  ;;  %4713 = vmatprep.subr.bf16.mxu0 %v5540_v8  ;;  %v3717_v57 = vsel %vm1639_vm2, %v3574_v55, 0  ;;  %v3961_v2 = vrot.slane %v6390_v10, %v3960_v59  ;;  %v4950_v10 = vld [vmem:[#allocation22] sm:$0xff]  }
 0xed2   : > { %4708 = vmatpush3.bf16.msra.mxu1 %v3671_v49  ;;  %4709 = vmatprep.mubr.msk.bf16.mxu1 %vm5541_vm1, %v5540_v8 }
 0xed3   : > { %4704 = vmatmul.mubr.msk.bf16.vlgmr.msra.gmra.mrb[36].mxu0 %vm1635_vm3, %v3510_v3  ;;  %4719 = vmatprep.subr.bf16.mxu1 %v5540_v8 }
 0xed4   : > { %4714 = vmatpush3.bf16.msra.mxu0 %v3717_v57  ;;  %4715 = vmatprep.mubr.msk.bf16.mxu0 %vm5541_vm1, %v5540_v8 }
 0xed5   : > { %4725 = vmatprep.subr.bf16.mxu0 %v5540_v8 }
 0xee7   : > { %v3497_v4 = vpop.xlane.xlu1 %3496 }
 0xee8   : > { %4988 = vrcp.f32 %v3497_v4 }
 0xee9   : > { %v3500_v5 = vpop.xlane.xlu0 %3499 }
 0xeea   : > { %4990 = vrcp.f32 %v3500_v5 }
 0xef2   : > { %v4989_v6 = vpop.eup %4988 }
 0xef3   : > { %v3507_v9 = vmul.f32 %v4989_v6, %v6528_v0  ;;  %v3760_v0 = vld [vmem:[#allocation19 + $0x4] sm:$0xf] }
 0xef4   : > { %v4991_v11 = vpop.eup %4990  ;;  %v3817_v22 = vsel %vm1639_vm2, %v3760_v0, 0  ;;  %v4951_v0 = vld [vmem:[#allocation22 + $0x8] sm:$0xff]  }
 0xef5   : > { %v3508_v27 = vmul.f32 %v4991_v11, %v6530_v1  ;;  %v3511_v12 = vpack.c.bf16 %v3507_v9, %v3507_v9  ;;  %v3761_v1 = vld [vmem:[#allocation19 + $0x8] sm:$0xf] }
 0xef6   : > { %v3863_v24 = vsel %vm1639_vm2, %v3761_v1, 0  ;;  %v4953_v1 = vld [vmem:[#allocation25 + $0x8] sm:$0xff]  }
 0xef7   : > { %4710 = vmatmul.mubr.msk.bf16.vlgmr.msra.gmra.mrb[48].mxu1 %vm1635_vm3, %v3511_v12  ;;  %v3512_v13 = vpack.c.bf16 %v3508_v27, %v3508_v27 }
 0xef8   : > { %4721 = vmatprep.mubr.msk.bf16.mxu1 %vm5541_vm1, %v5540_v8  ;;  %4720 = vmatpush3.bf16.msra.mxu1 %v3771_v19 }
 0xef9   : > { %4716 = vmatmul.mubr.msk.bf16.vlgmr.msra.gmra.mrb[40].mxu0 %vm1635_vm3, %v3512_v13  ;;  %4731 = vmatprep.subr.bf16.mxu1 %v5540_v8 }
 0xefa   : > { %4727 = vmatprep.mubr.msk.bf16.mxu0 %vm5541_vm1, %v5540_v8  ;;  %4726 = vmatpush3.bf16.msra.mxu0 %v3817_v22  ;;  %v4952_v22 = vld [vmem:[#allocation25] sm:$0xff]  }
 0xefb   : > { %4737 = vmatprep.subr.bf16.mxu0 %v5540_v8 }
 0xfa4   : > { %v3615_v32 = vpop.f32.mrb[44].mxu1 }
 0xfa5   : > { %v3763_v33 = vpack.c.bf16 %v3615_v32, %v3615_v32  ;;  %v4699_v7 = vpop.f32.mrb[45].mxu1 }
 0xfa6   : > { %v3618_v25 = vpop.f32.mrb[46].mxu1  ;;  %v3661_v26 = vpop.f32.mrb[36].mxu0  ;;  %v3980_v7 = vrot.slane %v6422_v28, %v3960_v59 }
 0xfa7   : > { %v3764_v29 = vpack.c.bf16 %v3661_v26, %v3661_v26  ;;  %v4700_v30 = vpop.f32.mrb[47].mxu1  ;;  %v4705_v34 = vpop.f32.mrb[37].mxu0  ;;  %4722 = vmatmul.mubr.msk.bf16.vlgmr.msra.gmra.mrb[52].mxu1 %vm1635_vm3, %v3763_v33  ;;  %v3984_v33 = vsub.s32 5, %v6169_v14  ;;  %v4486_v14 = vld [vmem:[#allocation23] ss:$0 sm:$0xff] }
 0xfa8   : > { %v3664_v36 = vpop.f32.mrb[38].mxu0  ;;  %4732 = vmatpush3.bf16.msra.mxu1 %v3863_v24  ;;  %4733 = vmatprep.mubr.msk.bf16.mxu1 %vm5541_vm1, %v5540_v8 }
 0xfa9   : > { %v4706_v37 = vpop.f32.mrb[39].mxu0  ;;  %4728 = vmatmul.mubr.msk.bf16.vlgmr.msra.gmra.mrb[44].mxu0 %vm1635_vm3, %v3764_v29  ;;  %4743 = vmatprep.subr.bf16.mxu1 %v5540_v8  ;;  %v3985_v26 = vrot.slane %v6422_v28, %v3984_v33  ;;  %v4955_v36 = vld [vmem:[#allocation25 + $0x18] sm:$0xff]  }
 0xfaa   : > { %4738 = vmatpush3.bf16.msra.mxu0 %v3909_v35  ;;  %4739 = vmatprep.mubr.msk.bf16.mxu0 %vm5541_vm1, %v5540_v8  ;;  %v4954_v35 = vld [vmem:[#allocation25 + $0x10] sm:$0xff]  }
 0xfab   : > { %4751 = vmatprep.subr.bf16.mxu0 %v5540_v8 }
 0xfca   : > { %v3707_v16 = vpop.f32.mrb[48].mxu1 }
 0xfcb   : > { %v3765_v15 = vpack.c.bf16 %v3707_v16, %v3707_v16  ;;  %v4711_v38 = vpop.f32.mrb[49].mxu1 }
 0xfcc   : > { %v3710_v39 = vpop.f32.mrb[50].mxu1  ;;  %v3753_v21 = vpop.f32.mrb[40].mxu0 }
 0xfcd   : > { %v3766_v23 = vpack.c.bf16 %v3753_v21, %v3753_v21  ;;  %v4712_v41 = vpop.f32.mrb[51].mxu1  ;;  %v4717_v42 = vpop.f32.mrb[41].mxu0  ;;  %4734 = vmatmul.mubr.msk.bf16.vlgmr.msra.gmra.mrb[56].mxu1 %vm1635_vm3, %v3765_v15 }
 0xfce   : > { %v3756_v17 = vpop.f32.mrb[42].mxu0  ;;  %4747 = vmatprep.mubr.msk.bf16.mxu1 %vm5541_vm1, %v5540_v8  ;;  %4744 = vmatpush3.bf16.msra.mxu1 %v4950_v10 }
 0xfcf   : > { %v4718_v43 = vpop.f32.mrb[43].mxu0  ;;  %4740 = vmatmul.mubr.msk.bf16.vlgmr.msra.gmra.mrb[48].mxu0 %vm1635_vm3, %v3766_v23  ;;  %4745 = vmatprep.subr.bf16.mxu1 %v5540_v8  ;;  %v4996_v23 = vld [vmem:[#allocation20] sm:$0x3f] }
 0xfd0   : > { %4759 = vmatprep.mubr.msk.bf16.mxu0 %vm5541_vm1, %v5540_v8  ;;  %4752 = vmatpush3.bf16.msra.mxu0 %v4952_v22  ;;  %v4067_v41 = vrot.slane %v4996_v23, %v3984_v33 }
 0xfd1   : > { %4753 = vmatprep.subr.bf16.mxu0 %v5540_v8 }
 0xfd2   : > { %4746 = vmatpush3.bf16.msra.mxu1 %v4951_v0 }
 0xfd4   : > { %4754 = vmatpush3.bf16.msra.mxu0 %v4953_v1 }
 0xfd5   : > { %4755 = vmatprep.subr.bf16.mxu0 %v5540_v8 }
 0xfd8   : > { %4756 = vmatpush3.bf16.msra.mxu0 %v4954_v35 }
 0xfd9   : > { %4757 = vmatprep.subr.bf16.mxu0 %v5540_v8 }
 0xfdc   : > { %4758 = vmatpush3.bf16.msra.mxu0 %v4955_v36 }
0x107a   : > { %v3807_v46 = vpop.f32.mrb[52].mxu1 }
0x107b   : > { %v4723_v47 = vpop.f32.mrb[53].mxu1  ;;  %v3951_v50 = vsel %vm795_vm0, %v3807_v46, 0.0 }
0x107c   : > { %v3810_v48 = vpop.f32.mrb[54].mxu1  ;;  %v3853_v44 = vpop.f32.mrb[44].mxu0 }
0x107d   : > { %v3952_v51 = vsel %vm795_vm0, %v3853_v44, 0.0  ;;  %v4724_v53 = vpop.f32.mrb[55].mxu1  ;;  %v4729_v54 = vpop.f32.mrb[45].mxu0 }
0x107e   : > { %v3953_v56 = vadd.f32 %v3952_v51, %v3951_v50  ;;  %v3856_v20 = vpop.f32.mrb[46].mxu0 }
0x107f   : > { %v4730_v58 = vpop.f32.mrb[47].mxu0 }
0x10a0   : > { %v3899_v45 = vpop.f32.mrb[56].mxu1 }
0x10a1   : > { %v3954_v60 = vsel %vm795_vm0, %v3899_v45, 0.0  ;;  %v4735_v61 = vpop.f32.mrb[57].mxu1 }
0x10a2   : > { %v3955_v62 = vadd.f32 %v3954_v60, %v3953_v56  ;;  %v3902_v63 = vpop.f32.mrb[58].mxu1  ;;  %v3945_v52 = vpop.f32.mrb[48].mxu0 }
0x10a3   : > { %v3956_v55 = vsel %vm795_vm0, %v3945_v52, 0.0  ;;  %v4736_v49 = vpop.f32.mrb[59].mxu1  ;;  %v4741_v3 = vpop.f32.mrb[49].mxu0 }
0x10a4   : > { %v3957_v57 = vadd.f32 %v3956_v55, %v3955_v62  ;;  %v3948_v4 = vpop.f32.mrb[50].mxu0 }
0x10a5   : > { %v4742_v5 = vpop.f32.mrb[51].mxu0 }
0x10a6   : > { %v3962_v6 = vadd.f32 %v3961_v2, %v3957_v57 }
0x10a8   : > { %v3963_v9 = vadd.f32 %v3962_v6, %v6398_v40 }
0x10aa   : > { %v3964_v11 = vsel %vm795_vm0, %v3963_v9, 0.0 }
0x10ab   : > { %3965 = vadd.xlane.f32.xlu0 %v3964_v11 }
0x1138   : > { %v3966_v27 = vpop.xlane.xlu0 %3965 }
0x1139   : > { %v3967_v12 = vmul.f32 0.03125, %v3966_v27 }
0x113b   : > { %v3968_v13 = vsub.f32 %v3963_v9, %v3967_v12 }
0x113d   : > { %v3969_v18 = vmul.f32 %v3968_v13, %v3968_v13 }
0x113f   : > { %v3970_v19 = vsel %vm795_vm0, %v3969_v18, 0.0 }
0x1140   : > { %3971 = vadd.xlane.f32.xlu1 %v3970_v19 }
0x11cd   : > { %v3972_v40 = vpop.xlane.xlu1 %3971 }
0x11ce   : > { %v3973_v32 = vmul.f32 0.03125, %v3972_v40 }
0x11d0   : > { %v3974_v31 = vadd.f32 1e-06, %v3973_v32 }
0x11d2   : > { %4992 = vrsqrt.f32 %v3974_v31 }
0x11dc   : > { %v4993_v24 = vpop.eup %4992 }
0x11dd   : > { %v3976_v25 = vmul.f32 %v4993_v24, %v3968_v13 }
0x11df   : > { %v3981_v29 = vmul.f32 %v3980_v7, %v3976_v25 }
0x11e1   : > { %v3986_v30 = vadd.f32 %v3985_v26, %v3981_v29 }
0x11e3   : > { %v3987_v34 = vpack.c.bf16 %v3986_v30, %v3986_v30 }
0x11e5   : > { %4748 = vmatmul.mubr.msk.bf16.vlgmr.msra.gmra.mrb[60].mxu1 %vm795_vm0, %v3987_v34 }
0x12b8   : > { %v4048_v37 = vpop.f32.mrb[60].mxu1 }
0x12b9   : > { %v4049_v16 = vadd.f32 %v4486_v14, %v4048_v37  ;;  %v4749_v15 = vpop.f32.mrb[61].mxu1 }
0x12ba   : > { %v4051_v38 = vpop.f32.mrb[62].mxu1 }
0x12bb   : > { %v4054_v39 = vmax.f32 %v4049_v16, 0.0  ;;  %v4750_v28 = vpop.f32.mrb[63].mxu1 }
0x12bd   : > { %v4055_v21 = vpack.c.bf16 %v4054_v39, %v4054_v39 }
0x12bf   : > { %4760 = vmatmul.mubr.msk.bf16.vlgmr.msra.gmra.mrb[52].mxu0 %vm4092_vm6, %v4055_v21 }
0x1392   : > { %v4130_v42 = vpop.f32.mrb[52].mxu0 }
0x1393   : > { %v4131_v8 = vadd.f32 %v4130_v42, %v4067_v41  ;;  %v4761_v17 = vpop.f32.mrb[53].mxu0 }
0x1394   : > { %v4133_v43 = vpop.f32.mrb[54].mxu0 }
0x1395   : > { %v4136_v46 = vadd.f32 %v4131_v8, %v3963_v9  ;;  %v4762_v47 = vpop.f32.mrb[55].mxu0 }
0x1397   : > { %4137 = vst.msk [vmem:[%s782_s21] sm:$0xff] %vm795_vm0, %v4136_v46 }
0x1398   : > { %5440 = shalt.err (!%p5437_p12)
}
0x1399   : > { %s5441_s11 = scalar_lea.hbm %s6622_s8, 128  ;;  %s5445_s23 = scalar_lea.hbm %s6790_s13, 256 }
0x139a   : > { %p5442_p7 = scmp.ne.s32.totalorder %s6622_s8, %s5441_s11  ;;  %p5446_p6 = scmp.lt.u32.totalorder %s6622_s8, %s6790_s13 }
0x139b   : > { %p5447_p10 = scmp.lt.u32.totalorder %s5445_s23, %s5441_s11  ;;  %p5449_p0 = scmp.lt.u32.totalorder %s5441_s11, %s6622_s8 }
0x139c   : > { %p5443_p1 = pnand %p5442_p7, %p6791_p5 }
0x139d   : > { %p5448_p8 = por %p5447_p10, %p5446_p6 }
0x139e   : > { %p5444_p11 = pneg %p5443_p1 }
0x139f   : > { %p5450_p13 = por %p5449_p0, %p5448_p8 }
0x13a1   : > { %p5451_p9 = pnand %p5450_p13, %p5444_p11 }
0x13a3   : > { %5454 = shalt.err (!%p5451_p9)
}
0x13a4   : > { %4813 = dma.vmem_to_hbm [thread:$0]  (%p6791_p5), %s6624_s0, 128, %s6622_s8, %s4139_s7  }
0x13a5 PF: > { %s6792_s3 = sld [smem:[#allocation36_spill]]  ;;  %s6793_s29 = sld [smem:[#allocation44_spill]] }
0x13a6   : > { %s6794_s5 = sld [smem:[#allocation38_spill]] }
0x13ab   : > { %s4164_s15 = sand.u32 1, %s6792_s3   ;;  %p6795_p2 = scmp.ne.s32.totalorder %s6793_s29, 0 }
0x13ac   : > { %p6796_p3 = scmp.ge.s32.totalorder %s6794_s5, 2  ;;  %s4165_s27 = scalar_lea.sflag [#allocation4], %s4164_s15 }
0x13ae   : > { %p4863_p4 = pnand %p6796_p3, %p6795_p2 }
0x13b0   : > { %5504 = dma.done.wait (!%p4863_p4), %s4165_s27, 128  }
0x13b1   : > { %5506 = vsyncadd (!%p4863_p4), %s4165_s27, 4294967168  ;;  %s6797_s21 = sld [smem:[#allocation41_spill]]  ;;  %s6798_s24 = sld [smem:[#allocation37_spill]] }
0x13b2   : > { %s6799_s20 = sld [smem:[#allocation42_spill]]  ;;  %s6800_s18 = smov %s5513_s19 }
0x13b7   : > { %p39_p12 = scmp.ge.s32.totalorder %s6797_s21, 4   ;;  %s6801_s19 = smov %s6798_s24 }
0x13b9   :  { %41 = sbr.rel (!%p39_p12) target bundleno = 30 (0x1e), region = 215 }
0x13c0   :  { %4170 = vsyncpa [#allocation3], 1 }
0x13c1   :  { %4172 = vsyncpa [#allocation3 + $0x1], 1 }
0x13c2   :  { %4173 = vsyncpa [#allocation6], 1 }
0x13c3   :  { %4175 = vsyncpa [#allocation6 + $0x1], 1 }
0x13c4   :  { %4176 = vsyncpa [#allocation9], 1 }
0x13c5   :  { %4178 = vsyncpa [#allocation9 + $0x1], 1 }
0x13c6   :  { %4179 = vsyncpa [#allocation12], 1 }
0x13c7   :  { %4180 = vsyncpa [#allocation15], 1 }
0x13c8   :  { %4181 = vsyncpa [#allocation18], 1 }
0x13c9   :  { %4182 = vsyncpa [#allocation21], 1 }
0x13ca   :  { %4183 = vsyncpa [#allocation24], 1 }
0x13cb   :  { %4184 = vsyncpa [#allocation4], 1 }
0x13cc   :  { %4186 = vsyncpa [#allocation4 + $0x1], 1 }

</bundles_post_ra>
